<compile_context>
chip_gen: v7x
topology: tpu7x:2x2x1
jax: 0.10.0
libtpu: 0.0.40
codegen_flags: <defaults>
</compile_context>

<pallas_src>
import jax
import jax.numpy as jnp
from jax.experimental import pallas as pl
from jax.experimental.pallas import tpu as pltpu


# -------------------------- Fused decoder kernel ------------------------------
def _decoder_kernel(x_ref, w1_ref, b1_ref, w2_ref, b2_ref,
                    d1w_ref, d1b_ref, d2w_ref, d2b_ref, d3w_ref, d3b_ref,
                    o_ref, rows_ref):
    # x: (Bp, 256) bf16            w1: (256, 512) bf16   b1: (1, 512) f32
    # w2: (512, tn) bf16 tile      b2: (1, tn) f32 tile  (NHWC column order)
    # d1w: (128, 256) bf16, d2w: (256, 512) bf16, d3w: (512, 64) bf16 (+f32 biases)
    # o:  (pp*Bp, 64) f32 tile     rows scratch: (pp*Bp, 128) f32
    bp = x_ref.shape[0]
    pp = w2_ref.shape[1] // 128          # complete pixels in this fc2 column tile

    # fc1 (tiny, recomputed per tile so every grid step is independent) + fc2 tile.
    h1 = jnp.dot(x_ref[...], w1_ref[...], preferred_element_type=jnp.float32)
    h1 = jnp.maximum(h1 + b1_ref[...], 0.0).astype(jnp.bfloat16)
    h2 = jnp.dot(h1, w2_ref[...], preferred_element_type=jnp.float32)
    h2 = jnp.maximum(h2 + b2_ref[...], 0.0)

    # NHWC columns -> per-(pixel, batch) rows: 8-aligned full-lane f32 stores.
    for p in range(pp):
        rows_ref[p * bp:(p + 1) * bp, :] = h2[:, p * 128:(p + 1) * 128]
    rows = rows_ref[...].astype(jnp.bfloat16)

    # deconv1/2/3 as per-row matmuls (bf16 operands, f32 accumulate) + sigmoid.
    y = jnp.dot(rows, d1w_ref[...], preferred_element_type=jnp.float32)
    y = jnp.maximum(y + d1b_ref[...], 0.0).astype(jnp.bfloat16)
    y = jnp.dot(y, d2w_ref[...], preferred_element_type=jnp.float32)
    y = jnp.maximum(y + d2b_ref[...], 0.0).astype(jnp.bfloat16)
    y = jnp.dot(y, d3w_ref[...], preferred_element_type=jnp.float32)
    o_ref[...] = jax.nn.sigmoid(y + d3b_ref[...])


def decoder_fused(x_bf16, prep, *, tn=2048):
    """Fused fc1+fc2+deconv1/2/3+sigmoid.

    Returns (64*Bp, 64) rows; row = pixel*Bp + b, pixel = h8*8 + w8,
    columns = (k1i, k1j, k2i, k2j, k3i, k3j) of the pixel's 8x8 output patch.
    """
    Bp, K1 = x_bf16.shape
    H = prep["fc1_w"].shape[1]
    N = prep["fc2_w"].shape[1]
    n_patch = prep["d3_w"].shape[1]
    assert Bp % 8 == 0 and N % tn == 0 and tn % 128 == 0
    pp = tn // 128                      # pixels per grid step
    n_pix = N // 128                    # 64 pixels total
    # NOTE: whole (padded) batch is held in one block; tile the batch axis as
    # well if B ever grows to thousands of rows (VMEM).
    return pl.pallas_call(
        _decoder_kernel,
        out_shape=jax.ShapeDtypeStruct((n_pix * Bp, n_patch), jnp.float32),
        grid_spec=pltpu.PrefetchScalarGridSpec(
            num_scalar_prefetch=0,
            grid=(N // tn,),
            in_specs=[
                pl.BlockSpec((Bp, K1), lambda j: (0, 0)),
                pl.BlockSpec((K1, H), lambda j: (0, 0)),
                pl.BlockSpec((1, H), lambda j: (0, 0)),
                pl.BlockSpec((H, tn), lambda j: (0, j)),   # streamed fc2 weight
                pl.BlockSpec((1, tn), lambda j: (0, j)),
                pl.BlockSpec(prep["d1_w"].shape, lambda j: (0, 0)),  # resident
                pl.BlockSpec(prep["d1_b"].shape, lambda j: (0, 0)),
                pl.BlockSpec(prep["d2_w"].shape, lambda j: (0, 0)),
                pl.BlockSpec(prep["d2_b"].shape, lambda j: (0, 0)),
                pl.BlockSpec(prep["d3_w"].shape, lambda j: (0, 0)),
                pl.BlockSpec(prep["d3_b"].shape, lambda j: (0, 0)),
            ],
            out_specs=pl.BlockSpec((pp * Bp, n_patch), lambda j: (j, 0)),
            scratch_shapes=[pltpu.VMEM((pp * Bp, 128), jnp.float32)],
        ),
        compiler_params=pltpu.CompilerParams(dimension_semantics=("parallel",)),
    )(x_bf16, prep["fc1_w"], prep["fc1_b"], prep["fc2_w"], prep["fc2_b"],
      prep["d1_w"], prep["d1_b"], prep["d2_w"], prep["d2_b"],
      prep["d3_w"], prep["d3_b"])


# ----------------------------- Parameters -------------------------------------
def init_params(key):
    """Deterministic synthetic parameters matching Decoder2D.__init__ shapes."""
    ks = jax.random.split(key, 10)

    def normal(k, shape, scale):
        return (scale * jax.random.normal(k, shape)).astype(jnp.float32)

    return {
        "fc1_w": normal(ks[0], (256, 512), 1.0 / 16.0),          # (in, out)
        "fc1_b": normal(ks[1], (512,), 0.02),
        "fc2_w": normal(ks[2], (512, 128 * 8 * 8), 1.0 / 22.6),  # (in, out)
        "fc2_b": normal(ks[3], (128 * 8 * 8,), 0.02),
        "d1_w": normal(ks[4], (128, 64, 2, 2), 1.0 / 22.6),      # (Cin, Cout, 2, 2)
        "d1_b": normal(ks[5], (64,), 0.02),
        "d2_w": normal(ks[6], (64, 32, 2, 2), 1.0 / 16.0),
        "d2_b": normal(ks[7], (32,), 0.02),
        "d3_w": normal(ks[8], (32, 1, 2, 2), 1.0 / 11.3),
        "d3_b": normal(ks[9], (1,), 0.02),
    }


def _flatten_deconv_w(w):
    # (Cin, Cout, 2, 2) -> (Cin, (ki, kj, co)): channels stay lane-minor.
    cin, cout = w.shape[0], w.shape[1]
    return jnp.transpose(w, (0, 2, 3, 1)).reshape(cin, 4 * cout)


def prepare_params(p):
    """One-time (outside jit) repacking: bf16 weights everywhere, NHWC fc2
    column order, flattened + block-diagonal deconv weights."""
    f32, bf16 = jnp.float32, jnp.bfloat16
    # fc2 columns permuted (c,h,w) -> (h,w,c): each 128-column group is one pixel.
    w2 = p["fc2_w"].reshape(512, 128, 8, 8).transpose(0, 2, 3, 1).reshape(512, -1)
    b2 = p["fc2_b"].reshape(128, 8, 8).transpose(1, 2, 0).reshape(1, -1)

    d1w = _flatten_deconv_w(p["d1_w"])                                      # (128, 256)
    d2w = jnp.kron(jnp.eye(4, dtype=f32), _flatten_deconv_w(p["d2_w"]))     # (256, 512)
    d3w = jnp.kron(jnp.eye(16, dtype=f32), _flatten_deconv_w(p["d3_w"]))    # (512, 64)

    return {
        "fc1_w": p["fc1_w"].astype(bf16),
        "fc1_b": p["fc1_b"].reshape(1, -1).astype(f32),
        "fc2_w": w2.astype(bf16),
        "fc2_b": b2.astype(f32),
        "d1_w": d1w.astype(bf16),
        "d1_b": jnp.tile(p["d1_b"], 4).reshape(1, -1).astype(f32),
        "d2_w": d2w.astype(bf16),
        "d2_b": jnp.tile(p["d2_b"], 16).reshape(1, -1).astype(f32),
        "d3_w": d3w.astype(bf16),
        "d3_b": jnp.tile(p["d3_b"], 64).reshape(1, -1).astype(f32),
    }


# ------------------------------- Forward ---------------------------------------
@jax.jit
def decoder2d_forward(x, prep):
    B = x.shape[0]
    Bp = max(8, ((B + 7) // 8) * 8)              # sublane-aligned batch
    xp = x.astype(jnp.bfloat16)
    if Bp != B:
        xp = jnp.pad(xp, ((0, Bp - B), (0, 0)))
    rows = decoder_fused(xp, prep)               # (64*Bp, 64)
    # rows: (h8, w8, b) major-to-minor; cols (k1i,k1j,k2i,k2j,k3i,k3j).
    y = rows.reshape(8, 8, Bp, 2, 2, 2, 2, 2, 2)
    y = jnp.transpose(y, (2, 0, 3, 5, 7, 1, 4, 6, 8))
    return y.reshape(Bp, 64, 64)[:B].reshape(B, 1, 64, 64)


# ----------------------- Pure-JAX reference (f32) -------------------------------
def decoder2d_reference(x, p):
    h = jnp.maximum(x @ p["fc1_w"] + p["fc1_b"], 0.0)
    h = jnp.maximum(h @ p["fc2_w"] + p["fc2_b"], 0.0)
    f = h.reshape(-1, 128, 8, 8)

    def deconv(xin, w, b):
        bb, _, hh, ww = xin.shape
        cout = w.shape[1]
        y = jnp.einsum("bcij,cokl->boikjl", xin, w)
        return y.reshape(bb, cout, 2 * hh, 2 * ww) + b[None, :, None, None]

    f = jnp.maximum(deconv(f, p["d1_w"], p["d1_b"]), 0.0)
    f = jnp.maximum(deconv(f, p["d2_w"], p["d2_b"]), 0.0)
    return jax.nn.sigmoid(deconv(f, p["d3_w"], p["d3_b"]))


if __name__ == "__main__":
    key = jax.random.PRNGKey(0)
    k_param, k_x = jax.random.split(key)
    params = init_params(k_param)
    prep = prepare_params(params)
    x = jax.random.normal(k_x, (2, 256), dtype=jnp.float32)

    out = decoder2d_forward(x, prep)
    out = jax.block_until_ready(out)

    assert out.shape == (2, 1, 64, 64), out.shape
    assert out.dtype == jnp.float32
    assert bool(jnp.all(jnp.isfinite(out)))
    assert bool(jnp.all((out >= 0.0) & (out <= 1.0)))  # sigmoid output range

    ref = decoder2d_reference(x, params)
    max_err = float(jnp.max(jnp.abs(out - ref)))
    assert max_err < 4e-2, max_err  # bf16 weights + bf16 deconv path vs f32 ref
    print("KERNEL_OK")
</pallas_src>

<mosaic_0001>
module attributes {stable_mosaic.version = 11 : i64} {
  func.func @_decoder_kernel(%arg0: i32, %arg1: memref<8x256xbf16, #tpu.memory_space<vmem>>, %arg2: memref<256x512xbf16, #tpu.memory_space<vmem>>, %arg3: memref<1x512xf32, #tpu.memory_space<vmem>>, %arg4: memref<512x2048xbf16, #tpu.memory_space<vmem>>, %arg5: memref<1x2048xf32, #tpu.memory_space<vmem>>, %arg6: memref<128x256xbf16, #tpu.memory_space<vmem>>, %arg7: memref<1x256xf32, #tpu.memory_space<vmem>>, %arg8: memref<256x512xbf16, #tpu.memory_space<vmem>>, %arg9: memref<1x512xf32, #tpu.memory_space<vmem>>, %arg10: memref<512x64xbf16, #tpu.memory_space<vmem>>, %arg11: memref<1x64xf32, #tpu.memory_space<vmem>>, %arg12: memref<128x64xf32, #tpu.memory_space<vmem>>, %arg13: memref<128x128xf32, #tpu.memory_space<vmem>>) attributes {dimension_semantics = [#tpu.dimension_semantics<parallel>], iteration_bounds = array<i64: 4>, scalar_prefetch = 0 : i64, scratch_operands = 1 : i64, tpu.core_type = #tpu.core_type<tc>, window_params = [{pipeline_mode = #tpu.pipeline_mode<synchronous>, transform_indices = @transform_0, window_bounds = array<i64: 8, 256>}, {pipeline_mode = #tpu.pipeline_mode<synchronous>, transform_indices = @transform_1, window_bounds = array<i64: 256, 512>}, {pipeline_mode = #tpu.pipeline_mode<synchronous>, transform_indices = @transform_2, window_bounds = array<i64: 1, 512>}, {transform_indices = @transform_3, window_bounds = array<i64: 512, 2048>}, {transform_indices = @transform_4, window_bounds = array<i64: 1, 2048>}, {pipeline_mode = #tpu.pipeline_mode<synchronous>, transform_indices = @transform_5, window_bounds = array<i64: 128, 256>}, {pipeline_mode = #tpu.pipeline_mode<synchronous>, transform_indices = @transform_6, window_bounds = array<i64: 1, 256>}, {pipeline_mode = #tpu.pipeline_mode<synchronous>, transform_indices = @transform_7, window_bounds = array<i64: 256, 512>}, {pipeline_mode = #tpu.pipeline_mode<synchronous>, transform_indices = @transform_8, window_bounds = array<i64: 1, 512>}, {pipeline_mode = #tpu.pipeline_mode<synchronous>, transform_indices = @transform_9, window_bounds = array<i64: 512, 64>}, {pipeline_mode = #tpu.pipeline_mode<synchronous>, transform_indices = @transform_10, window_bounds = array<i64: 1, 64>}, {transform_indices = @transform_11, window_bounds = array<i64: 128, 64>}]} {
    %c0 = arith.constant 0 : index
    %c0_0 = arith.constant 0 : index
    %0 = vector.load %arg1[%c0, %c0_0] : memref<8x256xbf16, #tpu.memory_space<vmem>>, vector<8x256xbf16>
    %c0_1 = arith.constant 0 : index
    %c0_2 = arith.constant 0 : index
    %1 = vector.load %arg2[%c0_1, %c0_2] : memref<256x512xbf16, #tpu.memory_space<vmem>>, vector<256x512xbf16>
    %cst = arith.constant dense<0.000000e+00> : vector<8x512xf32>
    %2 = tpu.matmul %0, %1, %cst {dimension_numbers = #tpu.dot_dimension_numbers<[1], [0], [0], [1], [0, 0, 1, 1], [], []>} : vector<8x256xbf16>, vector<256x512xbf16>, vector<8x512xf32> -> vector<8x512xf32>
    %c0_3 = arith.constant 0 : index
    %c0_4 = arith.constant 0 : index
    %3 = vector.load %arg3[%c0_3, %c0_4] : memref<1x512xf32, #tpu.memory_space<vmem>>, vector<1x512xf32>
    %4 = vector.broadcast %3 : vector<1x512xf32> to vector<8x512xf32>
    %5 = arith.addf %2, %4 : vector<8x512xf32>
    %cst_5 = arith.constant 0.000000e+00 : f32
    %6 = vector.broadcast %cst_5 : f32 to vector<8x512xf32>
    %7 = arith.maximumf %5, %6 : vector<8x512xf32>
    %8 = arith.truncf %7 : vector<8x512xf32> to vector<8x512xbf16>
    %c0_6 = arith.constant 0 : index
    %c0_7 = arith.constant 0 : index
    %9 = vector.load %arg4[%c0_6, %c0_7] : memref<512x2048xbf16, #tpu.memory_space<vmem>>, vector<512x2048xbf16>
    %cst_8 = arith.constant dense<0.000000e+00> : vector<8x2048xf32>
    %10 = tpu.matmul %8, %9, %cst_8 {dimension_numbers = #tpu.dot_dimension_numbers<[1], [0], [0], [1], [0, 0, 1, 1], [], []>} : vector<8x512xbf16>, vector<512x2048xbf16>, vector<8x2048xf32> -> vector<8x2048xf32>
    %c0_9 = arith.constant 0 : index
    %c0_10 = arith.constant 0 : index
    %11 = vector.load %arg5[%c0_9, %c0_10] : memref<1x2048xf32, #tpu.memory_space<vmem>>, vector<1x2048xf32>
    %12 = vector.broadcast %11 : vector<1x2048xf32> to vector<8x2048xf32>
    %13 = arith.addf %10, %12 : vector<8x2048xf32>
    %cst_11 = arith.constant 0.000000e+00 : f32
    %14 = vector.broadcast %cst_11 : f32 to vector<8x2048xf32>
    %15 = arith.maximumf %13, %14 : vector<8x2048xf32>
    %16 = vector.extract_strided_slice %15 {offsets = [0, 0], sizes = [8, 128], strides = [1, 1]} : vector<8x2048xf32> to vector<8x128xf32>
    %c0_12 = arith.constant 0 : index
    %c0_13 = arith.constant 0 : index
    %17 = vector.load %arg13[%c0_12, %c0_13] : memref<128x128xf32, #tpu.memory_space<vmem>>, vector<8x128xf32>
    tpu.vector_store %arg13[%c0_12, %c0_13], %16 {strides = array<i32>} : memref<128x128xf32, #tpu.memory_space<vmem>>, vector<8x128xf32>,
    %18 = vector.extract_strided_slice %15 {offsets = [0, 128], sizes = [8, 128], strides = [1, 1]} : vector<8x2048xf32> to vector<8x128xf32>
    %c8 = arith.constant 8 : index
    %c0_14 = arith.constant 0 : index
    %19 = vector.load %arg13[%c8, %c0_14] : memref<128x128xf32, #tpu.memory_space<vmem>>, vector<8x128xf32>
    tpu.vector_store %arg13[%c8, %c0_14], %18 {strides = array<i32>} : memref<128x128xf32, #tpu.memory_space<vmem>>, vector<8x128xf32>,
    %20 = vector.extract_strided_slice %15 {offsets = [0, 256], sizes = [8, 128], strides = [1, 1]} : vector<8x2048xf32> to vector<8x128xf32>
    %c16 = arith.constant 16 : index
    %c0_15 = arith.constant 0 : index
    %21 = vector.load %arg13[%c16, %c0_15] : memref<128x128xf32, #tpu.memory_space<vmem>>, vector<8x128xf32>
    tpu.vector_store %arg13[%c16, %c0_15], %20 {strides = array<i32>} : memref<128x128xf32, #tpu.memory_space<vmem>>, vector<8x128xf32>,
    %22 = vector.extract_strided_slice %15 {offsets = [0, 384], sizes = [8, 128], strides = [1, 1]} : vector<8x2048xf32> to vector<8x128xf32>
    %c24 = arith.constant 24 : index
    %c0_16 = arith.constant 0 : index
    %23 = vector.load %arg13[%c24, %c0_16] : memref<128x128xf32, #tpu.memory_space<vmem>>, vector<8x128xf32>
    tpu.vector_store %arg13[%c24, %c0_16], %22 {strides = array<i32>} : memref<128x128xf32, #tpu.memory_space<vmem>>, vector<8x128xf32>,
    %24 = vector.extract_strided_slice %15 {offsets = [0, 512], sizes = [8, 128], strides = [1, 1]} : vector<8x2048xf32> to vector<8x128xf32>
    %c32 = arith.constant 32 : index
    %c0_17 = arith.constant 0 : index
    %25 = vector.load %arg13[%c32, %c0_17] : memref<128x128xf32, #tpu.memory_space<vmem>>, vector<8x128xf32>
    tpu.vector_store %arg13[%c32, %c0_17], %24 {strides = array<i32>} : memref<128x128xf32, #tpu.memory_space<vmem>>, vector<8x128xf32>,
    %26 = vector.extract_strided_slice %15 {offsets = [0, 640], sizes = [8, 128], strides = [1, 1]} : vector<8x2048xf32> to vector<8x128xf32>
    %c40 = arith.constant 40 : index
    %c0_18 = arith.constant 0 : index
    %27 = vector.load %arg13[%c40, %c0_18] : memref<128x128xf32, #tpu.memory_space<vmem>>, vector<8x128xf32>
    tpu.vector_store %arg13[%c40, %c0_18], %26 {strides = array<i32>} : memref<128x128xf32, #tpu.memory_space<vmem>>, vector<8x128xf32>,
    %28 = vector.extract_strided_slice %15 {offsets = [0, 768], sizes = [8, 128], strides = [1, 1]} : vector<8x2048xf32> to vector<8x128xf32>
    %c48 = arith.constant 48 : index
    %c0_19 = arith.constant 0 : index
    %29 = vector.load %arg13[%c48, %c0_19] : memref<128x128xf32, #tpu.memory_space<vmem>>, vector<8x128xf32>
    tpu.vector_store %arg13[%c48, %c0_19], %28 {strides = array<i32>} : memref<128x128xf32, #tpu.memory_space<vmem>>, vector<8x128xf32>,
    %30 = vector.extract_strided_slice %15 {offsets = [0, 896], sizes = [8, 128], strides = [1, 1]} : vector<8x2048xf32> to vector<8x128xf32>
    %c56 = arith.constant 56 : index
    %c0_20 = arith.constant 0 : index
    %31 = vector.load %arg13[%c56, %c0_20] : memref<128x128xf32, #tpu.memory_space<vmem>>, vector<8x128xf32>
    tpu.vector_store %arg13[%c56, %c0_20], %30 {strides = array<i32>} : memref<128x128xf32, #tpu.memory_space<vmem>>, vector<8x128xf32>,
    %32 = vector.extract_strided_slice %15 {offsets = [0, 1024], sizes = [8, 128], strides = [1, 1]} : vector<8x2048xf32> to vector<8x128xf32>
    %c64 = arith.constant 64 : index
    %c0_21 = arith.constant 0 : index
    %33 = vector.load %arg13[%c64, %c0_21] : memref<128x128xf32, #tpu.memory_space<vmem>>, vector<8x128xf32>
    tpu.vector_store %arg13[%c64, %c0_21], %32 {strides = array<i32>} : memref<128x128xf32, #tpu.memory_space<vmem>>, vector<8x128xf32>,
    %34 = vector.extract_strided_slice %15 {offsets = [0, 1152], sizes = [8, 128], strides = [1, 1]} : vector<8x2048xf32> to vector<8x128xf32>
    %c72 = arith.constant 72 : index
    %c0_22 = arith.constant 0 : index
    %35 = vector.load %arg13[%c72, %c0_22] : memref<128x128xf32, #tpu.memory_space<vmem>>, vector<8x128xf32>
    tpu.vector_store %arg13[%c72, %c0_22], %34 {strides = array<i32>} : memref<128x128xf32, #tpu.memory_space<vmem>>, vector<8x128xf32>,
    %36 = vector.extract_strided_slice %15 {offsets = [0, 1280], sizes = [8, 128], strides = [1, 1]} : vector<8x2048xf32> to vector<8x128xf32>
    %c80 = arith.constant 80 : index
    %c0_23 = arith.constant 0 : index
    %37 = vector.load %arg13[%c80, %c0_23] : memref<128x128xf32, #tpu.memory_space<vmem>>, vector<8x128xf32>
    tpu.vector_store %arg13[%c80, %c0_23], %36 {strides = array<i32>} : memref<128x128xf32, #tpu.memory_space<vmem>>, vector<8x128xf32>,
    %38 = vector.extract_strided_slice %15 {offsets = [0, 1408], sizes = [8, 128], strides = [1, 1]} : vector<8x2048xf32> to vector<8x128xf32>
    %c88 = arith.constant 88 : index
    %c0_24 = arith.constant 0 : index
    %39 = vector.load %arg13[%c88, %c0_24] : memref<128x128xf32, #tpu.memory_space<vmem>>, vector<8x128xf32>
    tpu.vector_store %arg13[%c88, %c0_24], %38 {strides = array<i32>} : memref<128x128xf32, #tpu.memory_space<vmem>>, vector<8x128xf32>,
    %40 = vector.extract_strided_slice %15 {offsets = [0, 1536], sizes = [8, 128], strides = [1, 1]} : vector<8x2048xf32> to vector<8x128xf32>
    %c96 = arith.constant 96 : index
    %c0_25 = arith.constant 0 : index
    %41 = vector.load %arg13[%c96, %c0_25] : memref<128x128xf32, #tpu.memory_space<vmem>>, vector<8x128xf32>
    tpu.vector_store %arg13[%c96, %c0_25], %40 {strides = array<i32>} : memref<128x128xf32, #tpu.memory_space<vmem>>, vector<8x128xf32>,
    %42 = vector.extract_strided_slice %15 {offsets = [0, 1664], sizes = [8, 128], strides = [1, 1]} : vector<8x2048xf32> to vector<8x128xf32>
    %c104 = arith.constant 104 : index
    %c0_26 = arith.constant 0 : index
    %43 = vector.load %arg13[%c104, %c0_26] : memref<128x128xf32, #tpu.memory_space<vmem>>, vector<8x128xf32>
    tpu.vector_store %arg13[%c104, %c0_26], %42 {strides = array<i32>} : memref<128x128xf32, #tpu.memory_space<vmem>>, vector<8x128xf32>,
    %44 = vector.extract_strided_slice %15 {offsets = [0, 1792], sizes = [8, 128], strides = [1, 1]} : vector<8x2048xf32> to vector<8x128xf32>
    %c112 = arith.constant 112 : index
    %c0_27 = arith.constant 0 : index
    %45 = vector.load %arg13[%c112, %c0_27] : memref<128x128xf32, #tpu.memory_space<vmem>>, vector<8x128xf32>
    tpu.vector_store %arg13[%c112, %c0_27], %44 {strides = array<i32>} : memref<128x128xf32, #tpu.memory_space<vmem>>, vector<8x128xf32>,
    %46 = vector.extract_strided_slice %15 {offsets = [0, 1920], sizes = [8, 128], strides = [1, 1]} : vector<8x2048xf32> to vector<8x128xf32>
    %c120 = arith.constant 120 : index
    %c0_28 = arith.constant 0 : index
    %47 = vector.load %arg13[%c120, %c0_28] : memref<128x128xf32, #tpu.memory_space<vmem>>, vector<8x128xf32>
    tpu.vector_store %arg13[%c120, %c0_28], %46 {strides = array<i32>} : memref<128x128xf32, #tpu.memory_space<vmem>>, vector<8x128xf32>,
    %c0_29 = arith.constant 0 : index
    %c0_30 = arith.constant 0 : index
    %48 = vector.load %arg13[%c0_29, %c0_30] : memref<128x128xf32, #tpu.memory_space<vmem>>, vector<128x128xf32>
    %49 = arith.truncf %48 : vector<128x128xf32> to vector<128x128xbf16>
    %c0_31 = arith.constant 0 : index
    %c0_32 = arith.constant 0 : index
    %50 = vector.load %arg6[%c0_31, %c0_32] : memref<128x256xbf16, #tpu.memory_space<vmem>>, vector<128x256xbf16>
    %cst_33 = arith.constant dense<0.000000e+00> : vector<128x256xf32>
    %51 = tpu.matmul %49, %50, %cst_33 {dimension_numbers = #tpu.dot_dimension_numbers<[1], [0], [0], [1], [0, 0, 1, 1], [], []>} : vector<128x128xbf16>, vector<128x256xbf16>, vector<128x256xf32> -> vector<128x256xf32>
    %c0_34 = arith.constant 0 : index
    %c0_35 = arith.constant 0 : index
    %52 = vector.load %arg7[%c0_34, %c0_35] : memref<1x256xf32, #tpu.memory_space<vmem>>, vector<1x256xf32>
    %53 = vector.broadcast %52 : vector<1x256xf32> to vector<128x256xf32>
    %54 = arith.addf %51, %53 : vector<128x256xf32>
    %cst_36 = arith.constant 0.000000e+00 : f32
    %55 = vector.broadcast %cst_36 : f32 to vector<128x256xf32>
    %56 = arith.maximumf %54, %55 : vector<128x256xf32>
    %57 = arith.truncf %56 : vector<128x256xf32> to vector<128x256xbf16>
    %c0_37 = arith.constant 0 : index
    %c0_38 = arith.constant 0 : index
    %58 = vector.load %arg8[%c0_37, %c0_38] : memref<256x512xbf16, #tpu.memory_space<vmem>>, vector<256x512xbf16>
    %cst_39 = arith.constant dense<0.000000e+00> : vector<128x512xf32>
    %59 = tpu.matmul %57, %58, %cst_39 {dimension_numbers = #tpu.dot_dimension_numbers<[1], [0], [0], [1], [0, 0, 1, 1], [], []>} : vector<128x256xbf16>, vector<256x512xbf16>, vector<128x512xf32> -> vector<128x512xf32>
    %c0_40 = arith.constant 0 : index
    %c0_41 = arith.constant 0 : index
    %60 = vector.load %arg9[%c0_40, %c0_41] : memref<1x512xf32, #tpu.memory_space<vmem>>, vector<1x512xf32>
    %61 = vector.broadcast %60 : vector<1x512xf32> to vector<128x512xf32>
    %62 = arith.addf %59, %61 : vector<128x512xf32>
    %cst_42 = arith.constant 0.000000e+00 : f32
    %63 = vector.broadcast %cst_42 : f32 to vector<128x512xf32>
    %64 = arith.maximumf %62, %63 : vector<128x512xf32>
    %65 = arith.truncf %64 : vector<128x512xf32> to vector<128x512xbf16>
    %c0_43 = arith.constant 0 : index
    %c0_44 = arith.constant 0 : index
    %66 = vector.load %arg10[%c0_43, %c0_44] : memref<512x64xbf16, #tpu.memory_space<vmem>>, vector<512x64xbf16>
    %cst_45 = arith.constant dense<0.000000e+00> : vector<128x64xf32>
    %67 = tpu.matmul %65, %66, %cst_45 {dimension_numbers = #tpu.dot_dimension_numbers<[1], [0], [0], [1], [0, 0, 1, 1], [], []>} : vector<128x512xbf16>, vector<512x64xbf16>, vector<128x64xf32> -> vector<128x64xf32>
    %c0_46 = arith.constant 0 : index
    %c0_47 = arith.constant 0 : index
    %68 = vector.load %arg11[%c0_46, %c0_47] : memref<1x64xf32, #tpu.memory_space<vmem>>, vector<1x64xf32>
    %69 = vector.broadcast %68 : vector<1x64xf32> to vector<128x64xf32>
    %70 = arith.addf %67, %69 : vector<128x64xf32>
    %71 = arith.negf %70 : vector<128x64xf32>
    %72 = math.exp %71 : vector<128x64xf32>
    %cst_48 = arith.constant 1.000000e+00 : f32
    %73 = vector.broadcast %cst_48 : f32 to vector<128x64xf32>
    %74 = arith.addf %73, %72 : vector<128x64xf32>
    %75 = arith.divf %73, %74 : vector<128x64xf32>
    %c0_49 = arith.constant 0 : index
    %c0_50 = arith.constant 0 : index
    %76 = vector.load %arg12[%c0_49, %c0_50] : memref<128x64xf32, #tpu.memory_space<vmem>>, vector<128x64xf32>
    tpu.vector_store %arg12[%c0_49, %c0_50], %75 {strides = array<i32>} : memref<128x64xf32, #tpu.memory_space<vmem>>, vector<128x64xf32>,
    return
  }
  func.func @transform_0(%arg0: i32) -> (i32, i32) {
    %c0_i32 = arith.constant 0 : i32
    %c0_i32_0 = arith.constant 0 : i32
    %c0_i32_1 = arith.constant 0 : i32
    return %c0_i32, %c0_i32_0 : i32, i32
  }
  func.func @transform_1(%arg0: i32) -> (i32, i32) {
    %c0_i32 = arith.constant 0 : i32
    %c0_i32_0 = arith.constant 0 : i32
    %c0_i32_1 = arith.constant 0 : i32
    return %c0_i32, %c0_i32_0 : i32, i32
  }
  func.func @transform_2(%arg0: i32) -> (i32, i32) {
    %c0_i32 = arith.constant 0 : i32
    %c0_i32_0 = arith.constant 0 : i32
    %c0_i32_1 = arith.constant 0 : i32
    return %c0_i32, %c0_i32_0 : i32, i32
  }
  func.func @transform_3(%arg0: i32) -> (i32, i32) {
    %c0_i32 = arith.constant 0 : i32
    %c0_i32_0 = arith.constant 0 : i32
    return %c0_i32, %arg0 : i32, i32
  }
  func.func @transform_4(%arg0: i32) -> (i32, i32) {
    %c0_i32 = arith.constant 0 : i32
    %c0_i32_0 = arith.constant 0 : i32
    return %c0_i32, %arg0 : i32, i32
  }
  func.func @transform_5(%arg0: i32) -> (i32, i32) {
    %c0_i32 = arith.constant 0 : i32
    %c0_i32_0 = arith.constant 0 : i32
    %c0_i32_1 = arith.constant 0 : i32
    return %c0_i32, %c0_i32_0 : i32, i32
  }
  func.func @transform_6(%arg0: i32) -> (i32, i32) {
    %c0_i32 = arith.constant 0 : i32
    %c0_i32_0 = arith.constant 0 : i32
    %c0_i32_1 = arith.constant 0 : i32
    return %c0_i32, %c0_i32_0 : i32, i32
  }
  func.func @transform_7(%arg0: i32) -> (i32, i32) {
    %c0_i32 = arith.constant 0 : i32
    %c0_i32_0 = arith.constant 0 : i32
    %c0_i32_1 = arith.constant 0 : i32
    return %c0_i32, %c0_i32_0 : i32, i32
  }
  func.func @transform_8(%arg0: i32) -> (i32, i32) {
    %c0_i32 = arith.constant 0 : i32
    %c0_i32_0 = arith.constant 0 : i32
    %c0_i32_1 = arith.constant 0 : i32
    return %c0_i32, %c0_i32_0 : i32, i32
  }
  func.func @transform_9(%arg0: i32) -> (i32, i32) {
    %c0_i32 = arith.constant 0 : i32
    %c0_i32_0 = arith.constant 0 : i32
    %c0_i32_1 = arith.constant 0 : i32
    return %c0_i32, %c0_i32_0 : i32, i32
  }
  func.func @transform_10(%arg0: i32) -> (i32, i32) {
    %c0_i32 = arith.constant 0 : i32
    %c0_i32_0 = arith.constant 0 : i32
    %c0_i32_1 = arith.constant 0 : i32
    return %c0_i32, %c0_i32_0 : i32, i32
  }
  func.func @transform_11(%arg0: i32) -> (i32, i32) {
    %c0_i32 = arith.constant 0 : i32
    %c0_i32_0 = arith.constant 0 : i32
    return %arg0, %c0_i32 : i32, i32
  }
}

</mosaic_0001>

<bundles_post_ra>
// kernel: decoder2d_forward.1
= control target key start
LH: loop header
LB: loop body
LE: loop exit
PB: predicated region body
PF: predicated region fallthrough
CT: control target
= control target key end

     0   :  { %s9717_s0 = inlined_call_operand.vmem [shape: bf16[8,256], index: 0, kind: input, shape index: {}]   ;;  %s9718_s1 = inlined_call_operand.hbm [shape: bf16[256,512], index: 1, kind: input, shape index: {}]   ;;  %s9719_s2 = inlined_call_operand.hbm [shape: f32[1,512], index: 2, kind: input, shape index: {}]   ;;  %s9720_s3 = inlined_call_operand.hbm [shape: bf16[512,8192], index: 3, kind: input, shape index: {}]   ;;  %s9721_s4 = inlined_call_operand.hbm [shape: f32[1,8192], index: 4, kind: input, shape index: {}]   ;;  %s9722_s5 = inlined_call_operand.hbm [shape: bf16[128,256], index: 5, kind: input, shape index: {}]   ;;  %s9723_s6 = inlined_call_operand.hbm [shape: f32[1,256], index: 6, kind: input, shape index: {}]   ;;  %s9724_s7 = inlined_call_operand.hbm [shape: bf16[256,512], index: 7, kind: input, shape index: {}]   ;;  %s9725_s8 = inlined_call_operand.hbm [shape: f32[1,512], index: 8, kind: input, shape index: {}]   ;;  %s9726_s9 = inlined_call_operand.vmem [shape: bf16[512,64], index: 9, kind: input, shape index: {}]   ;;  %s9727_s10 = inlined_call_operand.hbm [shape: f32[1,64], index: 10, kind: input, shape index: {}]   ;;  %s9728_s11 = inlined_call_operand.vmem [shape: f32[512,64], index: 11, kind: output, shape index: {}]  }
   0x1   :  { %9741 = sst [smem:[#allocation23_spill]] %s9717_s0 }
   0x2   :  { %9742 = sst [smem:[#allocation24_spill]] %s9718_s1 }
   0x3   :  { %9743 = sst [smem:[#allocation25_spill]] %s9719_s2 }
   0x4   :  { %9744 = sst [smem:[#allocation26_spill]] %s9720_s3 }
   0x5   :  { %9745 = sst [smem:[#allocation27_spill]] %s9723_s6 }
   0x6   :  { %9746 = sst [smem:[#allocation28_spill]] %s9725_s8 }
   0x7   :  { %9747 = sst [smem:[#allocation29_spill]] %s9726_s9 }
   0x8   :  { %9748 = sst [smem:[#allocation30_spill]] %s9728_s11 }
   0x9   :  { %16 = vsyncpa [#allocation4], 0 }
   0xa   :  { %17 = vsyncpa [#allocation6], 0 }
   0xb   :  { %18 = vsyncpa [#allocation11], 0 }
   0xc   :  { %19 = vsyncpa [#allocation14], 0  ;;  %s8387_s17 = smov 0   ;;  %s8389_s18 = smov 0  }
   0xd   :  { %s8391_s19 = smov 0   ;;  %s8393_s20 = smov 0  }
   0xe LB: > { %s8310_s21 = smov [#allocation3]   ;;  %s8408_s23 = sadd.s32 4294967295, %s8308_s20   ;;  %s8308_s20 = sphi %s8393_s20, %s9787_s20   ;;  %s8304_s19 = sphi %s8391_s19, %s9786_s19   ;;  %s8300_s18 = sphi %s8389_s18, %s9785_s18   ;;  %s8296_s17 = sphi %s8387_s17, %s9784_s17  }
   0xf   : > { %s312_s22 = sshll.u32 %s8310_s21, 4  ;;  %p6631_p0 = scmp.ge.s32.totalorder %s8308_s20, 1  ;;  %s8413_s22 = int_to_ptr.vmem [resolvable:$true] %s312_s22 }
  0x10   : > { %p9730_p1 = scmp.eq.s32.totalorder %s8408_s23, 0  ;;  %p297_p2 = scmp.lt.s32.totalorder %s8308_s20, 5 }
  0x11   : > { %s8311_s25 = smov [#allocation5]   ;;  %s8312_s28 = smov [#allocation10]  }
  0x12   : > { %p8415_p3 = pnand %p6631_p0, %p297_p2  ;;  %s326_s26 = sshll.u32 %s8311_s25, 4  ;;  %s8427_s26 = int_to_ptr.vmem [resolvable:$true] %s326_s26 }
  0x13   : > { %s350_s29 = sshll.u32 %s8312_s28, 4  ;;  %s9751_s1 = sld [smem:[#allocation24_spill]]  ;;  %s8429_s29 = int_to_ptr.vmem [resolvable:$true] %s350_s29 }
  0x14   : > { %s9749_s24 = scalar_select %p8415_p3, 1, 0 }
  0x15   : > { %p7593_p4 = pneg %p8415_p3 }
  0x17   : > { %p8423_p5 = pnand %p7593_p4, %p9730_p1 }
  0x19   : > { %s9750_s27 = scalar_select %p8423_p5, 1, 0 }
  0x1a   : > { %s7998_s13 = scalar_lea.hbm %s9751_s1, 8192  ;;  %p8439_p7 = pneg %p8423_p5 }
  0x1b   : > { %p7999_p6 = scmp.ne.s32.totalorder %s9751_s1, %s7998_s13  ;;  %p8005_p10 = scmp.lt.u32.totalorder %s7998_s13, %s9751_s1 }
  0x1d   : > { %p8001_p8 = pnand %p8439_p7, %p7999_p6 }
  0x1f   : > { %p8002_p9 = pneg %p8001_p8 }
  0x21   : > { %p8007_p11 = pnand %p8005_p10, %p8002_p9 }
  0x23   : > { %8010 = shalt.err (!%p8007_p11)
}
  0x24   : > { %s8011_s28 = scalar_lea.vmem %s8413_s22, 8192  ;;  %p8019_p2 = scmp.lt.s32.totalorder %s8413_s22, %s8413_s22 }
  0x25   : > { %p8012_p12 = scmp.ne.s32.totalorder %s8413_s22, %s8011_s28  ;;  %p8020_p4 = scmp.lt.s32.totalorder %s8011_s28, %s8011_s28 }
  0x27   : > { %p8014_p13 = pnand %p8012_p12, %p8439_p7  ;;  %p8021_p6 = por %p8020_p4, %p8019_p2 }
  0x29   : > { %p8015_p0 = pneg %p8014_p13 }
  0x2b   : > { %p8022_p8 = pnand %p8021_p6, %p8015_p0 }
  0x2d   : > { %8025 = shalt.err (!%p8022_p8)
}
  0x2e   : > { %s9733_s30 = smov 256   ;;  %s9737_s12 = smov 16  }
  0x2f   : > { %7596 = dma.hbm_to_vmem [thread:$0]  (!%p8423_p5), %s9751_s1, 8192, %s8413_s22, [#allocation4], %s9733_s30, %s9733_s30, %s9737_s12  }
  0x30   : > { %s9753_s2 = sld [smem:[#allocation25_spill]] }
  0x36   : > { %s8026_s25 = scalar_lea.hbm %s9753_s2, 64 }
  0x37   : > { %p8027_p9 = scmp.ne.s32.totalorder %s9753_s2, %s8026_s25  ;;  %p8033_p12 = scmp.lt.u32.totalorder %s8026_s25, %s9753_s2 }
  0x39   : > { %p8029_p10 = pnand %p8027_p9, %p8439_p7 }
  0x3b   : > { %p8030_p11 = pneg %p8029_p10 }
  0x3d   : > { %p8035_p13 = pnand %p8033_p12, %p8030_p11 }
  0x3f   : > { %8038 = shalt.err (!%p8035_p13)
}
  0x40   : > { %s8039_s22 = scalar_lea.vmem %s8427_s26, 64  ;;  %p8047_p6 = scmp.lt.s32.totalorder %s8427_s26, %s8427_s26 }
  0x41   : > { %p8040_p0 = scmp.ne.s32.totalorder %s8427_s26, %s8039_s22  ;;  %p8048_p8 = scmp.lt.s32.totalorder %s8039_s22, %s8039_s22 }
  0x43   : > { %p8042_p2 = pnand %p8040_p0, %p8439_p7  ;;  %p8049_p9 = por %p8048_p8, %p8047_p6 }
  0x45   : > { %p8043_p4 = pneg %p8042_p2 }
  0x47   : > { %p8050_p10 = pnand %p8049_p9, %p8043_p4 }
  0x49   : > { %8053 = shalt.err (!%p8050_p10)
}
  0x4a   : > { %7599 = dma.hbm_to_vmem [thread:$0]  (!%p8423_p5), %s9753_s2, 64, %s8427_s26, [#allocation6]  }
  0x4b   : > { %s9754_s6 = sld [smem:[#allocation27_spill]] }
  0x51   : > { %s8054_s14 = scalar_lea.hbm %s9754_s6, 32 }
  0x52   : > { %p8055_p11 = scmp.ne.s32.totalorder %s9754_s6, %s8054_s14  ;;  %p8061_p0 = scmp.lt.u32.totalorder %s8054_s14, %s9754_s6 }
  0x54   : > { %p8057_p12 = pnand %p8055_p11, %p8439_p7 }
  0x56   : > { %p8058_p13 = pneg %p8057_p12 }
  0x58   : > { %p8063_p2 = pnand %p8061_p0, %p8058_p13 }
  0x5a   : > { %8066 = shalt.err (!%p8063_p2)
}
  0x5b   : > { %s8067_s26 = scalar_lea.vmem %s8429_s29, 32  ;;  %p8075_p9 = scmp.lt.s32.totalorder %s8429_s29, %s8429_s29 }
  0x5c   : > { %p8068_p4 = scmp.ne.s32.totalorder %s8429_s29, %s8067_s26  ;;  %p8076_p10 = scmp.lt.s32.totalorder %s8067_s26, %s8067_s26 }
  0x5e   : > { %p8070_p6 = pnand %p8068_p4, %p8439_p7  ;;  %p8077_p11 = por %p8076_p10, %p8075_p9 }
  0x60   : > { %p8071_p8 = pneg %p8070_p6 }
  0x62   : > { %p8078_p12 = pnand %p8077_p11, %p8071_p8 }
  0x64   : > { %8081 = shalt.err (!%p8078_p12)
}
  0x65   : > { %7605 = dma.hbm_to_vmem [thread:$0]  (!%p8423_p5), %s9754_s6, 32, %s8429_s29, [#allocation11]  }
  0x66   : > { %s8315_s9 = smov [#allocation13]   ;;  %s9755_s8 = sld [smem:[#allocation28_spill]] }
  0x67   : > { %s374_s11 = sshll.u32 %s8315_s9, 4  ;;  %s375_s11 = int_to_ptr.vmem [resolvable:$true] %s374_s11 }
  0x6c   : > { %s8082_s15 = scalar_lea.hbm %s9755_s8, 64 }
  0x6d   : > { %p8083_p13 = scmp.ne.s32.totalorder %s9755_s8, %s8082_s15  ;;  %p8089_p4 = scmp.lt.u32.totalorder %s8082_s15, %s9755_s8 }
  0x6f   : > { %p8085_p0 = pnand %p8083_p13, %p8439_p7 }
  0x71   : > { %p8086_p2 = pneg %p8085_p0 }
  0x73   : > { %p8091_p6 = pnand %p8089_p4, %p8086_p2 }
  0x75   : > { %8094 = shalt.err (!%p8091_p6)
}
  0x76   : > { %s8095_s29 = scalar_lea.vmem %s375_s11, 64  ;;  %p8103_p11 = scmp.lt.s32.totalorder %s375_s11, %s375_s11 }
  0x77   : > { %p8096_p8 = scmp.ne.s32.totalorder %s375_s11, %s8095_s29  ;;  %p8104_p12 = scmp.lt.s32.totalorder %s8095_s29, %s8095_s29 }
  0x79   : > { %p8098_p9 = pnand %p8096_p8, %p8439_p7  ;;  %p8105_p1 = por %p8104_p12, %p8103_p11 }
  0x7b   : > { %p8099_p10 = pneg %p8098_p9 }
  0x7d   : > { %p8106_p3 = pnand %p8105_p1, %p8099_p10 }
  0x7f   : > { %8109 = shalt.err (!%p8106_p3)
}
  0x80   : > { %7611 = dma.hbm_to_vmem [thread:$0]  (!%p8423_p5), %s9755_s8, 64, %s375_s11, [#allocation14]  }
  0x81   : > { %s8528_s9 = sadd.s32 1, %s8308_s20   ;;  %s95_s13 = sadd.s32 1, %s8304_s19 }
  0x82   : > { %s92_s14 = ssub.s32 %s8308_s20, %s8528_s9  ;;  %p102_p1 = scmp.ne.s32.totalorder %s8304_s19, %s8300_s18 }
  0x83   : > { %p93_p3 = scmp.eq.s32.totalorder %s92_s14, 0  ;;  %p103_p13 = scmp.eq.s32.totalorder %s8308_s20, 0 }
  0x84   : > { %p108_p0 = scmp.ne.s32.totalorder %s8300_s18, %s8296_s17  ;;  %p7629_p2 = scmp.lt.s32.totalorder %s8308_s20, 4 }
  0x85   : > { %s8540_s15 = scalar_select %p93_p3, %s8304_s19, %s95_s13  }
  0x86   : > { %p104_p4 = por %p103_p13, %p102_p1  ;;  %p9757_p6 = scmp.eq.s32.totalorder %s8408_s23, 0 }
  0x87   : > { %9756 = sst [smem:[#allocation22_spill]] %s8540_s15  ;;  %s399_s25 = sand.u32 1, %s8308_s20  }
  0x88   : > { %p8544_p8 = por %p9757_p6, %p108_p0  ;;  %s9732_s11 = sand.u32 1, %s8304_s19  }
  0x89   : > { %s6640_s28 = sshll.u32 %s9732_s11, 12  ;;  %s7367_s26 = sshll.u32 %s8308_s20, 10 }
  0x8a   : > { %s9758_s21 = scalar_select %p8544_p8, 1, 0 }
  0x8b   : > { %s9759_s3 = sld [smem:[#allocation26_spill]]  ;;  %s403_s17 = scalar_lea.vmem [#allocation7], %s6640_s28 }
  0x8c   : > { %s410_s13 = sshll.u32 %s403_s17, 4  ;;  %p8560_p9 = pnand %p7629_p2, %p104_p4  ;;  %s8558_s13 = int_to_ptr.vmem [resolvable:$true] %s410_s13 }
  0x8d   : > { %s8564_s11 = scalar_lea.sflag [#allocation4], %s399_s25 }
  0x8e   : > { %s9760_s14 = scalar_select %p8560_p9, 1, 0 }
  0x8f   : > { %p9738_p11 = pneg %p8560_p9 }
  0x91   : > { %s8556_s0 = scalar_lea.hbm %s9759_s3, %s7367_s26  ;;  %s8115_s29 = scalar_lea.hbm %s9759_s3, 262144 }
  0x92   : > { %s8110_s30 = scalar_lea.hbm %s8556_s0, 65536  ;;  %p8116_p3 = scmp.lt.u32.totalorder %s8556_s0, %s9759_s3 }
  0x93   : > { %p8111_p10 = scmp.ne.s32.totalorder %s8556_s0, %s8110_s30  ;;  %p8117_p13 = scmp.lt.u32.totalorder %s8115_s29, %s8110_s30 }
  0x94   : > { %p8119_p2 = scmp.lt.u32.totalorder %s8110_s30, %s8556_s0 }
  0x95   : > { %p8113_p12 = pnand %p9738_p11, %p8111_p10  ;;  %p8118_p0 = por %p8117_p13, %p8116_p3 }
  0x97   : > { %p8114_p1 = pneg %p8113_p12  ;;  %p8120_p4 = por %p8119_p2, %p8118_p0 }
  0x99   : > { %p8121_p6 = pnand %p8120_p4, %p8114_p1 }
  0x9b   : > { %8124 = shalt.err (!%p8121_p6)
}
  0x9c   : > { %s8125_s25 = scalar_lea.vmem %s8558_s13, 65536  ;;  %s8316_s28 = smov [#allocation7]  }
  0x9d   : > { %p8126_p10 = scmp.ne.s32.totalorder %s8558_s13, %s8125_s25  ;;  %s8130_s26 = sshll.u32 %s8316_s28, 4  ;;  %s8131_s26 = int_to_ptr.vmem [resolvable:$false] %s8130_s26 }
  0x9e   : > { %s8132_s22 = scalar_lea.vmem %s8131_s26, 131072  ;;  %p8133_p5 = scmp.lt.s32.totalorder %s8558_s13, %s8131_s26 }
  0x9f   : > { %p8128_p12 = pnand %p8126_p10, %p9738_p11  ;;  %p8134_p3 = scmp.lt.s32.totalorder %s8132_s22, %s8125_s25 }
  0xa1   : > { %p8129_p8 = pneg %p8128_p12  ;;  %p8135_p13 = por %p8134_p3, %p8133_p5 }
  0xa3   : > { %p8136_p0 = pnand %p8135_p13, %p8129_p8 }
  0xa5   : > { %8139 = shalt.err (!%p8136_p0)
}
  0xa6   : > { %s8317_s30 = smov 4096   ;;  %s8318_s29 = smov 1024  }
  0xa7   : > { %s8319_s17 = smov 64   ;;  %s8320_s12 = smov [#allocation9]  }
  0xa8   : > { %7618 = dma.hbm_to_vmem [thread:$0]  (!%p8560_p9), %s8556_s0, 65536, %s8558_s13, %s8564_s11, %s8317_s30, %s8318_s29, %s8319_s17  }
  0xa9   : > { %s336_s1 = sshll.u32 %s8320_s12, 4  ;;  %s8140_s25 = scalar_lea.hbm %s9722_s5, 2048  ;;  %s337_s1 = int_to_ptr.vmem [resolvable:$true] %s336_s1 }
  0xaa   : > { %p8141_p5 = scmp.ne.s32.totalorder %s9722_s5, %s8140_s25  ;;  %p8147_p2 = scmp.lt.u32.totalorder %s8140_s25, %s9722_s5 }
  0xac   : > { %p8143_p8 = pnand %p8141_p5, %p8439_p7 }
  0xae   : > { %p8144_p1 = pneg %p8143_p8 }
  0xb0   : > { %p8149_p4 = pnand %p8147_p2, %p8144_p1 }
  0xb2   : > { %8152 = shalt.err (!%p8149_p4)
}
  0xb3   : > { %s8153_s0 = scalar_lea.vmem %s337_s1, 2048  ;;  %p8161_p3 = scmp.lt.s32.totalorder %s337_s1, %s337_s1 }
  0xb4   : > { %p8154_p6 = scmp.ne.s32.totalorder %s337_s1, %s8153_s0  ;;  %p8162_p13 = scmp.lt.s32.totalorder %s8153_s0, %s8153_s0 }
  0xb6   : > { %p8156_p10 = pnand %p8154_p6, %p8439_p7  ;;  %p8163_p0 = por %p8162_p13, %p8161_p3 }
  0xb8   : > { %p8157_p12 = pneg %p8156_p10 }
  0xba   : > { %p8164_p11 = pnand %p8163_p0, %p8157_p12 }
  0xbc   : > { %8167 = shalt.err (!%p8164_p11)
}
  0xbd   : > { %s8321_s2 = smov 128   ;;  %s8322_s12 = smov 8  }
  0xbe   : > { %p9761_p5 = scmp.ne.s32.totalorder %s9750_s27, 0  ;;  %s8323_s13 = smov [#allocation12]  }
  0xbf   : > { %s360_s30 = sshll.u32 %s8323_s13, 4  ;;  %s8324_s29 = smov [#allocation15]   ;;  %s361_s30 = int_to_ptr.vmem [resolvable:$true] %s360_s30 }
  0xc0   : > { %7602 = dma.hbm_to_vmem [thread:$0]  (!%p9761_p5), %s9722_s5, 2048, %s337_s1, [#allocation6], %s8321_s2, %s8321_s2, %s8322_s12  }
  0xc1   : > { %s388_s17 = sshll.u32 %s8324_s29, 4  ;;  %s8168_s26 = scalar_lea.hbm %s9724_s7, 8192  ;;  %s389_s17 = int_to_ptr.vmem [resolvable:$true] %s388_s17 }
  0xc2   : > { %p8169_p11 = scmp.ne.s32.totalorder %s9724_s7, %s8168_s26  ;;  %p8175_p2 = scmp.lt.u32.totalorder %s8168_s26, %s9724_s7 }
  0xc4   : > { %p8171_p8 = pnand %p8169_p11, %p8439_p7 }
  0xc6   : > { %p8172_p1 = pneg %p8171_p8 }
  0xc8   : > { %p8177_p4 = pnand %p8175_p2, %p8172_p1 }
  0xca   : > { %8180 = shalt.err (!%p8177_p4)
}
  0xcb   : > { %s8181_s1 = scalar_lea.vmem %s361_s30, 8192  ;;  %p8189_p3 = scmp.lt.s32.totalorder %s361_s30, %s361_s30 }
  0xcc   : > { %p8182_p6 = scmp.ne.s32.totalorder %s361_s30, %s8181_s1  ;;  %p8190_p13 = scmp.lt.s32.totalorder %s8181_s1, %s8181_s1 }
  0xce   : > { %p8184_p10 = pnand %p8182_p6, %p8439_p7  ;;  %p8191_p0 = por %p8190_p13, %p8189_p3 }
  0xd0   : > { %p8185_p12 = pneg %p8184_p10 }
  0xd2   : > { %p8192_p9 = pnand %p8191_p0, %p8185_p12 }
  0xd4   : > { %8195 = shalt.err (!%p8192_p9)
}
  0xd5   : > { %s9762_s2 = smov 16   ;;  %s9763_s12 = smov 256  }
  0xd6   : > { %7608 = dma.hbm_to_vmem [thread:$0]  (!%p9761_p5), %s9724_s7, 8192, %s361_s30, [#allocation11], %s9763_s12, %s9763_s12, %s9762_s2  }
  0xd7   : > { %s9764_s3 = sand.u32 1, %s8304_s19   ;;  %s8196_s28 = scalar_lea.hbm %s9727_s10, 16 }
  0xd8   : > { %s6643_s6 = sshll.u32 %s9764_s3, 4  ;;  %p8197_p9 = scmp.ne.s32.totalorder %s9727_s10, %s8196_s28 }
  0xd9   : > { %p8203_p1 = scmp.lt.u32.totalorder %s8196_s28, %s9727_s10 }
  0xda   : > { %p8199_p11 = pnand %p8197_p9, %p8439_p7 }
  0xdc   : > { %p8200_p8 = pneg %p8199_p11 }
  0xde   : > { %p8205_p2 = pnand %p8203_p1, %p8200_p8 }
  0xe0   : > { %8208 = shalt.err (!%p8205_p2)
}
  0xe1   : > { %s8209_s30 = scalar_lea.vmem %s389_s17, 16  ;;  %s8216_s1 = scalar_lea.vmem %s389_s17, 32 }
  0xe2   : > { %p8210_p4 = scmp.ne.s32.totalorder %s389_s17, %s8209_s30  ;;  %p8217_p12 = scmp.lt.s32.totalorder %s389_s17, %s389_s17 }
  0xe3   : > { %p8218_p3 = scmp.lt.s32.totalorder %s8216_s1, %s8209_s30 }
  0xe4   : > { %p8212_p6 = pnand %p8210_p4, %p8439_p7 }
  0xe5   : > { %p8219_p13 = por %p8218_p3, %p8217_p12 }
  0xe6   : > { %p8213_p10 = pneg %p8212_p6 }
  0xe8   : > { %p8220_p0 = pnand %p8219_p13, %p8213_p10 }
  0xea   : > { %8223 = shalt.err (!%p8220_p0)
}
  0xeb   : > { %7614 = dma.hbm_to_vmem [thread:$0]  (!%p9761_p5), %s9727_s10, 16, %s389_s17, [#allocation14]  }
  0xec   : > { %s7368_s8 = sshll.u32 %s8308_s20, 8  ;;  %s424_s13 = scalar_lea.vmem [#allocation8], %s6643_s6 }
  0xed   : > { %s8655_s16 = scalar_lea.hbm %s9721_s4, %s7368_s8  ;;  %s432_s29 = sshll.u32 %s424_s13, 4  ;;  %s433_s29 = int_to_ptr.vmem [resolvable:$true] %s432_s29 }
  0xee   : > { %s8224_s27 = scalar_lea.hbm %s8655_s16, 256  ;;  %p9765_p9 = scmp.ne.s32.totalorder %s9760_s14, 0 }
  0xef   : > { %p8225_p7 = scmp.ne.s32.totalorder %s8655_s16, %s8224_s27  ;;  %s8229_s28 = scalar_lea.hbm %s9721_s4, 1024 }
  0xf0   : > { %p9766_p11 = pneg %p9765_p9  ;;  %p8230_p5 = scmp.lt.u32.totalorder %s8655_s16, %s9721_s4 }
  0xf1   : > { %p8231_p2 = scmp.lt.u32.totalorder %s8229_s28, %s8224_s27  ;;  %p8233_p6 = scmp.lt.u32.totalorder %s8224_s27, %s8655_s16 }
  0xf2   : > { %p8227_p8 = pnand %p8225_p7, %p9766_p11 }
  0xf3   : > { %p8232_p4 = por %p8231_p2, %p8230_p5 }
  0xf4   : > { %p8228_p1 = pneg %p8227_p8 }
  0xf5   : > { %p8234_p10 = por %p8233_p6, %p8232_p4 }
  0xf7   : > { %p8235_p12 = pnand %p8234_p10, %p8228_p1 }
  0xf9   : > { %8238 = shalt.err (!%p8235_p12)
}
  0xfa   : > { %s8239_s6 = scalar_lea.vmem %s433_s29, 256  ;;  %p9767_p13 = pmov %p9766_p11 }
  0xfb   : > { %p8240_p3 = scmp.ne.s32.totalorder %s433_s29, %s8239_s6  ;;  %s8325_s22 = smov [#allocation8]  }
  0xfc   : > { %s8244_s0 = sshll.u32 %s8325_s22, 4  ;;  %s8245_s0 = int_to_ptr.vmem [resolvable:$false] %s8244_s0 }
  0xfd   : > { %p8242_p0 = pnand %p8240_p3, %p9767_p13  ;;  %s8246_s30 = scalar_lea.vmem %s8245_s0, 512 }
  0xfe   : > { %p8247_p11 = scmp.lt.s32.totalorder %s433_s29, %s8245_s0  ;;  %p8248_p8 = scmp.lt.s32.totalorder %s8246_s30, %s8239_s6 }
  0xff   : > { %p8243_p7 = pneg %p8242_p0 }
 0x100   : > { %p8249_p2 = por %p8248_p8, %p8247_p11 }
 0x102   : > { %p8250_p5 = pnand %p8249_p2, %p8243_p7 }
 0x104   : > { %8253 = shalt.err (!%p8250_p5)
}
 0x105   : > { %7621 = dma.hbm_to_vmem [thread:$0]  (!%p9765_p9), %s8655_s16, 256, %s433_s29, %s8564_s11  }
 0x106   : > { %p9768_p1 = scmp.ne.s32.totalorder %s9749_s24, 0 }
 0x107   : > { %p9769_p4 = scmp.eq.s32.totalorder (!%p9768_p1), %s8408_s23, 0 }
 0x108   : > { %441 = sbr.rel (%p9768_p1) target bundleno = 1955 (0x7a3), region = 64 }
 0x10f   : > { %8271 = dma.done.wait (%p9769_p4), [#allocation4], 8192   ;;  %p9770_p6 = pmov %p9769_p4 }
 0x110   : > { %p9771_p10 = pmov %p9769_p4 }
 0x111   : > { %8273 = vsyncadd (%p9770_p6), [#allocation4], 4294959104 }
 0x112   : > { %8275 = dma.done.wait (%p9771_p10), [#allocation6], 64   ;;  %p9772_p12 = pmov %p9769_p4 }
 0x113   : > { %s451_s14 = sand.u32 1, %s8408_s23   ;;  %s453_s11 = sand.u32 1, %s8300_s18  }
 0x114   : > { %8277 = vsyncadd (%p9772_p12), [#allocation6], 4294967232  ;;  %s6649_s1 = sshll.u32 %s453_s11, 12  ;;  %s452_s24 = scalar_lea.sflag [#allocation4], %s451_s14 }
 0x115   : > { %s8689_s2 = scalar_lea.vmem [#allocation7], %s6649_s1  ;;  %p9773_p9 = scmp.ne.s32.totalorder %s9758_s21, 0 }
 0x117   : > { %8279 = dma.done.wait (%p9773_p9), %s452_s24, 65792  }
 0x118   : > { %8281 = vsyncadd (%p9773_p9), %s452_s24, 4294901504  ;;  %s8695_s12 = sshll.u32 %s453_s11, 4  ;;  %p9774_p3 = pmov %p9769_p4 }
 0x119   : > { %s464_s8 = scalar_lea.vmem [#allocation8], %s8695_s12 }
 0x11a   : > { %8283 = dma.done.wait (%p9774_p3), [#allocation6], 2048   ;;  %p9775_p13 = pmov %p9774_p3 }
 0x11b   : > { %p9776_p0 = pmov %p9774_p3 }
 0x11c   : > { %8285 = vsyncadd (%p9775_p13), [#allocation6], 4294965248 }
 0x11d   : > { %8287 = dma.done.wait (%p9776_p0), [#allocation11], 8224   ;;  %p9777_p7 = pmov %p9776_p0 }
 0x11e   : > { %p9778_p11 = pmov %p9776_p0 }
 0x11f   : > { %8289 = vsyncadd (%p9777_p7), [#allocation11], 4294959072 }
 0x120   : > { %8291 = dma.done.wait (%p9778_p11), [#allocation14], 80   ;;  %p9779_p8 = pmov %p9776_p0 }
 0x121   : > { %v7684_v0 = vld [vmem:[#allocation3 + $0x4] ss:$16 sps:$4 sm:$0xff]   ;;  %v7686_v1 = vld [vmem:[#allocation3] ss:$16 sps:$4 sm:$0xff]   ;;  %v7732_v14 = vld [vmem:[#allocation3 + $0xc] ss:$16 sps:$4 sm:$0xff]  }
 0x122   : > { %8293 = vsyncadd (%p9779_p8), [#allocation14], 4294967216  ;;  %951 = vmatprep.subr.bf16.mxu0 %v7684_v0  ;;  %v7687_v2 = vld [vmem:[#allocation3 + $0x24] ss:$16 sps:$4 sm:$0xff]   ;;  %v7689_v3 = vld [vmem:[#allocation3 + $0x20] ss:$16 sps:$4 sm:$0xff]   ;;  %992 = vmatprep.subr.bf16.mxu1 %v7732_v14 }
 0x123   : > { %952 = vmatpush1.bf16.msra.mxu0 %v7686_v1  ;;  %v7690_v4 = vld [vmem:[#allocation3 + $0x44] ss:$16 sps:$4 sm:$0xff]   ;;  %v7692_v5 = vld [vmem:[#allocation3 + $0x40] ss:$16 sps:$4 sm:$0xff]   ;;  %v7734_v15 = vld [vmem:[#allocation3 + $0x8] ss:$16 sps:$4 sm:$0xff]  }
 0x124   : > { %953 = vmatprep.subr.bf16.mxu0 %v7687_v2  ;;  %v7693_v6 = vld [vmem:[#allocation3 + $0x64] ss:$16 sps:$4 sm:$0xff]   ;;  %v7695_v7 = vld [vmem:[#allocation3 + $0x60] ss:$16 sps:$4 sm:$0xff]   ;;  %s9780_s3 = sld [smem:[#allocation23_spill]]  ;;  %993 = vmatpush1.bf16.msra.mxu1 %v7734_v15  ;;  %s9781_s29 = sld [smem:[#allocation29_spill]] }
 0x125   : > { %v7696_v8 = vld [vmem:[#allocation3 + $0x84] ss:$16 sps:$4 sm:$0xff]   ;;  %v7698_v9 = vld [vmem:[#allocation3 + $0x80] ss:$16 sps:$4 sm:$0xff]   ;;  %v7737_v18 = vld [vmem:[#allocation3 + $0x2c] ss:$16 sps:$4 sm:$0xff]  }
 0x126   : > { %v7699_v10 = vld [vmem:[#allocation3 + $0xa4] ss:$16 sps:$4 sm:$0xff]   ;;  %v7701_v11 = vld [vmem:[#allocation3 + $0xa0] ss:$16 sps:$4 sm:$0xff]   ;;  %v7739_v20 = vld [vmem:[#allocation3 + $0x28] ss:$16 sps:$4 sm:$0xff]   ;;  %994 = vmatprep.subr.bf16.mxu1 %v7737_v18 }
 0x127   : > { %954 = vmatpush1.bf16.msra.mxu0 %v7689_v3  ;;  %v7702_v12 = vld [vmem:[#allocation3 + $0xc4] ss:$16 sps:$4 sm:$0xff]   ;;  %v7704_v13 = vld [vmem:[#allocation3 + $0xc0] ss:$16 sps:$4 sm:$0xff]   ;;  %v7740_v21 = vld [vmem:[#allocation3 + $0x4c] ss:$16 sps:$4 sm:$0xff]  }
 0x128   : > { %955 = vmatprep.subr.bf16.mxu0 %v7690_v4  ;;  %v7705_v19 = vld [vmem:[#allocation3 + $0xe4] ss:$16 sps:$4 sm:$0xff]   ;;  %v7707_v22 = vld [vmem:[#allocation3 + $0xe0] ss:$16 sps:$4 sm:$0xff]   ;;  %995 = vmatpush1.bf16.msra.mxu1 %v7739_v20  ;;  %v7742_v24 = vld [vmem:[#allocation3 + $0x48] ss:$16 sps:$4 sm:$0xff]  }
 0x129   : > { %v7708_v23 = vld [vmem:[#allocation3 + $0x104] ss:$16 sps:$4 sm:$0xff]   ;;  %996 = vmatprep.subr.bf16.mxu1 %v7740_v21  ;;  %v7743_v25 = vld [vmem:[#allocation3 + $0x6c] ss:$16 sps:$4 sm:$0xff]   ;;  %v7710_v26 = vld [vmem:[#allocation3 + $0x100] ss:$16 sps:$4 sm:$0xff]  }
 0x12a   : > { %v8713_v16 = vld [vmem:[%s9780_s3] sm:$0xff]  ;;  %v7745_v28 = vld [vmem:[#allocation3 + $0x68] ss:$16 sps:$4 sm:$0xff]   ;;  %v7746_v29 = vld [vmem:[#allocation3 + $0x8c] ss:$16 sps:$4 sm:$0xff]   ;;  %s6656_s15 = sshll.u32 %s8408_s23, 4 }
 0x12b   : > { %956 = vmatpush1.bf16.msra.mxu0 %v7692_v5  ;;  %v6659_v17 = vcombine.high %v8713_v16, %v8713_v16  ;;  %v7711_v27 = vld [vmem:[#allocation3 + $0x124] ss:$16 sps:$4 sm:$0xff]   ;;  %v7713_v30 = vld [vmem:[#allocation3 + $0x120] ss:$16 sps:$4 sm:$0xff]   ;;  %v7748_v32 = vld [vmem:[#allocation3 + $0x88] ss:$16 sps:$4 sm:$0xff]   ;;  %v8723_v62 = vcombine.low %v8713_v16, %v8713_v16 }
 0x12c   : > { %957 = vmatprep.subr.bf16.mxu0 %v7693_v6  ;;  %997 = vmatpush1.bf16.msra.mxu1 %v7742_v24  ;;  %v7714_v31 = vld [vmem:[#allocation3 + $0x144] ss:$16 sps:$4 sm:$0xff]   ;;  %v7749_v33 = vld [vmem:[#allocation3 + $0xac] ss:$16 sps:$4 sm:$0xff]   ;;  %v7716_v34 = vld [vmem:[#allocation3 + $0x140] ss:$16 sps:$4 sm:$0xff]  }
 0x12d   : > { %983 = vmatprep.mubr.bf16.mxu0 %v6659_v17  ;;  %1024 = vmatprep.mubr.bf16.mxu1 %v6659_v17  ;;  %v7717_v35 = vld [vmem:[#allocation3 + $0x164] ss:$16 sps:$4 sm:$0xff]   ;;  %v7751_v36 = vld [vmem:[#allocation3 + $0xa8] ss:$16 sps:$4 sm:$0xff]   ;;  %v7752_v37 = vld [vmem:[#allocation3 + $0xcc] ss:$16 sps:$4 sm:$0xff]  }
 0x12e   : > { %998 = vmatprep.subr.bf16.mxu1 %v7743_v25  ;;  %v7719_v38 = vld [vmem:[#allocation3 + $0x160] ss:$16 sps:$4 sm:$0xff]   ;;  %v7720_v39 = vld [vmem:[#allocation3 + $0x184] ss:$16 sps:$4 sm:$0xff]   ;;  %v7754_v40 = vld [vmem:[#allocation3 + $0xc8] ss:$16 sps:$4 sm:$0xff]  }
 0x12f   : > { %958 = vmatpush1.bf16.msra.mxu0 %v7695_v7  ;;  %v7755_v41 = vld [vmem:[#allocation3 + $0xec] ss:$16 sps:$4 sm:$0xff]   ;;  %v7722_v42 = vld [vmem:[#allocation3 + $0x180] ss:$16 sps:$4 sm:$0xff]   ;;  %v7723_v43 = vld [vmem:[#allocation3 + $0x1a4] ss:$16 sps:$4 sm:$0xff]  }
 0x130   : > { %959 = vmatprep.subr.bf16.mxu0 %v7696_v8  ;;  %999 = vmatpush1.bf16.msra.mxu1 %v7745_v28  ;;  %v7757_v44 = vld [vmem:[#allocation3 + $0xe8] ss:$16 sps:$4 sm:$0xff]   ;;  %v7758_v45 = vld [vmem:[#allocation3 + $0x10c] ss:$16 sps:$4 sm:$0xff]   ;;  %v7725_v46 = vld [vmem:[#allocation3 + $0x1a0] ss:$16 sps:$4 sm:$0xff]  }
 0x131   : > { %1000 = vmatprep.subr.bf16.mxu1 %v7746_v29  ;;  %v7726_v47 = vld [vmem:[#allocation3 + $0x1c4] ss:$16 sps:$4 sm:$0xff]   ;;  %v7760_v48 = vld [vmem:[#allocation3 + $0x108] ss:$16 sps:$4 sm:$0xff]   ;;  %v7761_v49 = vld [vmem:[#allocation3 + $0x12c] ss:$16 sps:$4 sm:$0xff]  }
 0x132   : > { %v7728_v50 = vld [vmem:[#allocation3 + $0x1c0] ss:$16 sps:$4 sm:$0xff]   ;;  %v7729_v51 = vld [vmem:[#allocation3 + $0x1e4] ss:$16 sps:$4 sm:$0xff]   ;;  %v7763_v52 = vld [vmem:[#allocation3 + $0x128] ss:$16 sps:$4 sm:$0xff]  }
 0x133   : > { %960 = vmatpush1.bf16.msra.mxu0 %v7698_v9  ;;  %v1041_v53 = vld [vmem:[%s8689_s2] sm:$0xff]  ;;  %v7764_v55 = vld [vmem:[#allocation3 + $0x14c] ss:$16 sps:$4 sm:$0xff]   ;;  %v7731_v56 = vld [vmem:[#allocation3 + $0x1e0] ss:$16 sps:$4 sm:$0xff]   ;;  %p531_p2 = scmp.lt.s32.totalorder %s6656_s15, 63 }
 0x134   : > { %961 = vmatprep.subr.bf16.mxu0 %v7699_v10  ;;  %1001 = vmatpush1.bf16.msra.mxu1 %v7748_v32  ;;  %v1049_v54 = vld [vmem:[%s8689_s2 + $0x40] sm:$0xff]  ;;  %v7767_v59 = vld [vmem:[#allocation3 + $0x16c] ss:$16 sps:$4 sm:$0xff]   ;;  %s9782_s13 = sld [smem:[#allocation30_spill]]  ;;  %vm6459_vm0 = vcmask 523264  }
 0x135   : > { %1002 = vmatprep.subr.bf16.mxu1 %v7749_v33  ;;  %v7766_v57 = vld [vmem:[#allocation3 + $0x148] ss:$16 sps:$4 sm:$0xff]   ;;  %v6725_v58 = vcombine.high %v1041_v53, %v1049_v54  ;;  %v6724_v0 = vcombine.low %v1041_v53, %v1049_v54  ;;  %v7770_v3 = vld [vmem:[#allocation3 + $0x18c] ss:$16 sps:$4 sm:$0xff]   ;;  %s9789_s15 = smov (!%p531_p2, %s6656_s15), 63 }
 0x136   : > { %v1057_v60 = vld [vmem:[%s8689_s2 + $0x80] sm:$0xff]  ;;  %v7773_v9 = vld [vmem:[#allocation3 + $0x1ac] ss:$16 sps:$4 sm:$0xff]   ;;  %s6657_s23 = sshll.u32 %s9789_s15, 3 }
 0x137   : > { %962 = vmatpush1.bf16.msra.mxu0 %v7701_v11  ;;  %v1065_v61 = vld [vmem:[%s8689_s2 + $0xc0] sm:$0xff]  ;;  %v7776_v15 = vld [vmem:[#allocation3 + $0x1cc] ss:$16 sps:$4 sm:$0xff]  }
 0x138   : > { %963 = vmatprep.subr.bf16.mxu0 %v7702_v12  ;;  %1003 = vmatpush1.bf16.msra.mxu1 %v7751_v36  ;;  %v7769_v63 = vld [vmem:[#allocation3 + $0x168] ss:$16 sps:$4 sm:$0xff]   ;;  %v6741_v4 = vcombine.high %v1057_v60, %v1065_v61  ;;  %v6740_v6 = vcombine.low %v1057_v60, %v1065_v61  ;;  %v7779_v21 = vld [vmem:[#allocation3 + $0x1ec] ss:$16 sps:$4 sm:$0xff]  }
 0x139   : > { %1004 = vmatprep.subr.bf16.mxu1 %v7752_v37  ;;  %v1073_v1 = vld [vmem:[%s8689_s2 + $0x100] sm:$0xff]  ;;  %v1050_v24 = vld [vmem:[%s8689_s2 + $0x48] sm:$0xff] }
 0x13a   : > { %v1081_v2 = vld [vmem:[%s8689_s2 + $0x140] sm:$0xff]  ;;  %v1106_v54 = vld [vmem:[%s8689_s2 + $0x208] sm:$0xff]  ;;  %s9662_s27 = scalar_lea.vmem %s9782_s13, %s6657_s23 }
 0x13b   : > { %964 = vmatpush1.bf16.msra.mxu0 %v7704_v13  ;;  %v7772_v5 = vld [vmem:[#allocation3 + $0x188] ss:$16 sps:$4 sm:$0xff]   ;;  %v6757_v10 = vcombine.high %v1073_v1, %v1081_v2  ;;  %v6756_v12 = vcombine.low %v1073_v1, %v1081_v2 }
 0x13c   : > { %965 = vmatprep.subr.bf16.mxu0 %v7705_v19  ;;  %1005 = vmatpush1.bf16.msra.mxu1 %v7754_v40  ;;  %v1089_v7 = vld [vmem:[%s8689_s2 + $0x180] sm:$0xff] }
 0x13d   : > { %1006 = vmatprep.subr.bf16.mxu1 %v7755_v41  ;;  %v1097_v8 = vld [vmem:[%s8689_s2 + $0x1c0] sm:$0xff] }
 0x13e   : > { %v7775_v11 = vld [vmem:[#allocation3 + $0x1a8] ss:$16 sps:$4 sm:$0xff]   ;;  %v6773_v16 = vcombine.high %v1089_v7, %v1097_v8  ;;  %v6772_v18 = vcombine.low %v1089_v7, %v1097_v8  ;;  %v1146_v7 = vld [vmem:[%s8689_s2 + $0x348] sm:$0xff] }
 0x13f   : > { %966 = vmatpush1.bf16.msra.mxu0 %v7707_v22  ;;  %v1105_v13 = vld [vmem:[%s8689_s2 + $0x200] sm:$0xff] }
 0x140   : > { %967 = vmatprep.subr.bf16.mxu0 %v7708_v23  ;;  %1007 = vmatpush1.bf16.msra.mxu1 %v7757_v44  ;;  %v1113_v14 = vld [vmem:[%s8689_s2 + $0x240] sm:$0xff]  ;;  %v1042_v23 = vld [vmem:[%s8689_s2 + $0x8] sm:$0xff] }
 0x141   : > { %1008 = vmatprep.subr.bf16.mxu1 %v7758_v45  ;;  %v7778_v17 = vld [vmem:[#allocation3 + $0x1c8] ss:$16 sps:$4 sm:$0xff]   ;;  %v6789_v22 = vcombine.high %v1105_v13, %v1113_v14  ;;  %v6727_v32 = vcombine.high %v1042_v23, %v1050_v24  ;;  %v6726_v37 = vcombine.low %v1042_v23, %v1050_v24  ;;  %v1170_v23 = vld [vmem:[%s8689_s2 + $0x408] sm:$0xff] }
 0x142   : > { %v1121_v19 = vld [vmem:[%s8689_s2 + $0x280] sm:$0xff]  ;;  %v1178_v24 = vld [vmem:[%s8689_s2 + $0x448] sm:$0xff] }
 0x143   : > { %968 = vmatpush1.bf16.msra.mxu0 %v7710_v26  ;;  %v1129_v20 = vld [vmem:[%s8689_s2 + $0x2c0] sm:$0xff]  ;;  %v6788_v26 = vcombine.low %v1105_v13, %v1113_v14  ;;  %v1154_v14 = vld [vmem:[%s8689_s2 + $0x388] sm:$0xff] }
 0x144   : > { %969 = vmatprep.subr.bf16.mxu0 %v7711_v27  ;;  %1009 = vmatpush1.bf16.msra.mxu1 %v7760_v48  ;;  %v7781_v25 = vld [vmem:[#allocation3 + $0x1e8] ss:$16 sps:$4 sm:$0xff]   ;;  %v6805_v29 = vcombine.high %v1121_v19, %v1129_v20  ;;  %v6804_v33 = vcombine.low %v1121_v19, %v1129_v20 }
 0x145   : > { %1010 = vmatprep.subr.bf16.mxu1 %v7761_v49  ;;  %v1137_v27 = vld [vmem:[%s8689_s2 + $0x300] sm:$0xff] }
 0x146   : > { %v1145_v28 = vld [vmem:[%s8689_s2 + $0x340] sm:$0xff] }
 0x147   : > { %970 = vmatpush1.bf16.msra.mxu0 %v7713_v30  ;;  %v1058_v30 = vld [vmem:[%s8689_s2 + $0x88] sm:$0xff]  ;;  %v6821_v36 = vcombine.high %v1137_v27, %v1145_v28  ;;  %v6820_v41 = vcombine.low %v1137_v27, %v1145_v28  ;;  %v1217_v2 = vld [vmem:[%s8689_s2 + $0x580] sm:$0xff]  ;;  %v6855_v28 = vcombine.high %v1170_v23, %v1178_v24 }
 0x148   : > { %971 = vmatprep.subr.bf16.mxu0 %v7714_v31  ;;  %1011 = vmatpush1.bf16.msra.mxu1 %v7763_v52  ;;  %v1066_v31 = vld [vmem:[%s8689_s2 + $0xc8] sm:$0xff]  ;;  %v1257_v19 = vld [vmem:[%s8689_s2 + $0x6c0] sm:$0xff] }
 0x149   : > { %1012 = vmatprep.subr.bf16.mxu1 %v7764_v55  ;;  %v6743_v40 = vcombine.high %v1058_v30, %v1066_v31  ;;  %v6742_v45 = vcombine.low %v1058_v30, %v1066_v31  ;;  %v1114_v55 = vld [vmem:[%s8689_s2 + $0x248] sm:$0xff] }
 0x14a   : > { %v1194_v30 = vld [vmem:[%s8689_s2 + $0x4c8] sm:$0xff] }
 0x14b   : > { %972 = vmatpush1.bf16.msra.mxu0 %v7716_v34  ;;  %v1153_v34 = vld [vmem:[%s8689_s2 + $0x380] sm:$0xff] }
 0x14c   : > { %973 = vmatprep.subr.bf16.mxu0 %v7717_v35  ;;  %1013 = vmatpush1.bf16.msra.mxu1 %v7766_v57  ;;  %v1161_v35 = vld [vmem:[%s8689_s2 + $0x3c0] sm:$0xff] }
 0x14d   : > { %1014 = vmatprep.subr.bf16.mxu1 %v7767_v59  ;;  %v6837_v44 = vcombine.high %v1153_v34, %v1161_v35  ;;  %v6836_v49 = vcombine.low %v1153_v34, %v1161_v35  ;;  %v1209_v59 = vld [vmem:[%s8689_s2 + $0x540] sm:$0xff]  ;;  %v1202_v34 = vld [vmem:[%s8689_s2 + $0x508] sm:$0xff] }
 0x14e   : > { %v1210_v35 = vld [vmem:[%s8689_s2 + $0x548] sm:$0xff] }
 0x14f   : > { %974 = vmatpush1.bf16.msra.mxu0 %v7719_v38  ;;  %v1074_v38 = vld [vmem:[%s8689_s2 + $0x108] sm:$0xff] }
 0x150   : > { %975 = vmatprep.subr.bf16.mxu0 %v7720_v39  ;;  %1015 = vmatpush1.bf16.msra.mxu1 %v7769_v63  ;;  %v1082_v39 = vld [vmem:[%s8689_s2 + $0x148] sm:$0xff] }
 0x151   : > { %1016 = vmatprep.subr.bf16.mxu1 %v7770_v3  ;;  %v6759_v48 = vcombine.high %v1074_v38, %v1082_v39  ;;  %v6758_v53 = vcombine.low %v1074_v38, %v1082_v39  ;;  %v1130_v63 = vld [vmem:[%s8689_s2 + $0x2c8] sm:$0xff]  ;;  %v1225_v3 = vld [vmem:[%s8689_s2 + $0x5c0] sm:$0xff] }
 0x152   : > { %v1218_v38 = vld [vmem:[%s8689_s2 + $0x588] sm:$0xff] }
 0x153   : > { %976 = vmatpush1.bf16.msra.mxu0 %v7722_v42  ;;  %v1169_v42 = vld [vmem:[%s8689_s2 + $0x400] sm:$0xff]  ;;  %v1226_v39 = vld [vmem:[%s8689_s2 + $0x5c8] sm:$0xff] }
 0x154   : > { %977 = vmatprep.subr.bf16.mxu0 %v7723_v43  ;;  %1017 = vmatpush1.bf16.msra.mxu1 %v7772_v5  ;;  %v1177_v43 = vld [vmem:[%s8689_s2 + $0x440] sm:$0xff]  ;;  %v6790_v5 = vcombine.low %v1106_v54, %v1114_v55 }
 0x155   : > { %1018 = vmatprep.subr.bf16.mxu1 %v7773_v9  ;;  %v6853_v52 = vcombine.high %v1169_v42, %v1177_v43  ;;  %v6852_v57 = vcombine.low %v1169_v42, %v1177_v43  ;;  %v1234_v42 = vld [vmem:[%s8689_s2 + $0x608] sm:$0xff] }
 0x156   : > { %v1242_v43 = vld [vmem:[%s8689_s2 + $0x648] sm:$0xff] }
 0x157   : > { %978 = vmatpush1.bf16.msra.mxu0 %v7725_v46  ;;  %v1090_v46 = vld [vmem:[%s8689_s2 + $0x188] sm:$0xff] }
 0x158   : > { %979 = vmatprep.subr.bf16.mxu0 %v7726_v47  ;;  %1019 = vmatpush1.bf16.msra.mxu1 %v7775_v11  ;;  %v1098_v47 = vld [vmem:[%s8689_s2 + $0x1c8] sm:$0xff]  ;;  %v1241_v11 = vld [vmem:[%s8689_s2 + $0x640] sm:$0xff] }
 0x159   : > { %1020 = vmatprep.subr.bf16.mxu1 %v7776_v15  ;;  %v6774_v61 = vcombine.low %v1090_v46, %v1098_v47  ;;  %v1162_v15 = vld [vmem:[%s8689_s2 + $0x3c8] sm:$0xff] }
 0x15a   : > { %v6838_v27 = vcombine.low %v1154_v14, %v1162_v15 }
 0x15b   : > { %980 = vmatpush1.bf16.msra.mxu0 %v7728_v50  ;;  %v1185_v50 = vld [vmem:[%s8689_s2 + $0x480] sm:$0xff] }
 0x15c   : > { %981 = vmatprep.subr.bf16.mxu0 %v7729_v51  ;;  %1021 = vmatpush1.bf16.msra.mxu1 %v7778_v17  ;;  %v1193_v51 = vld [vmem:[%s8689_s2 + $0x4c0] sm:$0xff]  ;;  %v6900_v17 = vcombine.low %v1217_v2, %v1225_v3 }
 0x15d   : > { %1022 = vmatprep.subr.bf16.mxu1 %v7779_v21  ;;  %v6869_v60 = vcombine.high %v1185_v50, %v1193_v51  ;;  %v6868_v1 = vcombine.low %v1185_v50, %v1193_v51  ;;  %v1265_v51 = vld [vmem:[%s8689_s2 + $0x700] sm:$0xff] }
 0x15f   : > { %982 = vmatpush1.bf16.msra.mxu0 %v7731_v56  ;;  %v6775_v56 = vcombine.high %v1090_v46, %v1098_v47  ;;  %v1250_v46 = vld [vmem:[%s8689_s2 + $0x688] sm:$0xff] }
 0x160   : > { %4197 = vmatprep.subr.bf16.mxu0 %v6725_v58  ;;  %1023 = vmatpush1.bf16.msra.mxu1 %v7781_v25  ;;  %v1201_v58 = vld [vmem:[%s8689_s2 + $0x500] sm:$0xff]  ;;  %v1258_v47 = vld [vmem:[%s8689_s2 + $0x6c8] sm:$0xff] }
 0x161   : > { %4279 = vmatprep.subr.bf16.mxu1 %v6727_v32  ;;  %v6884_v9 = vcombine.low %v1201_v58, %v1209_v59  ;;  %v6854_v32 = vcombine.low %v1170_v23, %v1178_v24  ;;  %v6934_v50 = vcombine.low %v1250_v46, %v1258_v47 }
 0x162   : > { %984 = vmatmul.mubr.bf16.vlgmr.msra.gmra.mrb[0].mxu0 %v8723_v62 }
 0x163   : > { %4198 = vmatpush1.bf16.msra.mxu0 %v6724_v0  ;;  %1025 = vmatmul.mubr.bf16.vlgmr.msra.gmra.mrb[0].mxu1 %v8723_v62  ;;  %v1122_v62 = vld [vmem:[%s8689_s2 + $0x288] sm:$0xff]  ;;  %v6791_v0 = vcombine.high %v1106_v54, %v1114_v55 }
 0x164   : > { %4199 = vmatprep.subr.bf16.mxu0 %v6741_v4  ;;  %4280 = vmatpush1.bf16.msra.mxu1 %v6726_v37  ;;  %v6885_v4 = vcombine.high %v1201_v58, %v1209_v59  ;;  %v6807_v8 = vcombine.high %v1122_v62, %v1130_v63  ;;  %v6806_v13 = vcombine.low %v1122_v62, %v1130_v63  ;;  %v1274_v55 = vld [vmem:[%s8689_s2 + $0x748] sm:$0xff]  ;;  %v1281_v59 = vld [vmem:[%s8689_s2 + $0x780] sm:$0xff] }
 0x165   : > { %4281 = vmatprep.subr.bf16.mxu1 %v6743_v40  ;;  %v6887_v37 = vcombine.high %v1202_v34, %v1210_v35  ;;  %v6886_v40 = vcombine.low %v1202_v34, %v1210_v35  ;;  %v1290_v63 = vld [vmem:[%s8689_s2 + $0x7c8] sm:$0xff]  ;;  %v1329_v34 = vld [vmem:[%s8689_s2 + $0x900] sm:$0xff] }
 0x166   : > { %v1337_v35 = vld [vmem:[%s8689_s2 + $0x940] sm:$0xff] }
 0x167   : > { %4200 = vmatpush1.bf16.msra.mxu0 %v6740_v6  ;;  %v1138_v6 = vld [vmem:[%s8689_s2 + $0x308] sm:$0xff] }
 0x168   : > { %4201 = vmatprep.subr.bf16.mxu0 %v6757_v10  ;;  %4282 = vmatpush1.bf16.msra.mxu1 %v6742_v45  ;;  %v1233_v10 = vld [vmem:[%s8689_s2 + $0x600] sm:$0xff]  ;;  %v6822_v21 = vcombine.low %v1138_v6, %v1146_v7  ;;  %v6919_v45 = vcombine.high %v1234_v42, %v1242_v43 }
 0x169   : > { %4283 = vmatprep.subr.bf16.mxu1 %v6759_v48  ;;  %v6917_v20 = vcombine.high %v1233_v10, %v1241_v11  ;;  %v6916_v25 = vcombine.low %v1233_v10, %v1241_v11  ;;  %v6918_v48 = vcombine.low %v1234_v42, %v1242_v43  ;;  %v604_v11 = vlaneseq  ;;  %v1345_v42 = vld [vmem:[%s8689_s2 + $0x980] sm:$0xff] }
 0x16a   : > { %v1353_v43 = vld [vmem:[%s8689_s2 + $0x9c0] sm:$0xff] }
 0x16b   : > { %4202 = vmatpush1.bf16.msra.mxu0 %v6756_v12  ;;  %v6901_v12 = vcombine.high %v1217_v2, %v1225_v3  ;;  %v1297_v3 = vld [vmem:[%s8689_s2 + $0x800] sm:$0xff] }
 0x16c   : > { %4203 = vmatprep.subr.bf16.mxu0 %v6773_v16  ;;  %4284 = vmatpush1.bf16.msra.mxu1 %v6758_v53  ;;  %v6823_v16 = vcombine.high %v1138_v6, %v1146_v7  ;;  %v1266_v53 = vld [vmem:[%s8689_s2 + $0x708] sm:$0xff] }
 0x16d   : > { %4285 = vmatprep.subr.bf16.mxu1 %v6775_v56  ;;  %v6951_v58 = vcombine.high %v1266_v53, %v1274_v55  ;;  %v1306_v6 = vld [vmem:[%s8689_s2 + $0x848] sm:$0xff] }
 0x16f   : > { %4204 = vmatpush1.bf16.msra.mxu0 %v6772_v18  ;;  %v1249_v18 = vld [vmem:[%s8689_s2 + $0x680] sm:$0xff] }
 0x170   : > { %4205 = vmatprep.subr.bf16.mxu0 %v6789_v22  ;;  %4286 = vmatpush1.bf16.msra.mxu1 %v6774_v61  ;;  %v6839_v22 = vcombine.high %v1154_v14, %v1162_v15  ;;  %v6932_v31 = vcombine.low %v1249_v18, %v1257_v19  ;;  %v1282_v61 = vld [vmem:[%s8689_s2 + $0x788] sm:$0xff]  ;;  %v8796_v14 = vld [vmem:[#allocation5] sm:$0xf] }
 0x171   : > { %4287 = vmatprep.subr.bf16.mxu1 %v6791_v0  ;;  %v6967_v2 = vcombine.high %v1282_v61, %v1290_v63 }
 0x173   : > { %4206 = vmatpush1.bf16.msra.mxu0 %v6788_v26  ;;  %v6933_v26 = vcombine.high %v1249_v18, %v1257_v19 }
 0x174   : > { %4207 = vmatprep.subr.bf16.mxu0 %v6805_v29  ;;  %4288 = vmatpush1.bf16.msra.mxu1 %v6790_v5  ;;  %v1186_v29 = vld [vmem:[%s8689_s2 + $0x488] sm:$0xff] }
 0x175   : > { %4289 = vmatprep.subr.bf16.mxu1 %v6807_v8  ;;  %v1298_v5 = vld [vmem:[%s8689_s2 + $0x808] sm:$0xff] }
 0x176   : > { %v6983_v10 = vcombine.high %v1298_v5, %v1306_v6 }
 0x177   : > { %4208 = vmatpush1.bf16.msra.mxu0 %v6804_v33  ;;  %v6871_v33 = vcombine.high %v1186_v29, %v1194_v30 }
 0x178   : > { %4209 = vmatprep.subr.bf16.mxu0 %v6821_v36  ;;  %4290 = vmatpush1.bf16.msra.mxu1 %v6806_v13  ;;  %v6870_v36 = vcombine.low %v1186_v29, %v1194_v30  ;;  %v1322_v29 = vld [vmem:[%s8689_s2 + $0x8c8] sm:$0xff] }
 0x179   : > { %4291 = vmatprep.subr.bf16.mxu1 %v6823_v16 }
 0x17b   : > { %4210 = vmatpush1.bf16.msra.mxu0 %v6820_v41  ;;  %v6903_v41 = vcombine.high %v1218_v38, %v1226_v39 }
 0x17c   : > { %4211 = vmatprep.subr.bf16.mxu0 %v6837_v44  ;;  %4292 = vmatpush1.bf16.msra.mxu1 %v6822_v21  ;;  %v6902_v44 = vcombine.low %v1218_v38, %v1226_v39 }
 0x17d   : > { %4293 = vmatprep.subr.bf16.mxu1 %v6839_v22 }
 0x17f   : > { %4212 = vmatpush1.bf16.msra.mxu0 %v6836_v49  ;;  %v6935_v49 = vcombine.high %v1250_v46, %v1258_v47  ;;  %v7012_v46 = vcombine.low %v1329_v34, %v1337_v35 }
 0x180   : > { %4213 = vmatprep.subr.bf16.mxu0 %v6853_v52  ;;  %4294 = vmatpush1.bf16.msra.mxu1 %v6838_v27  ;;  %v1273_v52 = vld [vmem:[%s8689_s2 + $0x740] sm:$0xff] }
 0x181   : > { %4295 = vmatprep.subr.bf16.mxu1 %v6855_v28  ;;  %v6949_v54 = vcombine.high %v1265_v51, %v1273_v52  ;;  %v6948_v56 = vcombine.low %v1265_v51, %v1273_v52  ;;  %v1321_v27 = vld [vmem:[%s8689_s2 + $0x8c0] sm:$0xff]  ;;  %v1314_v28 = vld [vmem:[%s8689_s2 + $0x888] sm:$0xff] }
 0x182   : > { %v6998_v39 = vcombine.low %v1314_v28, %v1322_v29  ;;  %v1369_v51 = vld [vmem:[%s8689_s2 + $0xa40] sm:$0xff]  ;;  %v1362_v52 = vld [vmem:[%s8689_s2 + $0xa08] sm:$0xff] }
 0x183   : > { %4214 = vmatpush1.bf16.msra.mxu0 %v6852_v57  ;;  %v6950_v57 = vcombine.low %v1266_v53, %v1274_v55  ;;  %v1370_v53 = vld [vmem:[%s8689_s2 + $0xa48] sm:$0xff]  ;;  %v7028_v55 = vcombine.low %v1345_v42, %v1353_v43 }
 0x184   : > { %4215 = vmatprep.subr.bf16.mxu0 %v6869_v60  ;;  %4296 = vmatpush1.bf16.msra.mxu1 %v6854_v32  ;;  %v1289_v60 = vld [vmem:[%s8689_s2 + $0x7c0] sm:$0xff] }
 0x185   : > { %4297 = vmatprep.subr.bf16.mxu1 %v6871_v33  ;;  %v6965_v62 = vcombine.high %v1281_v59, %v1289_v60  ;;  %v6964_v0 = vcombine.low %v1281_v59, %v1289_v60  ;;  %v6999_v33 = vcombine.high %v1314_v28, %v1322_v29  ;;  %v1377_v59 = vld [vmem:[%s8689_s2 + $0xa80] sm:$0xff] }
 0x186   : > { %v1385_v60 = vld [vmem:[%s8689_s2 + $0xac0] sm:$0xff] }
 0x187   : > { %4216 = vmatpush1.bf16.msra.mxu0 %v6868_v1  ;;  %v6966_v1 = vcombine.low %v1282_v61, %v1290_v63  ;;  %v1378_v61 = vld [vmem:[%s8689_s2 + $0xa88] sm:$0xff] }
 0x188   : > { %4217 = vmatprep.subr.bf16.mxu0 %v6885_v4  ;;  %4298 = vmatpush1.bf16.msra.mxu1 %v6870_v36  ;;  %v1305_v4 = vld [vmem:[%s8689_s2 + $0x840] sm:$0xff]  ;;  %v1330_v36 = vld [vmem:[%s8689_s2 + $0x908] sm:$0xff] }
 0x189   : > { %4299 = vmatprep.subr.bf16.mxu1 %v6887_v37  ;;  %v6980_v7 = vcombine.low %v1297_v3, %v1305_v4  ;;  %v6981_v8 = vcombine.high %v1297_v3, %v1305_v4  ;;  %v1338_v37 = vld [vmem:[%s8689_s2 + $0x948] sm:$0xff]  ;;  %v7061_v3 = vcombine.high %v1377_v59, %v1385_v60 }
 0x18a   : > { %v7014_v47 = vcombine.low %v1330_v36, %v1338_v37 }
 0x18b   : > { %4218 = vmatpush1.bf16.msra.mxu0 %v6884_v9  ;;  %v6982_v9 = vcombine.low %v1298_v5, %v1306_v6  ;;  %v1393_v5 = vld [vmem:[%s8689_s2 + $0xb00] sm:$0xff] }
 0x18c   : > { %4219 = vmatprep.subr.bf16.mxu0 %v6901_v12  ;;  %4300 = vmatpush1.bf16.msra.mxu1 %v6886_v40  ;;  %v8791_v12 = vshrl.u32 %v604_v11, 7  ;;  %v7013_v40 = vcombine.high %v1329_v34, %v1337_v35  ;;  %v1433_v34 = vld [vmem:[%s8689_s2 + $0xc40] sm:$0xff]  ;;  %v1426_v35 = vld [vmem:[%s8689_s2 + $0xc08] sm:$0xff] }
 0x18d   : > { %4301 = vmatprep.subr.bf16.mxu1 %v6903_v41  ;;  %v7015_v41 = vcombine.high %v1330_v36, %v1338_v37  ;;  %v1434_v36 = vld [vmem:[%s8689_s2 + $0xc48] sm:$0xff] }
 0x18e   : > { %v8794_v13 = vsub.s32 0, %v8791_v12  ;;  %v8799_v15 = vsub.s32 1, %v8791_v12 }
 0x18f   : > { %4220 = vmatpush1.bf16.msra.mxu0 %v6900_v17 }
 0x190   : > { %4221 = vmatprep.subr.bf16.mxu0 %v6917_v20  ;;  %4302 = vmatpush1.bf16.msra.mxu1 %v6902_v44  ;;  %v607_v16 = vrot.slane %v8796_v14, %v8794_v13  ;;  %v611_v17 = vrot.slane %v8796_v14, %v8799_v15  ;;  %v1346_v44 = vld [vmem:[%s8689_s2 + $0x988] sm:$0xff] }
 0x191   : > { %4303 = vmatprep.subr.bf16.mxu1 %v6919_v45  ;;  %v1354_v45 = vld [vmem:[%s8689_s2 + $0x9c8] sm:$0xff] }
 0x193   : > { %4222 = vmatpush1.bf16.msra.mxu0 %v6916_v25  ;;  %v1313_v25 = vld [vmem:[%s8689_s2 + $0x880] sm:$0xff] }
 0x194   : > { %4223 = vmatprep.subr.bf16.mxu0 %v6933_v26  ;;  %4304 = vmatpush1.bf16.msra.mxu1 %v6918_v48  ;;  %v6997_v32 = vcombine.high %v1313_v25, %v1321_v27  ;;  %v6996_v38 = vcombine.low %v1313_v25, %v1321_v27  ;;  %v7029_v48 = vcombine.high %v1345_v42, %v1353_v43  ;;  %v1418_v25 = vld [vmem:[%s8689_s2 + $0xbc8] sm:$0xff]  ;;  %v1449_v42 = vld [vmem:[%s8689_s2 + $0xcc0] sm:$0xff] }
 0x195   : > { %4305 = vmatprep.subr.bf16.mxu1 %v6935_v49  ;;  %v7031_v49 = vcombine.high %v1346_v44, %v1354_v45  ;;  %v1442_v43 = vld [vmem:[%s8689_s2 + $0xc88] sm:$0xff] }
 0x197   : > { %4224 = vmatpush1.bf16.msra.mxu0 %v6932_v31 }
 0x198   : > { %4306 = vmatpush1.bf16.msra.mxu1 %v6934_v50  ;;  %4225 = vmatprep.subr.bf16.mxu0 %v6949_v54  ;;  %v1361_v50 = vld [vmem:[%s8689_s2 + $0xa00] sm:$0xff]  ;;  %v8830_v54 = vsub.s32 3, %v8791_v12 }
 0x199   : > { %4307 = vmatprep.subr.bf16.mxu1 %v6951_v58  ;;  %v7047_v58 = vcombine.high %v1362_v52, %v1370_v53 }
 0x19a   : > { %v619_v63 = vrot.slane %v8796_v14, %v8830_v54 }
 0x19b   : > { %4226 = vmatpush1.bf16.msra.mxu0 %v6948_v56  ;;  %v7030_v56 = vcombine.low %v1346_v44, %v1354_v45  ;;  %v1450_v44 = vld [vmem:[%s8689_s2 + $0xcc8] sm:$0xff] }
 0x19c   : > { %4308 = vmatpush1.bf16.msra.mxu1 %v6950_v57  ;;  %4227 = vmatprep.subr.bf16.mxu0 %v6965_v62  ;;  %v7045_v57 = vcombine.high %v1361_v50, %v1369_v51  ;;  %v1386_v62 = vld [vmem:[%s8689_s2 + $0xac8] sm:$0xff] }
 0x19d   : > { %4309 = vmatprep.subr.bf16.mxu1 %v6967_v2  ;;  %v7063_v4 = vcombine.high %v1378_v61, %v1386_v62 }
 0x19f   : > { %4228 = vmatpush1.bf16.msra.mxu0 %v6964_v0  ;;  %v7044_v0 = vcombine.low %v1361_v50, %v1369_v51  ;;  %v1465_v50 = vld [vmem:[%s8689_s2 + $0xd40] sm:$0xff]  ;;  %v1458_v51 = vld [vmem:[%s8689_s2 + $0xd08] sm:$0xff] }
 0x1a0   : > { %4310 = vmatpush1.bf16.msra.mxu1 %v6966_v1  ;;  %4238 = vmatprep.subr.bf16.mxu0 %v6981_v8  ;;  %v7046_v1 = vcombine.low %v1362_v52, %v1370_v53  ;;  %v1394_v8 = vld [vmem:[%s8689_s2 + $0xb08] sm:$0xff] }
 0x1a1   : > { %4320 = vmatprep.subr.bf16.mxu1 %v6983_v10  ;;  %v1466_v52 = vld [vmem:[%s8689_s2 + $0xd48] sm:$0xff] }
 0x235   : > { %v985_v18 = vpop.f32.mrb[0].mxu0 }
 0x236   : > { %v986_v19 = vadd.f32 %v985_v18, %v607_v16  ;;  %v987_v20 = vpop.f32.mrb[1].mxu0  ;;  %v8838_v2 = vpop.f32.mrb[0].mxu1  ;;  %v7062_v18 = vcombine.low %v1378_v61, %v1386_v62  ;;  %v1482_v61 = vld [vmem:[%s8689_s2 + $0xdc8] sm:$0xff] }
 0x237   : > { %v988_v21 = vadd.f32 %v987_v20, %v611_v17  ;;  %v989_v22 = vpop.f32.mrb[2].mxu0  ;;  %v1028_v6 = vpop.f32.mrb[1].mxu1  ;;  %v7060_v17 = vcombine.low %v1377_v59, %v1385_v60  ;;  %v1481_v59 = vld [vmem:[%s8689_s2 + $0xdc0] sm:$0xff]  ;;  %v1474_v60 = vld [vmem:[%s8689_s2 + $0xd88] sm:$0xff] }
 0x238   : > { %v1033_v23 = vmax.f32 %v986_v19, 0.0  ;;  %v990_v24 = vpop.f32.mrb[3].mxu0  ;;  %v1029_v10 = vadd.f32 %v1028_v6, %v619_v63  ;;  %v1030_v11 = vpop.f32.mrb[2].mxu1  ;;  %v1409_v22 = vld [vmem:[%s8689_s2 + $0xb80] sm:$0xff]  ;;  %v7142_v63 = vcombine.low %v1458_v51, %v1466_v52  ;;  %v1498_v6 = vld [vmem:[%s8689_s2 + $0xe48] sm:$0xff] }
 0x239   : > { %v1034_v26 = vmax.f32 %v988_v21, 0.0  ;;  %v1031_v16 = vpop.f32.mrb[3].mxu1  ;;  %v1410_v24 = vld [vmem:[%s8689_s2 + $0xb88] sm:$0xff]  ;;  %v1505_v11 = vld [vmem:[%s8689_s2 + $0xe80] sm:$0xff] }
 0x23a   : > { %v8811_v31 = vpack.c.bf16 %v1033_v23, %v1033_v23  ;;  %v1036_v19 = vmax.f32 %v1029_v10, 0.0  ;;  %v1417_v23 = vld [vmem:[%s8689_s2 + $0xbc0] sm:$0xff] }
 0x23b   : > { %v8809_v30 = vpack.c.bf16 %v1034_v26, %v1034_v26  ;;  %v7093_v29 = vcombine.high %v1409_v22, %v1417_v23  ;;  %v7092_v37 = vcombine.low %v1409_v22, %v1417_v23  ;;  %v1513_v16 = vld [vmem:[%s8689_s2 + $0xec0] sm:$0xff] }
 0x23c   : > { %v8848_v26 = vpack.c.bf16 %v1036_v19, %v1036_v19  ;;  %v8877_v19 = vsub.s32 2, %v8791_v12  ;;  %v7189_v22 = vcombine.high %v1505_v11, %v1513_v16 }
 0x23d   : > { %4229 = vmatprep.mubr.bf16.mxu0 %v8809_v30  ;;  %4311 = vmatprep.mubr.bf16.mxu1 %v8809_v30 }
 0x23e   : > { %4230 = vmatmul.mubr.bf16.vlgmr.msra.gmra.mrb[4].mxu0 %v8811_v31  ;;  %4312 = vmatmul.mubr.bf16.vlgmr.msra.gmra.mrb[4].mxu1 %v8811_v31 }
 0x23f   : > { %4239 = vmatpush1.bf16.msra.mxu0 %v6980_v7  ;;  %4321 = vmatpush1.bf16.msra.mxu1 %v6982_v9  ;;  %v1401_v7 = vld [vmem:[%s8689_s2 + $0xb40] sm:$0xff]  ;;  %v1402_v9 = vld [vmem:[%s8689_s2 + $0xb48] sm:$0xff] }
 0x240   : > { %4240 = vmatprep.subr.bf16.mxu0 %v6997_v32  ;;  %4322 = vmatprep.subr.bf16.mxu1 %v6999_v33  ;;  %v7077_v20 = vcombine.high %v1393_v5, %v1401_v7  ;;  %v7079_v21 = vcombine.high %v1394_v8, %v1402_v9  ;;  %v7076_v27 = vcombine.low %v1393_v5, %v1401_v7  ;;  %v1425_v33 = vld [vmem:[%s8689_s2 + $0xc00] sm:$0xff]  ;;  %v1490_v5 = vld [vmem:[%s8689_s2 + $0xe08] sm:$0xff] }
 0x241   : > { %v7078_v28 = vcombine.low %v1394_v8, %v1402_v9  ;;  %v7095_v32 = vcombine.high %v1410_v24, %v1418_v25  ;;  %4270 = vmatprep.mubr.bf16.mxu0 %v8848_v26  ;;  %4352 = vmatprep.mubr.bf16.mxu1 %v8848_v26  ;;  %v7108_v45 = vcombine.low %v1425_v33, %v1433_v34 }
 0x242   : > { %v7158_v8 = vcombine.low %v1474_v60, %v1482_v61  ;;  %v7175_v10 = vcombine.high %v1490_v5, %v1498_v6 }
 0x243   : > { %4241 = vmatpush1.bf16.msra.mxu0 %v6996_v38  ;;  %4323 = vmatpush1.bf16.msra.mxu1 %v6998_v39  ;;  %v7094_v38 = vcombine.low %v1410_v24, %v1418_v25  ;;  %v7109_v39 = vcombine.high %v1425_v33, %v1433_v34  ;;  %v1521_v24 = vld [vmem:[%s8689_s2 + $0xf00] sm:$0xff] }
 0x244   : > { %4242 = vmatprep.subr.bf16.mxu0 %v7013_v40  ;;  %4324 = vmatprep.subr.bf16.mxu1 %v7015_v41  ;;  %v7111_v40 = vcombine.high %v1426_v35, %v1434_v36  ;;  %v1441_v41 = vld [vmem:[%s8689_s2 + $0xc80] sm:$0xff] }
 0x245   : > { %v7124_v53 = vcombine.low %v1441_v41, %v1449_v42  ;;  %v1529_v25 = vld [vmem:[%s8689_s2 + $0xf40] sm:$0xff] }
 0x246   : > { %v7205_v34 = vcombine.high %v1521_v24, %v1529_v25 }
 0x247   : > { %4243 = vmatpush1.bf16.msra.mxu0 %v7012_v46  ;;  %4325 = vmatpush1.bf16.msra.mxu1 %v7014_v47  ;;  %v7110_v46 = vcombine.low %v1426_v35, %v1434_v36  ;;  %v7125_v47 = vcombine.high %v1441_v41, %v1449_v42  ;;  %v1537_v36 = vld [vmem:[%s8689_s2 + $0xf80] sm:$0xff] }
 0x248   : > { %4244 = vmatprep.subr.bf16.mxu0 %v7029_v48  ;;  %4326 = vmatprep.subr.bf16.mxu1 %v7031_v49  ;;  %v7127_v48 = vcombine.high %v1442_v43, %v1450_v44  ;;  %v1457_v49 = vld [vmem:[%s8689_s2 + $0xd00] sm:$0xff] }
 0x249   : > { %v7140_v62 = vcombine.low %v1457_v49, %v1465_v50 }
 0x24b   : > { %4245 = vmatpush1.bf16.msra.mxu0 %v7028_v55  ;;  %4327 = vmatpush1.bf16.msra.mxu1 %v7030_v56  ;;  %v7126_v55 = vcombine.low %v1442_v43, %v1450_v44  ;;  %v7141_v56 = vcombine.high %v1457_v49, %v1465_v50  ;;  %v1043_v44 = vld [vmem:[%s8689_s2 + $0x10] sm:$0xff] }
 0x24c   : > { %4246 = vmatprep.subr.bf16.mxu0 %v7045_v57  ;;  %4328 = vmatprep.subr.bf16.mxu1 %v7047_v58  ;;  %v7143_v57 = vcombine.high %v1458_v51, %v1466_v52  ;;  %v1473_v58 = vld [vmem:[%s8689_s2 + $0xd80] sm:$0xff]  ;;  %v1059_v52 = vld [vmem:[%s8689_s2 + $0x90] sm:$0xff] }
 0x24d   : > { %v7156_v7 = vcombine.low %v1473_v58, %v1481_v59 }
 0x24f   : > { %4247 = vmatpush1.bf16.msra.mxu0 %v7044_v0  ;;  %4329 = vmatpush1.bf16.msra.mxu1 %v7046_v1  ;;  %v7157_v0 = vcombine.high %v1473_v58, %v1481_v59  ;;  %v7159_v1 = vcombine.high %v1474_v60, %v1482_v61 }
 0x250   : > { %4248 = vmatprep.subr.bf16.mxu0 %v7061_v3  ;;  %4330 = vmatprep.subr.bf16.mxu1 %v7063_v4  ;;  %v1489_v3 = vld [vmem:[%s8689_s2 + $0xe00] sm:$0xff] }
 0x251   : > { %v1497_v4 = vld [vmem:[%s8689_s2 + $0xe40] sm:$0xff] }
 0x252   : > { %v7173_v9 = vcombine.high %v1489_v3, %v1497_v4 }
 0x253   : > { %4249 = vmatpush1.bf16.msra.mxu0 %v7060_v17  ;;  %4331 = vmatpush1.bf16.msra.mxu1 %v7062_v18  ;;  %v1506_v17 = vld [vmem:[%s8689_s2 + $0xe88] sm:$0xff] }
 0x254   : > { %4250 = vmatprep.subr.bf16.mxu0 %v7077_v20  ;;  %4332 = vmatprep.subr.bf16.mxu1 %v7079_v21  ;;  %v1514_v18 = vld [vmem:[%s8689_s2 + $0xec8] sm:$0xff]  ;;  %v7172_v20 = vcombine.low %v1489_v3, %v1497_v4  ;;  %v7174_v21 = vcombine.low %v1490_v5, %v1498_v6 }
 0x255   : > { %v7191_v23 = vcombine.high %v1506_v17, %v1514_v18  ;;  %v7190_v33 = vcombine.low %v1506_v17, %v1514_v18 }
 0x257   : > { %4251 = vmatpush1.bf16.msra.mxu0 %v7076_v27  ;;  %4333 = vmatpush1.bf16.msra.mxu1 %v7078_v28  ;;  %v1522_v27 = vld [vmem:[%s8689_s2 + $0xf08] sm:$0xff] }
 0x258   : > { %4252 = vmatprep.subr.bf16.mxu0 %v7093_v29  ;;  %4334 = vmatprep.subr.bf16.mxu1 %v7095_v32  ;;  %v1530_v28 = vld [vmem:[%s8689_s2 + $0xf48] sm:$0xff]  ;;  %v615_v29 = vrot.slane %v8796_v14, %v8877_v19  ;;  %v7188_v32 = vcombine.low %v1505_v11, %v1513_v16  ;;  %v7204_v14 = vcombine.low %v1521_v24, %v1529_v25 }
 0x259   : > { %v7207_v35 = vcombine.high %v1522_v27, %v1530_v28  ;;  %v7206_v41 = vcombine.low %v1522_v27, %v1530_v28 }
 0x25b   : > { %4253 = vmatpush1.bf16.msra.mxu0 %v7092_v37  ;;  %4335 = vmatpush1.bf16.msra.mxu1 %v7094_v38  ;;  %v1545_v37 = vld [vmem:[%s8689_s2 + $0xfc0] sm:$0xff]  ;;  %v1538_v38 = vld [vmem:[%s8689_s2 + $0xf88] sm:$0xff] }
 0x25c   : > { %4254 = vmatprep.subr.bf16.mxu0 %v7109_v39  ;;  %4336 = vmatprep.subr.bf16.mxu1 %v7111_v40  ;;  %v1546_v39 = vld [vmem:[%s8689_s2 + $0xfc8] sm:$0xff]  ;;  %v1027_v40 = vadd.f32 %v8838_v2, %v615_v29  ;;  %v7221_v42 = vcombine.high %v1537_v36, %v1545_v37  ;;  %v7220_v2 = vcombine.low %v1537_v36, %v1545_v37  ;;  %v1123_v29 = vld [vmem:[%s8689_s2 + $0x290] sm:$0xff] }
 0x25d   : > { %v7223_v43 = vcombine.high %v1538_v38, %v1546_v39  ;;  %v7222_v49 = vcombine.low %v1538_v38, %v1546_v39  ;;  %v1139_v39 = vld [vmem:[%s8689_s2 + $0x310] sm:$0xff] }
 0x25f   : > { %4255 = vmatpush1.bf16.msra.mxu0 %v7108_v45  ;;  %4337 = vmatpush1.bf16.msra.mxu1 %v7110_v46  ;;  %v1051_v45 = vld [vmem:[%s8689_s2 + $0x50] sm:$0xff]  ;;  %v1044_v46 = vld [vmem:[%s8689_s2 + $0x18] sm:$0xff] }
 0x260   : > { %4256 = vmatprep.subr.bf16.mxu0 %v7125_v47  ;;  %4338 = vmatprep.subr.bf16.mxu1 %v7127_v48  ;;  %v1052_v47 = vld [vmem:[%s8689_s2 + $0x58] sm:$0xff]  ;;  %v1035_v48 = vmax.f32 %v1027_v40, 0.0  ;;  %v6729_v50 = vcombine.high %v1043_v44, %v1051_v45  ;;  %v6728_v58 = vcombine.low %v1043_v44, %v1051_v45  ;;  %v1147_v40 = vld [vmem:[%s8689_s2 + $0x350] sm:$0xff] }
 0x261   : > { %v6731_v51 = vcombine.high %v1044_v46, %v1052_v47  ;;  %v6730_v59 = vcombine.low %v1044_v46, %v1052_v47  ;;  %v6825_v44 = vcombine.high %v1139_v39, %v1147_v40  ;;  %v1155_v46 = vld [vmem:[%s8689_s2 + $0x390] sm:$0xff] }
 0x262   : > { %v1163_v47 = vld [vmem:[%s8689_s2 + $0x3d0] sm:$0xff] }
 0x263   : > { %4257 = vmatpush1.bf16.msra.mxu0 %v7124_v53  ;;  %4339 = vmatpush1.bf16.msra.mxu1 %v7126_v55  ;;  %v8895_v53 = vpack.c.bf16 %v1035_v48, %v1035_v48  ;;  %v1067_v55 = vld [vmem:[%s8689_s2 + $0xd0] sm:$0xff]  ;;  %v1156_v48 = vld [vmem:[%s8689_s2 + $0x398] sm:$0xff] }
 0x264   : > { %4258 = vmatprep.subr.bf16.mxu0 %v7141_v56  ;;  %4340 = vmatprep.subr.bf16.mxu1 %v7143_v57  ;;  %v1060_v56 = vld [vmem:[%s8689_s2 + $0x98] sm:$0xff]  ;;  %v6745_v60 = vcombine.high %v1059_v52, %v1067_v55  ;;  %v6744_v3 = vcombine.low %v1059_v52, %v1067_v55  ;;  %v1171_v55 = vld [vmem:[%s8689_s2 + $0x410] sm:$0xff] }
 0x265   : > { %v1068_v57 = vld [vmem:[%s8689_s2 + $0xd8] sm:$0xff] }
 0x266   : > { %v6747_v61 = vcombine.high %v1060_v56, %v1068_v57  ;;  %v6746_v4 = vcombine.low %v1060_v56, %v1068_v57  ;;  %v1179_v56 = vld [vmem:[%s8689_s2 + $0x450] sm:$0xff]  ;;  %v1172_v57 = vld [vmem:[%s8689_s2 + $0x418] sm:$0xff] }
 0x267   : > { %4259 = vmatpush1.bf16.msra.mxu0 %v7140_v62  ;;  %4341 = vmatpush1.bf16.msra.mxu1 %v7142_v63  ;;  %v1075_v62 = vld [vmem:[%s8689_s2 + $0x110] sm:$0xff] }
 0x268   : > { %4260 = vmatprep.subr.bf16.mxu0 %v7157_v0  ;;  %4342 = vmatprep.subr.bf16.mxu1 %v7159_v1  ;;  %v1083_v63 = vld [vmem:[%s8689_s2 + $0x150] sm:$0xff]  ;;  %v1076_v0 = vld [vmem:[%s8689_s2 + $0x118] sm:$0xff] }
 0x269   : > { %v1084_v1 = vld [vmem:[%s8689_s2 + $0x158] sm:$0xff]  ;;  %v6761_v5 = vcombine.high %v1075_v62, %v1083_v63  ;;  %v6760_v11 = vcombine.low %v1075_v62, %v1083_v63  ;;  %v1187_v63 = vld [vmem:[%s8689_s2 + $0x490] sm:$0xff] }
 0x26a   : > { %v6763_v6 = vcombine.high %v1076_v0, %v1084_v1  ;;  %v6762_v16 = vcombine.low %v1076_v0, %v1084_v1  ;;  %v1195_v0 = vld [vmem:[%s8689_s2 + $0x4d0] sm:$0xff]  ;;  %v1188_v1 = vld [vmem:[%s8689_s2 + $0x498] sm:$0xff] }
 0x26b   : > { %4261 = vmatpush1.bf16.msra.mxu0 %v7156_v7  ;;  %4343 = vmatpush1.bf16.msra.mxu1 %v7158_v8  ;;  %v1091_v7 = vld [vmem:[%s8689_s2 + $0x190] sm:$0xff] }
 0x26c   : > { %4262 = vmatprep.subr.bf16.mxu0 %v7173_v9  ;;  %4344 = vmatprep.subr.bf16.mxu1 %v7175_v10  ;;  %v1099_v8 = vld [vmem:[%s8689_s2 + $0x1d0] sm:$0xff]  ;;  %v1092_v9 = vld [vmem:[%s8689_s2 + $0x198] sm:$0xff] }
 0x26d   : > { %v1100_v10 = vld [vmem:[%s8689_s2 + $0x1d8] sm:$0xff]  ;;  %v6777_v17 = vcombine.high %v1091_v7, %v1099_v8  ;;  %v6776_v24 = vcombine.low %v1091_v7, %v1099_v8  ;;  %v1203_v8 = vld [vmem:[%s8689_s2 + $0x510] sm:$0xff] }
 0x26e   : > { %v6779_v18 = vcombine.high %v1092_v9, %v1100_v10  ;;  %v6778_v25 = vcombine.low %v1092_v9, %v1100_v10  ;;  %v1211_v9 = vld [vmem:[%s8689_s2 + $0x550] sm:$0xff]  ;;  %v1204_v10 = vld [vmem:[%s8689_s2 + $0x518] sm:$0xff] }
 0x26f   : > { %4263 = vmatpush1.bf16.msra.mxu0 %v7172_v20  ;;  %4345 = vmatpush1.bf16.msra.mxu1 %v7174_v21  ;;  %v1107_v20 = vld [vmem:[%s8689_s2 + $0x210] sm:$0xff] }
 0x270   : > { %4264 = vmatprep.subr.bf16.mxu0 %v7189_v22  ;;  %4346 = vmatprep.subr.bf16.mxu1 %v7191_v23  ;;  %v1115_v21 = vld [vmem:[%s8689_s2 + $0x250] sm:$0xff]  ;;  %v1108_v22 = vld [vmem:[%s8689_s2 + $0x218] sm:$0xff] }
 0x271   : > { %v1116_v23 = vld [vmem:[%s8689_s2 + $0x258] sm:$0xff]  ;;  %v6793_v27 = vcombine.high %v1107_v20, %v1115_v21 }
 0x272   : > { %v6795_v28 = vcombine.high %v1108_v22, %v1116_v23  ;;  %v6794_v36 = vcombine.low %v1108_v22, %v1116_v23  ;;  %v1227_v22 = vld [vmem:[%s8689_s2 + $0x5d0] sm:$0xff]  ;;  %v1220_v23 = vld [vmem:[%s8689_s2 + $0x598] sm:$0xff] }
 0x273   : > { %4265 = vmatpush1.bf16.msra.mxu0 %v7188_v32  ;;  %4347 = vmatpush1.bf16.msra.mxu1 %v7190_v33  ;;  %v1131_v32 = vld [vmem:[%s8689_s2 + $0x2d0] sm:$0xff]  ;;  %v1124_v33 = vld [vmem:[%s8689_s2 + $0x298] sm:$0xff] }
 0x274   : > { %4266 = vmatprep.subr.bf16.mxu0 %v7205_v34  ;;  %4348 = vmatprep.subr.bf16.mxu1 %v7207_v35  ;;  %v1132_v34 = vld [vmem:[%s8689_s2 + $0x2d8] sm:$0xff]  ;;  %v6792_v35 = vcombine.low %v1107_v20, %v1115_v21  ;;  %v6809_v37 = vcombine.high %v1123_v29, %v1131_v32  ;;  %v1219_v21 = vld [vmem:[%s8689_s2 + $0x590] sm:$0xff] }
 0x275   : > { %v6811_v38 = vcombine.high %v1124_v33, %v1132_v34 }
 0x277   : > { %4267 = vmatpush1.bf16.msra.mxu0 %v7204_v14  ;;  %4349 = vmatpush1.bf16.msra.mxu1 %v7206_v41  ;;  %v1140_v14 = vld [vmem:[%s8689_s2 + $0x318] sm:$0xff] }
 0x278   : > { %4268 = vmatprep.subr.bf16.mxu0 %v7221_v42  ;;  %4350 = vmatprep.subr.bf16.mxu1 %v7223_v43  ;;  %v1148_v41 = vld [vmem:[%s8689_s2 + $0x358] sm:$0xff]  ;;  %v6808_v42 = vcombine.low %v1123_v29, %v1131_v32  ;;  %v6810_v43 = vcombine.low %v1124_v33, %v1132_v34  ;;  %v1235_v32 = vld [vmem:[%s8689_s2 + $0x610] sm:$0xff] }
 0x279   : > { %v6827_v45 = vcombine.high %v1140_v14, %v1148_v41  ;;  %v1243_v33 = vld [vmem:[%s8689_s2 + $0x650] sm:$0xff]  ;;  %v1236_v34 = vld [vmem:[%s8689_s2 + $0x618] sm:$0xff] }
 0x27b   : > { %4269 = vmatpush1.bf16.msra.mxu0 %v7220_v2  ;;  %4351 = vmatpush1.bf16.msra.mxu1 %v7222_v49  ;;  %v1164_v2 = vld [vmem:[%s8689_s2 + $0x3d8] sm:$0xff]  ;;  %v6824_v49 = vcombine.low %v1139_v39, %v1147_v40  ;;  %v1251_v40 = vld [vmem:[%s8689_s2 + $0x690] sm:$0xff] }
 0x27c   : > { %4361 = vmatprep.subr.bf16.mxu0 %v6729_v50  ;;  %4443 = vmatprep.subr.bf16.mxu1 %v6731_v51  ;;  %v6826_v50 = vcombine.low %v1140_v14, %v1148_v41  ;;  %v6841_v51 = vcombine.high %v1155_v46, %v1163_v47  ;;  %v6843_v52 = vcombine.high %v1156_v48, %v1164_v2  ;;  %v1259_v14 = vld [vmem:[%s8689_s2 + $0x6d0] sm:$0xff]  ;;  %v1252_v41 = vld [vmem:[%s8689_s2 + $0x698] sm:$0xff] }
 0x27e   : > { %4271 = vmatmul.mubr.bf16.vlgmr.msra.gmra.mrb[4].mxu0 %v8895_v53  ;;  %4353 = vmatmul.mubr.bf16.vlgmr.msra.gmra.mrb[4].mxu1 %v8895_v53 }
 0x27f   : > { %4362 = vmatpush1.bf16.msra.mxu0 %v6728_v58  ;;  %4393 = vmatprep.mubr.bf16.mxu0 %v8809_v30  ;;  %v1180_v58 = vld [vmem:[%s8689_s2 + $0x458] sm:$0xff] }
 0x280   : > { %4444 = vmatpush1.bf16.msra.mxu1 %v6730_v59  ;;  %4475 = vmatprep.mubr.bf16.mxu1 %v8809_v30  ;;  %v6840_v59 = vcombine.low %v1155_v46, %v1163_v47  ;;  %v6859_v62 = vcombine.high %v1172_v57, %v1180_v58  ;;  %v1267_v47 = vld [vmem:[%s8689_s2 + $0x710] sm:$0xff] }
 0x281   : > { %4363 = vmatprep.subr.bf16.mxu0 %v6745_v60  ;;  %4445 = vmatprep.subr.bf16.mxu1 %v6747_v61  ;;  %v6842_v60 = vcombine.low %v1156_v48, %v1164_v2  ;;  %v6857_v61 = vcombine.high %v1171_v55, %v1179_v56  ;;  %v1275_v48 = vld [vmem:[%s8689_s2 + $0x750] sm:$0xff]  ;;  %v1268_v2 = vld [vmem:[%s8689_s2 + $0x718] sm:$0xff] }
 0x283   : > { %4364 = vmatpush1.bf16.msra.mxu0 %v6744_v3  ;;  %v1196_v3 = vld [vmem:[%s8689_s2 + $0x4d8] sm:$0xff] }
 0x284   : > { %4446 = vmatpush1.bf16.msra.mxu1 %v6746_v4  ;;  %4365 = vmatprep.subr.bf16.mxu0 %v6761_v5  ;;  %v6856_v4 = vcombine.low %v1171_v55, %v1179_v56  ;;  %v6858_v5 = vcombine.low %v1172_v57, %v1180_v58  ;;  %v6875_v7 = vcombine.high %v1188_v1, %v1196_v3  ;;  %v1283_v56 = vld [vmem:[%s8689_s2 + $0x790] sm:$0xff]  ;;  %v1284_v58 = vld [vmem:[%s8689_s2 + $0x798] sm:$0xff] }
 0x285   : > { %4447 = vmatprep.subr.bf16.mxu1 %v6763_v6  ;;  %v6873_v6 = vcombine.high %v1187_v63, %v1195_v0  ;;  %v1291_v57 = vld [vmem:[%s8689_s2 + $0x7d0] sm:$0xff] }
 0x287   : > { %4366 = vmatpush1.bf16.msra.mxu0 %v6760_v11  ;;  %v1212_v11 = vld [vmem:[%s8689_s2 + $0x558] sm:$0xff] }
 0x288   : > { %4448 = vmatpush1.bf16.msra.mxu1 %v6762_v16  ;;  %4367 = vmatprep.subr.bf16.mxu0 %v6777_v17  ;;  %v6872_v16 = vcombine.low %v1187_v63, %v1195_v0  ;;  %v6874_v17 = vcombine.low %v1188_v1, %v1196_v3  ;;  %v6891_v20 = vcombine.high %v1204_v10, %v1212_v11  ;;  %v1299_v0 = vld [vmem:[%s8689_s2 + $0x810] sm:$0xff]  ;;  %v1300_v3 = vld [vmem:[%s8689_s2 + $0x818] sm:$0xff] }
 0x289   : > { %4449 = vmatprep.subr.bf16.mxu1 %v6779_v18  ;;  %v6889_v18 = vcombine.high %v1203_v8, %v1211_v9  ;;  %v1307_v1 = vld [vmem:[%s8689_s2 + $0x850] sm:$0xff] }
 0x28b   : > { %4368 = vmatpush1.bf16.msra.mxu0 %v6776_v24  ;;  %v1228_v24 = vld [vmem:[%s8689_s2 + $0x5d8] sm:$0xff] }
 0x28c   : > { %4450 = vmatpush1.bf16.msra.mxu1 %v6778_v25  ;;  %4369 = vmatprep.subr.bf16.mxu0 %v6793_v27  ;;  %v6888_v25 = vcombine.low %v1203_v8, %v1211_v9  ;;  %v6890_v27 = vcombine.low %v1204_v10, %v1212_v11  ;;  %v6907_v29 = vcombine.high %v1220_v23, %v1228_v24  ;;  %v1315_v9 = vld [vmem:[%s8689_s2 + $0x890] sm:$0xff] }
 0x28d   : > { %4451 = vmatprep.subr.bf16.mxu1 %v6795_v28  ;;  %v6905_v28 = vcombine.high %v1219_v21, %v1227_v22  ;;  %v1323_v10 = vld [vmem:[%s8689_s2 + $0x8d0] sm:$0xff]  ;;  %v6984_v11 = vcombine.low %v1299_v0, %v1307_v1 }
 0x28f   : > { %4370 = vmatpush1.bf16.msra.mxu0 %v6792_v35  ;;  %v1244_v35 = vld [vmem:[%s8689_s2 + $0x658] sm:$0xff] }
 0x290   : > { %4452 = vmatpush1.bf16.msra.mxu1 %v6794_v36  ;;  %4371 = vmatprep.subr.bf16.mxu0 %v6809_v37  ;;  %v6904_v36 = vcombine.low %v1219_v21, %v1227_v22  ;;  %v6906_v37 = vcombine.low %v1220_v23, %v1228_v24  ;;  %v6923_v39 = vcombine.high %v1236_v34, %v1244_v35  ;;  %v1331_v21 = vld [vmem:[%s8689_s2 + $0x910] sm:$0xff]  ;;  %v1332_v24 = vld [vmem:[%s8689_s2 + $0x918] sm:$0xff] }
 0x291   : > { %4453 = vmatprep.subr.bf16.mxu1 %v6811_v38  ;;  %v6921_v38 = vcombine.high %v1235_v32, %v1243_v33  ;;  %v1339_v22 = vld [vmem:[%s8689_s2 + $0x950] sm:$0xff] }
 0x293   : > { %4372 = vmatpush1.bf16.msra.mxu0 %v6808_v42  ;;  %v1260_v42 = vld [vmem:[%s8689_s2 + $0x6d8] sm:$0xff] }
 0x294   : > { %4454 = vmatpush1.bf16.msra.mxu1 %v6810_v43  ;;  %4373 = vmatprep.subr.bf16.mxu0 %v6825_v44  ;;  %v6920_v43 = vcombine.low %v1235_v32, %v1243_v33  ;;  %v6922_v44 = vcombine.low %v1236_v34, %v1244_v35  ;;  %v6939_v46 = vcombine.high %v1252_v41, %v1260_v42  ;;  %v1347_v33 = vld [vmem:[%s8689_s2 + $0x990] sm:$0xff]  ;;  %v1348_v35 = vld [vmem:[%s8689_s2 + $0x998] sm:$0xff] }
 0x295   : > { %4455 = vmatprep.subr.bf16.mxu1 %v6827_v45  ;;  %v6937_v45 = vcombine.high %v1251_v40, %v1259_v14  ;;  %v1355_v34 = vld [vmem:[%s8689_s2 + $0x9d0] sm:$0xff] }
 0x297   : > { %4374 = vmatpush1.bf16.msra.mxu0 %v6824_v49  ;;  %v1276_v49 = vld [vmem:[%s8689_s2 + $0x758] sm:$0xff] }
 0x298   : > { %4456 = vmatpush1.bf16.msra.mxu1 %v6826_v50  ;;  %4375 = vmatprep.subr.bf16.mxu0 %v6841_v51  ;;  %v6936_v50 = vcombine.low %v1251_v40, %v1259_v14  ;;  %v6938_v51 = vcombine.low %v1252_v41, %v1260_v42  ;;  %v6955_v55 = vcombine.high %v1268_v2, %v1276_v49  ;;  %v1363_v14 = vld [vmem:[%s8689_s2 + $0xa10] sm:$0xff]  ;;  %v1364_v42 = vld [vmem:[%s8689_s2 + $0xa18] sm:$0xff] }
 0x299   : > { %4457 = vmatprep.subr.bf16.mxu1 %v6843_v52  ;;  %v6953_v52 = vcombine.high %v1267_v47, %v1275_v48  ;;  %v1371_v41 = vld [vmem:[%s8689_s2 + $0xa50] sm:$0xff] }
 0x29b   : > { %4376 = vmatpush1.bf16.msra.mxu0 %v6840_v59  ;;  %v1292_v59 = vld [vmem:[%s8689_s2 + $0x7d8] sm:$0xff] }
 0x29c   : > { %4458 = vmatpush1.bf16.msra.mxu1 %v6842_v60  ;;  %4377 = vmatprep.subr.bf16.mxu0 %v6857_v61  ;;  %v6952_v60 = vcombine.low %v1267_v47, %v1275_v48  ;;  %v6954_v61 = vcombine.low %v1268_v2, %v1276_v49  ;;  %v6971_v63 = vcombine.high %v1284_v58, %v1292_v59  ;;  %v1379_v48 = vld [vmem:[%s8689_s2 + $0xa90] sm:$0xff]  ;;  %v1380_v49 = vld [vmem:[%s8689_s2 + $0xa98] sm:$0xff] }
 0x29d   : > { %4459 = vmatprep.subr.bf16.mxu1 %v6859_v62  ;;  %v6969_v62 = vcombine.high %v1283_v56, %v1291_v57  ;;  %v1387_v2 = vld [vmem:[%s8689_s2 + $0xad0] sm:$0xff] }
 0x29f   : > { %4378 = vmatpush1.bf16.msra.mxu0 %v6856_v4  ;;  %v1308_v4 = vld [vmem:[%s8689_s2 + $0x858] sm:$0xff] }
 0x2a0   : > { %4460 = vmatpush1.bf16.msra.mxu1 %v6858_v5  ;;  %4379 = vmatprep.subr.bf16.mxu0 %v6873_v6  ;;  %v6968_v5 = vcombine.low %v1283_v56, %v1291_v57  ;;  %v6970_v6 = vcombine.low %v1284_v58, %v1292_v59  ;;  %v6987_v8 = vcombine.high %v1300_v3, %v1308_v4  ;;  %v1395_v57 = vld [vmem:[%s8689_s2 + $0xb10] sm:$0xff]  ;;  %v1396_v59 = vld [vmem:[%s8689_s2 + $0xb18] sm:$0xff] }
 0x2a1   : > { %4461 = vmatprep.subr.bf16.mxu1 %v6875_v7  ;;  %v6985_v7 = vcombine.high %v1299_v0, %v1307_v1  ;;  %v1403_v58 = vld [vmem:[%s8689_s2 + $0xb50] sm:$0xff] }
 0x2a2   : > { %v1411_v1 = vld [vmem:[%s8689_s2 + $0xb90] sm:$0xff] }
 0x2a3   : > { %4380 = vmatpush1.bf16.msra.mxu0 %v6872_v16  ;;  %v1316_v16 = vld [vmem:[%s8689_s2 + $0x898] sm:$0xff] }
 0x2a4   : > { %4462 = vmatpush1.bf16.msra.mxu1 %v6874_v17  ;;  %4381 = vmatprep.subr.bf16.mxu0 %v6889_v18  ;;  %v1324_v17 = vld [vmem:[%s8689_s2 + $0x8d8] sm:$0xff]  ;;  %v6986_v18 = vcombine.low %v1300_v3, %v1308_v4  ;;  %v1419_v3 = vld [vmem:[%s8689_s2 + $0xbd0] sm:$0xff] }
 0x2a5   : > { %4463 = vmatprep.subr.bf16.mxu1 %v6891_v20  ;;  %v7001_v20 = vcombine.high %v1315_v9, %v1323_v10  ;;  %v7003_v23 = vcombine.high %v1316_v16, %v1324_v17  ;;  %v1412_v4 = vld [vmem:[%s8689_s2 + $0xb98] sm:$0xff] }
 0x2a7   : > { %4382 = vmatpush1.bf16.msra.mxu0 %v6888_v25  ;;  %v1340_v25 = vld [vmem:[%s8689_s2 + $0x958] sm:$0xff] }
 0x2a8   : > { %4464 = vmatpush1.bf16.msra.mxu1 %v6890_v27  ;;  %4383 = vmatprep.subr.bf16.mxu0 %v6905_v28  ;;  %v7000_v27 = vcombine.low %v1315_v9, %v1323_v10  ;;  %v7002_v28 = vcombine.low %v1316_v16, %v1324_v17  ;;  %v7019_v32 = vcombine.high %v1332_v24, %v1340_v25  ;;  %v1427_v10 = vld [vmem:[%s8689_s2 + $0xc10] sm:$0xff]  ;;  %v1428_v16 = vld [vmem:[%s8689_s2 + $0xc18] sm:$0xff] }
 0x2a9   : > { %4465 = vmatprep.subr.bf16.mxu1 %v6907_v29  ;;  %v7017_v29 = vcombine.high %v1331_v21, %v1339_v22  ;;  %v1436_v17 = vld [vmem:[%s8689_s2 + $0xc58] sm:$0xff] }
 0x2ab   : > { %4384 = vmatpush1.bf16.msra.mxu0 %v6904_v36  ;;  %v1356_v36 = vld [vmem:[%s8689_s2 + $0x9d8] sm:$0xff] }
 0x2ac   : > { %4466 = vmatpush1.bf16.msra.mxu1 %v6906_v37  ;;  %4385 = vmatprep.subr.bf16.mxu0 %v6921_v38  ;;  %v7016_v37 = vcombine.low %v1331_v21, %v1339_v22  ;;  %v7018_v38 = vcombine.low %v1332_v24, %v1340_v25  ;;  %v7035_v40 = vcombine.high %v1348_v35, %v1356_v36  ;;  %v1451_v24 = vld [vmem:[%s8689_s2 + $0xcd0] sm:$0xff]  ;;  %v1444_v25 = vld [vmem:[%s8689_s2 + $0xc98] sm:$0xff] }
 0x2ad   : > { %4467 = vmatprep.subr.bf16.mxu1 %v6923_v39  ;;  %v7033_v39 = vcombine.high %v1347_v33, %v1355_v34  ;;  %v7115_v22 = vcombine.high %v1428_v16, %v1436_v17 }
 0x2af   : > { %4386 = vmatpush1.bf16.msra.mxu0 %v6920_v43  ;;  %v1372_v43 = vld [vmem:[%s8689_s2 + $0xa58] sm:$0xff] }
 0x2b0   : > { %4468 = vmatpush1.bf16.msra.mxu1 %v6922_v44  ;;  %4387 = vmatprep.subr.bf16.mxu0 %v6937_v45  ;;  %v7032_v44 = vcombine.low %v1347_v33, %v1355_v34  ;;  %v7034_v45 = vcombine.low %v1348_v35, %v1356_v36  ;;  %v7051_v47 = vcombine.high %v1364_v42, %v1372_v43  ;;  %v1459_v34 = vld [vmem:[%s8689_s2 + $0xd10] sm:$0xff]  ;;  %v1460_v36 = vld [vmem:[%s8689_s2 + $0xd18] sm:$0xff] }
 0x2b1   : > { %4469 = vmatprep.subr.bf16.mxu1 %v6939_v46  ;;  %v7049_v46 = vcombine.high %v1363_v14, %v1371_v41  ;;  %v1467_v35 = vld [vmem:[%s8689_s2 + $0xd50] sm:$0xff] }
 0x2b3   : > { %4388 = vmatpush1.bf16.msra.mxu0 %v6936_v50  ;;  %v1388_v50 = vld [vmem:[%s8689_s2 + $0xad8] sm:$0xff] }
 0x2b4   : > { %4470 = vmatpush1.bf16.msra.mxu1 %v6938_v51  ;;  %4389 = vmatprep.subr.bf16.mxu0 %v6953_v52  ;;  %v7048_v51 = vcombine.low %v1363_v14, %v1371_v41  ;;  %v7050_v52 = vcombine.low %v1364_v42, %v1372_v43  ;;  %v7067_v56 = vcombine.high %v1380_v49, %v1388_v50  ;;  %v1475_v41 = vld [vmem:[%s8689_s2 + $0xd90] sm:$0xff]  ;;  %v1476_v43 = vld [vmem:[%s8689_s2 + $0xd98] sm:$0xff] }
 0x2b5   : > { %4471 = vmatprep.subr.bf16.mxu1 %v6955_v55  ;;  %v7065_v55 = vcombine.high %v1379_v48, %v1387_v2  ;;  %v1483_v42 = vld [vmem:[%s8689_s2 + $0xdd0] sm:$0xff] }
 0x2b7   : > { %4390 = vmatpush1.bf16.msra.mxu0 %v6952_v60  ;;  %v1404_v60 = vld [vmem:[%s8689_s2 + $0xb58] sm:$0xff] }
 0x2b8   : > { %4472 = vmatpush1.bf16.msra.mxu1 %v6954_v61  ;;  %4391 = vmatprep.subr.bf16.mxu0 %v6969_v62  ;;  %v7064_v61 = vcombine.low %v1379_v48, %v1387_v2  ;;  %v7066_v62 = vcombine.low %v1380_v49, %v1388_v50  ;;  %v7083_v0 = vcombine.high %v1396_v59, %v1404_v60  ;;  %v1491_v2 = vld [vmem:[%s8689_s2 + $0xe10] sm:$0xff]  ;;  %v1492_v50 = vld [vmem:[%s8689_s2 + $0xe18] sm:$0xff] }
 0x2b9   : > { %4473 = vmatprep.subr.bf16.mxu1 %v6971_v63  ;;  %v7081_v63 = vcombine.high %v1395_v57, %v1403_v58  ;;  %v1499_v49 = vld [vmem:[%s8689_s2 + $0xe50] sm:$0xff] }
 0x2bb   : > { %4392 = vmatpush1.bf16.msra.mxu0 %v6968_v5  ;;  %v1420_v5 = vld [vmem:[%s8689_s2 + $0xbd8] sm:$0xff] }
 0x2bc   : > { %4474 = vmatpush1.bf16.msra.mxu1 %v6970_v6  ;;  %4402 = vmatprep.subr.bf16.mxu0 %v6985_v7  ;;  %v7080_v6 = vcombine.low %v1395_v57, %v1403_v58  ;;  %v7082_v7 = vcombine.low %v1396_v59, %v1404_v60  ;;  %v7099_v9 = vcombine.high %v1412_v4, %v1420_v5  ;;  %v1507_v58 = vld [vmem:[%s8689_s2 + $0xe90] sm:$0xff]  ;;  %v1508_v60 = vld [vmem:[%s8689_s2 + $0xe98] sm:$0xff] }
 0x2bd   : > { %4484 = vmatprep.subr.bf16.mxu1 %v6987_v8  ;;  %v7097_v8 = vcombine.high %v1411_v1, %v1419_v3  ;;  %v1515_v59 = vld [vmem:[%s8689_s2 + $0xed0] sm:$0xff] }
 0x2be   : > { %4394 = vmatmul.mubr.bf16.vlgmr.msra.gmra.mrb[8].mxu0 %v8811_v31 }
 0x2bf   : > { %4476 = vmatmul.mubr.bf16.vlgmr.msra.gmra.mrb[8].mxu1 %v8811_v31  ;;  %4403 = vmatpush1.bf16.msra.mxu0 %v6984_v11  ;;  %v1435_v11 = vld [vmem:[%s8689_s2 + $0xc50] sm:$0xff] }
 0x2c0   : > { %4434 = vmatprep.mubr.bf16.mxu0 %v8848_v26  ;;  %4485 = vmatpush1.bf16.msra.mxu1 %v6986_v18  ;;  %v7096_v18 = vcombine.low %v1411_v1, %v1419_v3  ;;  %v7113_v21 = vcombine.high %v1427_v10, %v1435_v11  ;;  %v1523_v3 = vld [vmem:[%s8689_s2 + $0xf10] sm:$0xff] }
 0x2c1   : > { %4516 = vmatprep.mubr.bf16.mxu1 %v8848_v26  ;;  %4404 = vmatprep.subr.bf16.mxu0 %v7001_v20  ;;  %v7098_v20 = vcombine.low %v1412_v4, %v1420_v5  ;;  %v1531_v4 = vld [vmem:[%s8689_s2 + $0xf50] sm:$0xff]  ;;  %v1524_v5 = vld [vmem:[%s8689_s2 + $0xf18] sm:$0xff] }
 0x2c2   : > { %4486 = vmatprep.subr.bf16.mxu1 %v7003_v23  ;;  %v1443_v23 = vld [vmem:[%s8689_s2 + $0xc90] sm:$0xff] }
 0x2c3   : > { %4405 = vmatpush1.bf16.msra.mxu0 %v7000_v27  ;;  %v1452_v27 = vld [vmem:[%s8689_s2 + $0xcd8] sm:$0xff] }
 0x2c4   : > { %4487 = vmatpush1.bf16.msra.mxu1 %v7002_v28  ;;  %4406 = vmatprep.subr.bf16.mxu0 %v7017_v29  ;;  %v7112_v28 = vcombine.low %v1427_v10, %v1435_v11  ;;  %v7114_v29 = vcombine.low %v1428_v16, %v1436_v17  ;;  %v7131_v33 = vcombine.high %v1444_v25, %v1452_v27  ;;  %v1539_v11 = vld [vmem:[%s8689_s2 + $0xf90] sm:$0xff]  ;;  %v1540_v17 = vld [vmem:[%s8689_s2 + $0xf98] sm:$0xff] }
 0x2c5   : > { %4488 = vmatprep.subr.bf16.mxu1 %v7019_v32  ;;  %v7129_v32 = vcombine.high %v1443_v23, %v1451_v24  ;;  %v1547_v16 = vld [vmem:[%s8689_s2 + $0xfd0] sm:$0xff] }
 0x2c7   : > { %4407 = vmatpush1.bf16.msra.mxu0 %v7016_v37  ;;  %v1468_v37 = vld [vmem:[%s8689_s2 + $0xd58] sm:$0xff] }
 0x2c8   : > { %4489 = vmatpush1.bf16.msra.mxu1 %v7018_v38  ;;  %4408 = vmatprep.subr.bf16.mxu0 %v7033_v39  ;;  %v7128_v38 = vcombine.low %v1443_v23, %v1451_v24  ;;  %v7130_v39 = vcombine.low %v1444_v25, %v1452_v27  ;;  %v7147_v14 = vcombine.high %v1460_v36, %v1468_v37  ;;  %v1045_v24 = vld [vmem:[%s8689_s2 + $0x20] sm:$0xff]  ;;  %v1046_v27 = vld [vmem:[%s8689_s2 + $0x28] sm:$0xff] }
 0x2c9   : > { %4490 = vmatprep.subr.bf16.mxu1 %v7035_v40  ;;  %v7145_v40 = vcombine.high %v1459_v34, %v1467_v35  ;;  %v1053_v25 = vld [vmem:[%s8689_s2 + $0x60] sm:$0xff] }
 0x2cb   : > { %4409 = vmatpush1.bf16.msra.mxu0 %v7032_v44  ;;  %v1484_v44 = vld [vmem:[%s8689_s2 + $0xdd8] sm:$0xff] }
 0x2cc   : > { %4491 = vmatpush1.bf16.msra.mxu1 %v7034_v45  ;;  %4410 = vmatprep.subr.bf16.mxu0 %v7049_v46  ;;  %v7144_v45 = vcombine.low %v1459_v34, %v1467_v35  ;;  %v7146_v46 = vcombine.low %v1460_v36, %v1468_v37  ;;  %v7163_v48 = vcombine.high %v1476_v43, %v1484_v44  ;;  %v1061_v35 = vld [vmem:[%s8689_s2 + $0xa0] sm:$0xff] }
 0x2cd   : > { %4492 = vmatprep.subr.bf16.mxu1 %v7051_v47  ;;  %v7161_v47 = vcombine.high %v1475_v41, %v1483_v42  ;;  %v1069_v36 = vld [vmem:[%s8689_s2 + $0xe0] sm:$0xff]  ;;  %v6732_v37 = vcombine.low %v1045_v24, %v1053_v25 }
 0x2cf   : > { %4411 = vmatpush1.bf16.msra.mxu0 %v7048_v51  ;;  %v1500_v51 = vld [vmem:[%s8689_s2 + $0xe58] sm:$0xff] }
 0x2d0   : > { %4493 = vmatpush1.bf16.msra.mxu1 %v7050_v52  ;;  %4412 = vmatprep.subr.bf16.mxu0 %v7065_v55  ;;  %v7160_v52 = vcombine.low %v1475_v41, %v1483_v42  ;;  %v7162_v55 = vcombine.low %v1476_v43, %v1484_v44  ;;  %v7179_v57 = vcombine.high %v1492_v50, %v1500_v51  ;;  %v1077_v41 = vld [vmem:[%s8689_s2 + $0x120] sm:$0xff]  ;;  %v1078_v44 = vld [vmem:[%s8689_s2 + $0x128] sm:$0xff] }
 0x2d1   : > { %4494 = vmatprep.subr.bf16.mxu1 %v7067_v56  ;;  %v7177_v56 = vcombine.high %v1491_v2, %v1499_v49  ;;  %v1085_v42 = vld [vmem:[%s8689_s2 + $0x160] sm:$0xff] }
 0x2d3   : > { %4413 = vmatpush1.bf16.msra.mxu0 %v7064_v61  ;;  %v1516_v61 = vld [vmem:[%s8689_s2 + $0xed8] sm:$0xff] }
 0x2d4   : > { %4495 = vmatpush1.bf16.msra.mxu1 %v7066_v62  ;;  %4414 = vmatprep.subr.bf16.mxu0 %v7081_v63  ;;  %v7176_v62 = vcombine.low %v1491_v2, %v1499_v49  ;;  %v7178_v63 = vcombine.low %v1492_v50, %v1500_v51  ;;  %v7195_v1 = vcombine.high %v1508_v60, %v1516_v61  ;;  %v1093_v49 = vld [vmem:[%s8689_s2 + $0x1a0] sm:$0xff]  ;;  %v1094_v51 = vld [vmem:[%s8689_s2 + $0x1a8] sm:$0xff] }
 0x2d5   : > { %4496 = vmatprep.subr.bf16.mxu1 %v7083_v0  ;;  %v7193_v0 = vcombine.high %v1507_v58, %v1515_v59  ;;  %v1101_v50 = vld [vmem:[%s8689_s2 + $0x1e0] sm:$0xff] }
 0x2d7   : > { %4415 = vmatpush1.bf16.msra.mxu0 %v7080_v6  ;;  %v1532_v6 = vld [vmem:[%s8689_s2 + $0xf58] sm:$0xff] }
 0x2d8   : > { %4497 = vmatpush1.bf16.msra.mxu1 %v7082_v7  ;;  %4416 = vmatprep.subr.bf16.mxu0 %v7097_v8  ;;  %v7192_v7 = vcombine.low %v1507_v58, %v1515_v59  ;;  %v7194_v8 = vcombine.low %v1508_v60, %v1516_v61  ;;  %v7211_v10 = vcombine.high %v1524_v5, %v1532_v6  ;;  %v1109_v59 = vld [vmem:[%s8689_s2 + $0x220] sm:$0xff]  ;;  %v1110_v61 = vld [vmem:[%s8689_s2 + $0x228] sm:$0xff] }
 0x2d9   : > { %4498 = vmatprep.subr.bf16.mxu1 %v7099_v9  ;;  %v7209_v9 = vcombine.high %v1523_v3, %v1531_v4  ;;  %v1117_v60 = vld [vmem:[%s8689_s2 + $0x260] sm:$0xff] }
 0x2db   : > { %4417 = vmatpush1.bf16.msra.mxu0 %v7096_v18  ;;  %v1548_v18 = vld [vmem:[%s8689_s2 + $0xfd8] sm:$0xff] }
 0x2dc   : > { %4499 = vmatpush1.bf16.msra.mxu1 %v7098_v20  ;;  %4418 = vmatprep.subr.bf16.mxu0 %v7113_v21  ;;  %v7208_v20 = vcombine.low %v1523_v3, %v1531_v4  ;;  %v7210_v21 = vcombine.low %v1524_v5, %v1532_v6  ;;  %v7227_v23 = vcombine.high %v1540_v17, %v1548_v18  ;;  %v1125_v4 = vld [vmem:[%s8689_s2 + $0x2a0] sm:$0xff]  ;;  %v1126_v6 = vld [vmem:[%s8689_s2 + $0x2a8] sm:$0xff] }
 0x2dd   : > { %4500 = vmatprep.subr.bf16.mxu1 %v7115_v22  ;;  %v7225_v22 = vcombine.high %v1539_v11, %v1547_v16  ;;  %v1133_v5 = vld [vmem:[%s8689_s2 + $0x2e0] sm:$0xff] }
 0x2df   : > { %4419 = vmatpush1.bf16.msra.mxu0 %v7112_v28  ;;  %v1054_v28 = vld [vmem:[%s8689_s2 + $0x68] sm:$0xff] }
 0x2e0   : > { %4501 = vmatpush1.bf16.msra.mxu1 %v7114_v29  ;;  %4420 = vmatprep.subr.bf16.mxu0 %v7129_v32  ;;  %v7224_v29 = vcombine.low %v1539_v11, %v1547_v16  ;;  %v7226_v32 = vcombine.low %v1540_v17, %v1548_v18  ;;  %v6735_v34 = vcombine.high %v1046_v27, %v1054_v28  ;;  %v1141_v16 = vld [vmem:[%s8689_s2 + $0x320] sm:$0xff]  ;;  %v1142_v18 = vld [vmem:[%s8689_s2 + $0x328] sm:$0xff] }
 0x2e1   : > { %4502 = vmatprep.subr.bf16.mxu1 %v7131_v33  ;;  %v6733_v33 = vcombine.high %v1045_v24, %v1053_v25  ;;  %v1149_v17 = vld [vmem:[%s8689_s2 + $0x360] sm:$0xff] }
 0x2e2   : > { %v1157_v25 = vld [vmem:[%s8689_s2 + $0x3a0] sm:$0xff] }
 0x2e3   : > { %4421 = vmatpush1.bf16.msra.mxu0 %v7128_v38  ;;  %v1062_v38 = vld [vmem:[%s8689_s2 + $0xa8] sm:$0xff] }
 0x2e4   : > { %4503 = vmatpush1.bf16.msra.mxu1 %v7130_v39  ;;  %4422 = vmatprep.subr.bf16.mxu0 %v7145_v40  ;;  %v1070_v39 = vld [vmem:[%s8689_s2 + $0xe8] sm:$0xff]  ;;  %v6734_v40 = vcombine.low %v1046_v27, %v1054_v28  ;;  %v1165_v27 = vld [vmem:[%s8689_s2 + $0x3e0] sm:$0xff] }
 0x2e5   : > { %4504 = vmatprep.subr.bf16.mxu1 %v7147_v14  ;;  %v6749_v14 = vcombine.high %v1061_v35, %v1069_v36  ;;  %v6751_v43 = vcombine.high %v1062_v38, %v1070_v39  ;;  %v1158_v28 = vld [vmem:[%s8689_s2 + $0x3a8] sm:$0xff] }
 0x2e7   : > { %4423 = vmatpush1.bf16.msra.mxu0 %v7144_v45  ;;  %v1086_v45 = vld [vmem:[%s8689_s2 + $0x168] sm:$0xff] }
 0x2e8   : > { %4505 = vmatpush1.bf16.msra.mxu1 %v7146_v46  ;;  %4424 = vmatprep.subr.bf16.mxu0 %v7161_v47  ;;  %v6748_v46 = vcombine.low %v1061_v35, %v1069_v36  ;;  %v6750_v47 = vcombine.low %v1062_v38, %v1070_v39  ;;  %v6767_v2 = vcombine.high %v1078_v44, %v1086_v45  ;;  %v1173_v36 = vld [vmem:[%s8689_s2 + $0x420] sm:$0xff]  ;;  %v1174_v38 = vld [vmem:[%s8689_s2 + $0x428] sm:$0xff] }
 0x2e9   : > { %4506 = vmatprep.subr.bf16.mxu1 %v7163_v48  ;;  %v6765_v48 = vcombine.high %v1077_v41, %v1085_v42  ;;  %v1182_v39 = vld [vmem:[%s8689_s2 + $0x468] sm:$0xff] }
 0x2eb   : > { %4425 = vmatpush1.bf16.msra.mxu0 %v7160_v52  ;;  %v1102_v52 = vld [vmem:[%s8689_s2 + $0x1e8] sm:$0xff] }
 0x2ec   : > { %4507 = vmatpush1.bf16.msra.mxu1 %v7162_v55  ;;  %4426 = vmatprep.subr.bf16.mxu0 %v7177_v56  ;;  %v6764_v55 = vcombine.low %v1077_v41, %v1085_v42  ;;  %v6766_v56 = vcombine.low %v1078_v44, %v1086_v45  ;;  %v6783_v58 = vcombine.high %v1094_v51, %v1102_v52  ;;  %v1197_v44 = vld [vmem:[%s8689_s2 + $0x4e0] sm:$0xff]  ;;  %v1190_v45 = vld [vmem:[%s8689_s2 + $0x4a8] sm:$0xff] }
 0x2ed   : > { %4508 = vmatprep.subr.bf16.mxu1 %v7179_v57  ;;  %v6781_v57 = vcombine.high %v1093_v49, %v1101_v50  ;;  %v6863_v42 = vcombine.high %v1174_v38, %v1182_v39 }
 0x2ef   : > { %4427 = vmatpush1.bf16.msra.mxu0 %v7176_v62  ;;  %v1118_v62 = vld [vmem:[%s8689_s2 + $0x268] sm:$0xff] }
 0x2f0   : > { %4509 = vmatpush1.bf16.msra.mxu1 %v7178_v63  ;;  %4428 = vmatprep.subr.bf16.mxu0 %v7193_v0  ;;  %v6780_v63 = vcombine.low %v1093_v49, %v1101_v50  ;;  %v6782_v0 = vcombine.low %v1094_v51, %v1102_v52  ;;  %v6799_v3 = vcombine.high %v1110_v61, %v1118_v62  ;;  %v1205_v50 = vld [vmem:[%s8689_s2 + $0x520] sm:$0xff]  ;;  %v1206_v52 = vld [vmem:[%s8689_s2 + $0x528] sm:$0xff] }
 0x2f1   : > { %4510 = vmatprep.subr.bf16.mxu1 %v7195_v1  ;;  %v6797_v1 = vcombine.high %v1109_v59, %v1117_v60  ;;  %v1213_v51 = vld [vmem:[%s8689_s2 + $0x560] sm:$0xff] }
 0x2f3   : > { %4429 = vmatpush1.bf16.msra.mxu0 %v7192_v7  ;;  %v1134_v7 = vld [vmem:[%s8689_s2 + $0x2e8] sm:$0xff] }
 0x2f4   : > { %4511 = vmatpush1.bf16.msra.mxu1 %v7194_v8  ;;  %4430 = vmatprep.subr.bf16.mxu0 %v7209_v9  ;;  %v6796_v8 = vcombine.low %v1109_v59, %v1117_v60  ;;  %v6798_v9 = vcombine.low %v1110_v61, %v1118_v62  ;;  %v6815_v11 = vcombine.high %v1126_v6, %v1134_v7  ;;  %v1221_v60 = vld [vmem:[%s8689_s2 + $0x5a0] sm:$0xff]  ;;  %v1222_v62 = vld [vmem:[%s8689_s2 + $0x5a8] sm:$0xff] }
 0x2f5   : > { %4512 = vmatprep.subr.bf16.mxu1 %v7211_v10  ;;  %v6813_v10 = vcombine.high %v1125_v4, %v1133_v5  ;;  %v1229_v61 = vld [vmem:[%s8689_s2 + $0x5e0] sm:$0xff] }
 0x2f7   : > { %4431 = vmatpush1.bf16.msra.mxu0 %v7208_v20  ;;  %v1150_v20 = vld [vmem:[%s8689_s2 + $0x368] sm:$0xff] }
 0x2f8   : > { %4513 = vmatpush1.bf16.msra.mxu1 %v7210_v21  ;;  %4432 = vmatprep.subr.bf16.mxu0 %v7225_v22  ;;  %v6812_v21 = vcombine.low %v1125_v4, %v1133_v5  ;;  %v6814_v22 = vcombine.low %v1126_v6, %v1134_v7  ;;  %v6831_v24 = vcombine.high %v1142_v18, %v1150_v20  ;;  %v1237_v5 = vld [vmem:[%s8689_s2 + $0x620] sm:$0xff]  ;;  %v1238_v7 = vld [vmem:[%s8689_s2 + $0x628] sm:$0xff] }
 0x2f9   : > { %4514 = vmatprep.subr.bf16.mxu1 %v7227_v23  ;;  %v6829_v23 = vcombine.high %v1141_v16, %v1149_v17  ;;  %v1245_v6 = vld [vmem:[%s8689_s2 + $0x660] sm:$0xff] }
 0x2fb   : > { %4433 = vmatpush1.bf16.msra.mxu0 %v7224_v29  ;;  %v1166_v29 = vld [vmem:[%s8689_s2 + $0x3e8] sm:$0xff] }
 0x2fc   : > { %4515 = vmatpush1.bf16.msra.mxu1 %v7226_v32  ;;  %4525 = vmatprep.subr.bf16.mxu0 %v6733_v33  ;;  %v6828_v32 = vcombine.low %v1141_v16, %v1149_v17  ;;  %v6830_v33 = vcombine.low %v1142_v18, %v1150_v20  ;;  %v6847_v35 = vcombine.high %v1158_v28, %v1166_v29  ;;  %v1253_v17 = vld [vmem:[%s8689_s2 + $0x6a0] sm:$0xff]  ;;  %v1254_v20 = vld [vmem:[%s8689_s2 + $0x6a8] sm:$0xff] }
 0x2fd   : > { %4607 = vmatprep.subr.bf16.mxu1 %v6735_v34  ;;  %v6845_v34 = vcombine.high %v1157_v25, %v1165_v27  ;;  %v1261_v18 = vld [vmem:[%s8689_s2 + $0x6e0] sm:$0xff] }
 0x2fe   : > { %4435 = vmatmul.mubr.bf16.vlgmr.msra.gmra.mrb[8].mxu0 %v8895_v53 }
 0x2ff   : > { %4517 = vmatmul.mubr.bf16.vlgmr.msra.gmra.mrb[8].mxu1 %v8895_v53  ;;  %4526 = vmatpush1.bf16.msra.mxu0 %v6732_v37  ;;  %v1181_v37 = vld [vmem:[%s8689_s2 + $0x460] sm:$0xff] }
 0x300   : > { %4557 = vmatprep.mubr.bf16.mxu0 %v8809_v30  ;;  %4608 = vmatpush1.bf16.msra.mxu1 %v6734_v40  ;;  %v6844_v40 = vcombine.low %v1157_v25, %v1165_v27  ;;  %v6861_v41 = vcombine.high %v1173_v36, %v1181_v37  ;;  %v1269_v27 = vld [vmem:[%s8689_s2 + $0x720] sm:$0xff] }
 0x301   : > { %4639 = vmatprep.mubr.bf16.mxu1 %v8809_v30  ;;  %4527 = vmatprep.subr.bf16.mxu0 %v6749_v14  ;;  %v6846_v14 = vcombine.low %v1158_v28, %v1166_v29  ;;  %v1277_v28 = vld [vmem:[%s8689_s2 + $0x760] sm:$0xff]  ;;  %v1270_v29 = vld [vmem:[%s8689_s2 + $0x728] sm:$0xff] }
 0x302   : > { %4609 = vmatprep.subr.bf16.mxu1 %v6751_v43  ;;  %v1189_v43 = vld [vmem:[%s8689_s2 + $0x4a0] sm:$0xff] }
 0x303   : > { %4528 = vmatpush1.bf16.msra.mxu0 %v6748_v46  ;;  %v1198_v46 = vld [vmem:[%s8689_s2 + $0x4e8] sm:$0xff] }
 0x304   : > { %4610 = vmatpush1.bf16.msra.mxu1 %v6750_v47  ;;  %4529 = vmatprep.subr.bf16.mxu0 %v6765_v48  ;;  %v6860_v47 = vcombine.low %v1173_v36, %v1181_v37  ;;  %v6862_v48 = vcombine.low %v1174_v38, %v1182_v39  ;;  %v6879_v49 = vcombine.high %v1190_v45, %v1198_v46  ;;  %v1285_v37 = vld [vmem:[%s8689_s2 + $0x7a0] sm:$0xff]  ;;  %v1286_v39 = vld [vmem:[%s8689_s2 + $0x7a8] sm:$0xff] }
 0x305   : > { %4611 = vmatprep.subr.bf16.mxu1 %v6767_v2  ;;  %v6877_v2 = vcombine.high %v1189_v43, %v1197_v44  ;;  %v1293_v38 = vld [vmem:[%s8689_s2 + $0x7e0] sm:$0xff] }
 0x307   : > { %4530 = vmatpush1.bf16.msra.mxu0 %v6764_v55  ;;  %v1214_v55 = vld [vmem:[%s8689_s2 + $0x568] sm:$0xff] }
 0x308   : > { %4612 = vmatpush1.bf16.msra.mxu1 %v6766_v56  ;;  %4531 = vmatprep.subr.bf16.mxu0 %v6781_v57  ;;  %v6876_v56 = vcombine.low %v1189_v43, %v1197_v44  ;;  %v6878_v57 = vcombine.low %v1190_v45, %v1198_v46  ;;  %v6895_v59 = vcombine.high %v1206_v52, %v1214_v55  ;;  %v1301_v44 = vld [vmem:[%s8689_s2 + $0x820] sm:$0xff]  ;;  %v1302_v46 = vld [vmem:[%s8689_s2 + $0x828] sm:$0xff] }
 0x309   : > { %4613 = vmatprep.subr.bf16.mxu1 %v6783_v58  ;;  %v6893_v58 = vcombine.high %v1205_v50, %v1213_v51  ;;  %v1309_v45 = vld [vmem:[%s8689_s2 + $0x860] sm:$0xff] }
 0x30b   : > { %4532 = vmatpush1.bf16.msra.mxu0 %v6780_v63  ;;  %v1230_v63 = vld [vmem:[%s8689_s2 + $0x5e8] sm:$0xff] }
 0x30c   : > { %4614 = vmatpush1.bf16.msra.mxu1 %v6782_v0  ;;  %4533 = vmatprep.subr.bf16.mxu0 %v6797_v1  ;;  %v6892_v0 = vcombine.low %v1205_v50, %v1213_v51  ;;  %v6894_v1 = vcombine.low %v1206_v52, %v1214_v55  ;;  %v6911_v4 = vcombine.high %v1222_v62, %v1230_v63  ;;  %v1317_v51 = vld [vmem:[%s8689_s2 + $0x8a0] sm:$0xff] }
 0x30d   : > { %4615 = vmatprep.subr.bf16.mxu1 %v6799_v3  ;;  %v6909_v3 = vcombine.high %v1221_v60, %v1229_v61  ;;  %v1325_v52 = vld [vmem:[%s8689_s2 + $0x8e0] sm:$0xff]  ;;  %v6988_v55 = vcombine.low %v1301_v44, %v1309_v45 }
 0x30f   : > { %4534 = vmatpush1.bf16.msra.mxu0 %v6796_v8  ;;  %v1246_v8 = vld [vmem:[%s8689_s2 + $0x668] sm:$0xff] }
 0x310   : > { %4616 = vmatpush1.bf16.msra.mxu1 %v6798_v9  ;;  %4535 = vmatprep.subr.bf16.mxu0 %v6813_v10  ;;  %v6908_v9 = vcombine.low %v1221_v60, %v1229_v61  ;;  %v6910_v10 = vcombine.low %v1222_v62, %v1230_v63  ;;  %v6927_v16 = vcombine.high %v1238_v7, %v1246_v8  ;;  %v1333_v60 = vld [vmem:[%s8689_s2 + $0x920] sm:$0xff]  ;;  %v1334_v63 = vld [vmem:[%s8689_s2 + $0x928] sm:$0xff] }
 0x311   : > { %4617 = vmatprep.subr.bf16.mxu1 %v6815_v11  ;;  %v6925_v11 = vcombine.high %v1237_v5, %v1245_v6  ;;  %v1341_v61 = vld [vmem:[%s8689_s2 + $0x960] sm:$0xff] }
 0x313   : > { %4536 = vmatpush1.bf16.msra.mxu0 %v6812_v21  ;;  %v1262_v21 = vld [vmem:[%s8689_s2 + $0x6e8] sm:$0xff] }
 0x314   : > { %4618 = vmatpush1.bf16.msra.mxu1 %v6814_v22  ;;  %4537 = vmatprep.subr.bf16.mxu0 %v6829_v23  ;;  %v6924_v22 = vcombine.low %v1237_v5, %v1245_v6  ;;  %v6926_v23 = vcombine.low %v1238_v7, %v1246_v8  ;;  %v6943_v25 = vcombine.high %v1254_v20, %v1262_v21  ;;  %v1349_v6 = vld [vmem:[%s8689_s2 + $0x9a0] sm:$0xff]  ;;  %v1350_v8 = vld [vmem:[%s8689_s2 + $0x9a8] sm:$0xff] }
 0x315   : > { %4619 = vmatprep.subr.bf16.mxu1 %v6831_v24  ;;  %v6941_v24 = vcombine.high %v1253_v17, %v1261_v18  ;;  %v1357_v7 = vld [vmem:[%s8689_s2 + $0x9e0] sm:$0xff] }
 0x317   : > { %4538 = vmatpush1.bf16.msra.mxu0 %v6828_v32  ;;  %v1278_v32 = vld [vmem:[%s8689_s2 + $0x768] sm:$0xff] }
 0x318   : > { %4620 = vmatpush1.bf16.msra.mxu1 %v6830_v33  ;;  %4539 = vmatprep.subr.bf16.mxu0 %v6845_v34  ;;  %v6940_v33 = vcombine.low %v1253_v17, %v1261_v18  ;;  %v6942_v34 = vcombine.low %v1254_v20, %v1262_v21  ;;  %v6959_v36 = vcombine.high %v1270_v29, %v1278_v32  ;;  %v1365_v18 = vld [vmem:[%s8689_s2 + $0xa20] sm:$0xff]  ;;  %v1366_v21 = vld [vmem:[%s8689_s2 + $0xa28] sm:$0xff] }
 0x319   : > { %4621 = vmatprep.subr.bf16.mxu1 %v6847_v35  ;;  %v6957_v35 = vcombine.high %v1269_v27, %v1277_v28  ;;  %v1373_v20 = vld [vmem:[%s8689_s2 + $0xa60] sm:$0xff] }
 0x31b   : > { %4540 = vmatpush1.bf16.msra.mxu0 %v6844_v40  ;;  %v1294_v40 = vld [vmem:[%s8689_s2 + $0x7e8] sm:$0xff] }
 0x31c   : > { %4622 = vmatpush1.bf16.msra.mxu1 %v6846_v14  ;;  %4541 = vmatprep.subr.bf16.mxu0 %v6861_v41  ;;  %v6956_v14 = vcombine.low %v1269_v27, %v1277_v28  ;;  %v6958_v41 = vcombine.low %v1270_v29, %v1278_v32  ;;  %v6975_v43 = vcombine.high %v1286_v39, %v1294_v40  ;;  %v1381_v28 = vld [vmem:[%s8689_s2 + $0xaa0] sm:$0xff]  ;;  %v1382_v32 = vld [vmem:[%s8689_s2 + $0xaa8] sm:$0xff] }
 0x31d   : > { %4623 = vmatprep.subr.bf16.mxu1 %v6863_v42  ;;  %v6973_v42 = vcombine.high %v1285_v37, %v1293_v38  ;;  %v1389_v29 = vld [vmem:[%s8689_s2 + $0xae0] sm:$0xff] }
 0x31f   : > { %4542 = vmatpush1.bf16.msra.mxu0 %v6860_v47  ;;  %v1310_v47 = vld [vmem:[%s8689_s2 + $0x868] sm:$0xff] }
 0x320   : > { %4624 = vmatpush1.bf16.msra.mxu1 %v6862_v48  ;;  %4543 = vmatprep.subr.bf16.mxu0 %v6877_v2  ;;  %v6972_v48 = vcombine.low %v1285_v37, %v1293_v38  ;;  %v6974_v2 = vcombine.low %v1286_v39, %v1294_v40  ;;  %v6991_v50 = vcombine.high %v1302_v46, %v1310_v47  ;;  %v1397_v39 = vld [vmem:[%s8689_s2 + $0xb20] sm:$0xff] }
 0x321   : > { %4625 = vmatprep.subr.bf16.mxu1 %v6879_v49  ;;  %v6989_v49 = vcombine.high %v1301_v44, %v1309_v45  ;;  %v7069_v37 = vcombine.high %v1381_v28, %v1389_v29  ;;  %v1405_v40 = vld [vmem:[%s8689_s2 + $0xb60] sm:$0xff] }
 0x323   : > { %4544 = vmatpush1.bf16.msra.mxu0 %v6876_v56  ;;  %v1318_v56 = vld [vmem:[%s8689_s2 + $0x8a8] sm:$0xff] }
 0x324   : > { %4626 = vmatpush1.bf16.msra.mxu1 %v6878_v57  ;;  %4545 = vmatprep.subr.bf16.mxu0 %v6893_v58  ;;  %v1326_v57 = vld [vmem:[%s8689_s2 + $0x8e8] sm:$0xff]  ;;  %v6990_v58 = vcombine.low %v1302_v46, %v1310_v47  ;;  %v7068_v46 = vcombine.low %v1381_v28, %v1389_v29  ;;  %v1445_v28 = vld [vmem:[%s8689_s2 + $0xca0] sm:$0xff] }
 0x325   : > { %4627 = vmatprep.subr.bf16.mxu1 %v6895_v59  ;;  %v7005_v59 = vcombine.high %v1317_v51, %v1325_v52  ;;  %v7007_v62 = vcombine.high %v1318_v56, %v1326_v57  ;;  %v1453_v29 = vld [vmem:[%s8689_s2 + $0xce0] sm:$0xff] }
 0x327   : > { %4546 = vmatpush1.bf16.msra.mxu0 %v6892_v0  ;;  %v1342_v0 = vld [vmem:[%s8689_s2 + $0x968] sm:$0xff] }
 0x328   : > { %4628 = vmatpush1.bf16.msra.mxu1 %v6894_v1  ;;  %4547 = vmatprep.subr.bf16.mxu0 %v6909_v3  ;;  %v7004_v1 = vcombine.low %v1317_v51, %v1325_v52  ;;  %v7006_v3 = vcombine.low %v1318_v56, %v1326_v57  ;;  %v7023_v5 = vcombine.high %v1334_v63, %v1342_v0  ;;  %v1413_v51 = vld [vmem:[%s8689_s2 + $0xba0] sm:$0xff] }
 0x329   : > { %4629 = vmatprep.subr.bf16.mxu1 %v6911_v4  ;;  %v7021_v4 = vcombine.high %v1333_v60, %v1341_v61  ;;  %v1421_v52 = vld [vmem:[%s8689_s2 + $0xbe0] sm:$0xff] }
 0x32b   : > { %4548 = vmatpush1.bf16.msra.mxu0 %v6908_v9  ;;  %v1358_v9 = vld [vmem:[%s8689_s2 + $0x9e8] sm:$0xff] }
 0x32c   : > { %4630 = vmatpush1.bf16.msra.mxu1 %v6910_v10  ;;  %4549 = vmatprep.subr.bf16.mxu0 %v6925_v11  ;;  %v7020_v10 = vcombine.low %v1333_v60, %v1341_v61  ;;  %v7022_v11 = vcombine.low %v1334_v63, %v1342_v0  ;;  %v7039_v17 = vcombine.high %v1350_v8, %v1358_v9  ;;  %v1422_v60 = vld [vmem:[%s8689_s2 + $0xbe8] sm:$0xff] }
 0x32d   : > { %4631 = vmatprep.subr.bf16.mxu1 %v6927_v16  ;;  %v7037_v16 = vcombine.high %v1349_v6, %v1357_v7 }
 0x32f   : > { %4550 = vmatpush1.bf16.msra.mxu0 %v6924_v22  ;;  %v1374_v22 = vld [vmem:[%s8689_s2 + $0xa68] sm:$0xff] }
 0x330   : > { %4632 = vmatpush1.bf16.msra.mxu1 %v6926_v23  ;;  %4551 = vmatprep.subr.bf16.mxu0 %v6941_v24  ;;  %v7036_v23 = vcombine.low %v1349_v6, %v1357_v7  ;;  %v7038_v24 = vcombine.low %v1350_v8, %v1358_v9  ;;  %v7055_v27 = vcombine.high %v1366_v21, %v1374_v22 }
 0x331   : > { %4633 = vmatprep.subr.bf16.mxu1 %v6943_v25  ;;  %v7053_v25 = vcombine.high %v1365_v18, %v1373_v20  ;;  %v7101_v8 = vcombine.high %v1413_v51, %v1421_v52 }
 0x333   : > { %4552 = vmatpush1.bf16.msra.mxu0 %v6940_v33  ;;  %v1390_v33 = vld [vmem:[%s8689_s2 + $0xae8] sm:$0xff] }
 0x334   : > { %4634 = vmatpush1.bf16.msra.mxu1 %v6942_v34  ;;  %4553 = vmatprep.subr.bf16.mxu0 %v6957_v35  ;;  %v7052_v34 = vcombine.low %v1365_v18, %v1373_v20  ;;  %v9126_v35 = vld [vmem:[%s464_s8] sm:$0xff]  ;;  %v7071_v38 = vcombine.high %v1382_v32, %v1390_v33  ;;  %v7070_v47 = vcombine.low %v1382_v32, %v1390_v33  ;;  %v1430_v18 = vld [vmem:[%s8689_s2 + $0xc28] sm:$0xff] }
 0x335   : > { %4635 = vmatprep.subr.bf16.mxu1 %v6959_v36  ;;  %v7054_v36 = vcombine.low %v1366_v21, %v1374_v22  ;;  %v1564_v44 = vrot.slane %v9126_v35, %v8799_v15  ;;  %v1572_v45 = vrot.slane %v9126_v35, %v8830_v54  ;;  %v1438_v20 = vld [vmem:[%s8689_s2 + $0xc68] sm:$0xff] }
 0x336   : > { %v1446_v32 = vld [vmem:[%s8689_s2 + $0xca8] sm:$0xff] }
 0x337   : > { %4554 = vmatpush1.bf16.msra.mxu0 %v6956_v14  ;;  %v1560_v14 = vrot.slane %v9126_v35, %v8794_v13  ;;  %v1454_v33 = vld [vmem:[%s8689_s2 + $0xce8] sm:$0xff] }
 0x338   : > { %4636 = vmatpush1.bf16.msra.mxu1 %v6958_v41  ;;  %4555 = vmatprep.subr.bf16.mxu0 %v6973_v42  ;;  %v1568_v41 = vrot.slane %v9126_v35, %v8877_v19  ;;  %v1398_v42 = vld [vmem:[%s8689_s2 + $0xb28] sm:$0xff] }
 0x339   : > { %4637 = vmatprep.subr.bf16.mxu1 %v6975_v43  ;;  %v1406_v43 = vld [vmem:[%s8689_s2 + $0xb68] sm:$0xff] }
 0x33a   : > { %v7086_v7 = vcombine.low %v1398_v42, %v1406_v43 }
 0x33b   : > { %4556 = vmatpush1.bf16.msra.mxu0 %v6972_v48  ;;  %v7085_v48 = vcombine.high %v1397_v39, %v1405_v40 }
 0x33c   : > { %4638 = vmatpush1.bf16.msra.mxu1 %v6974_v2  ;;  %4566 = vmatprep.subr.bf16.mxu0 %v6989_v49 }
 0x33d   : > { %4648 = vmatprep.subr.bf16.mxu1 %v6991_v50  ;;  %v7087_v50 = vcombine.high %v1398_v42, %v1406_v43  ;;  %v7132_v42 = vcombine.low %v1445_v28, %v1453_v29  ;;  %v7134_v43 = vcombine.low %v1446_v32, %v1454_v33 }
 0x33e   : > { %4558 = vmatmul.mubr.bf16.vlgmr.msra.gmra.mrb[12].mxu0 %v8811_v31 }
 0x33f   : > { %4640 = vmatmul.mubr.bf16.vlgmr.msra.gmra.mrb[12].mxu1 %v8811_v31  ;;  %4567 = vmatpush1.bf16.msra.mxu0 %v6988_v55 }
 0x340   : > { %4598 = vmatprep.mubr.bf16.mxu0 %v8848_v26  ;;  %4649 = vmatpush1.bf16.msra.mxu1 %v6990_v58 }
 0x341   : > { %4680 = vmatprep.mubr.bf16.mxu1 %v8848_v26  ;;  %4568 = vmatprep.subr.bf16.mxu0 %v7005_v59  ;;  %v1414_v59 = vld [vmem:[%s8689_s2 + $0xba8] sm:$0xff] }
 0x342   : > { %4650 = vmatprep.subr.bf16.mxu1 %v7007_v62 }
 0x343   : > { %4569 = vmatpush1.bf16.msra.mxu0 %v7004_v1  ;;  %v7084_v1 = vcombine.low %v1397_v39, %v1405_v40  ;;  %v1461_v39 = vld [vmem:[%s8689_s2 + $0xd20] sm:$0xff] }
 0x344   : > { %4651 = vmatpush1.bf16.msra.mxu1 %v7006_v3  ;;  %4570 = vmatprep.subr.bf16.mxu0 %v7021_v4  ;;  %v1469_v40 = vld [vmem:[%s8689_s2 + $0xd60] sm:$0xff] }
 0x345   : > { %4652 = vmatprep.subr.bf16.mxu1 %v7023_v5 }
 0x347   : > { %4571 = vmatpush1.bf16.msra.mxu0 %v7020_v10 }
 0x348   : > { %4653 = vmatpush1.bf16.msra.mxu1 %v7022_v11  ;;  %4572 = vmatprep.subr.bf16.mxu0 %v7037_v16  ;;  %v7103_v11 = vcombine.high %v1414_v59, %v1422_v60  ;;  %v1429_v16 = vld [vmem:[%s8689_s2 + $0xc20] sm:$0xff] }
 0x349   : > { %4654 = vmatprep.subr.bf16.mxu1 %v7039_v17  ;;  %v1437_v17 = vld [vmem:[%s8689_s2 + $0xc60] sm:$0xff] }
 0x34b   : > { %4573 = vmatpush1.bf16.msra.mxu0 %v7036_v23  ;;  %v7100_v23 = vcombine.low %v1413_v51, %v1421_v52 }
 0x34c   : > { %4655 = vmatpush1.bf16.msra.mxu1 %v7038_v24  ;;  %4574 = vmatprep.subr.bf16.mxu0 %v7053_v25  ;;  %v7102_v24 = vcombine.low %v1414_v59, %v1422_v60  ;;  %v7117_v25 = vcombine.high %v1429_v16, %v1437_v17 }
 0x34d   : > { %4656 = vmatprep.subr.bf16.mxu1 %v7055_v27  ;;  %v7119_v27 = vcombine.high %v1430_v18, %v1438_v20 }
 0x34f   : > { %4575 = vmatpush1.bf16.msra.mxu0 %v7052_v34  ;;  %v7116_v34 = vcombine.low %v1429_v16, %v1437_v17 }
 0x350   : > { %4657 = vmatpush1.bf16.msra.mxu1 %v7054_v36  ;;  %4576 = vmatprep.subr.bf16.mxu0 %v7069_v37  ;;  %v7118_v36 = vcombine.low %v1430_v18, %v1438_v20  ;;  %v7133_v37 = vcombine.high %v1445_v28, %v1453_v29 }
 0x351   : > { %v4272_v2 = vpop.f32.mrb[4].mxu0  ;;  %v4354_v49 = vpop.f32.mrb[4].mxu1  ;;  %4658 = vmatprep.subr.bf16.mxu1 %v7071_v38  ;;  %v7135_v38 = vcombine.high %v1446_v32, %v1454_v33 }
 0x352   : > { %v7513_v55 = vadd.f32 %v4272_v2, %v1560_v14  ;;  %v7515_v56 = vadd.f32 %v4354_v49, %v1568_v41  ;;  %v4274_v57 = vpop.f32.mrb[5].mxu0  ;;  %v4356_v58 = vpop.f32.mrb[5].mxu1  ;;  %v1462_v14 = vld [vmem:[%s8689_s2 + $0xd28] sm:$0xff]  ;;  %v7148_v49 = vcombine.low %v1461_v39, %v1469_v40 }
 0x353   : > { %v7514_v61 = vadd.f32 %v4274_v57, %v1564_v44  ;;  %v7516_v62 = vadd.f32 %v4356_v58, %v1572_v45  ;;  %v4276_v63 = vpop.f32.mrb[6].mxu0  ;;  %v4358_v0 = vpop.f32.mrb[6].mxu1  ;;  %4577 = vmatpush1.bf16.msra.mxu0 %v7068_v46  ;;  %v1470_v41 = vld [vmem:[%s8689_s2 + $0xd68] sm:$0xff]  ;;  %v7149_v44 = vcombine.high %v1461_v39, %v1469_v40  ;;  %v1477_v46 = vld [vmem:[%s8689_s2 + $0xda0] sm:$0xff] }
 0x354   : > { %v4853_v3 = vmax.f32 %v7513_v55, 0.0  ;;  %v4855_v4 = vmax.f32 %v7515_v56, 0.0  ;;  %4659 = vmatpush1.bf16.msra.mxu1 %v7070_v47  ;;  %v4277_v5 = vpop.f32.mrb[7].mxu0  ;;  %v4359_v6 = vpop.f32.mrb[7].mxu1  ;;  %4578 = vmatprep.subr.bf16.mxu0 %v7085_v48  ;;  %v7151_v45 = vcombine.high %v1462_v14, %v1470_v41  ;;  %v1485_v47 = vld [vmem:[%s8689_s2 + $0xde0] sm:$0xff]  ;;  %v1478_v48 = vld [vmem:[%s8689_s2 + $0xda8] sm:$0xff] }
 0x355   : > { %v4854_v9 = vmax.f32 %v7514_v61, 0.0  ;;  %v4856_v10 = vmax.f32 %v7516_v62, 0.0  ;;  %4660 = vmatprep.subr.bf16.mxu1 %v7087_v50  ;;  %v1486_v2 = vld [vmem:[%s8689_s2 + $0xde8] sm:$0xff]  ;;  %v7150_v50 = vcombine.low %v1462_v14, %v1470_v41  ;;  %v7165_v51 = vcombine.high %v1477_v46, %v1485_v47  ;;  %v1493_v55 = vld [vmem:[%s8689_s2 + $0xe20] sm:$0xff] }
 0x356   : > { %v7167_v52 = vcombine.high %v1478_v48, %v1486_v2  ;;  %v1501_v56 = vld [vmem:[%s8689_s2 + $0xe60] sm:$0xff]  ;;  %v1494_v57 = vld [vmem:[%s8689_s2 + $0xe28] sm:$0xff]  ;;  %v7164_v59 = vcombine.low %v1477_v46, %v1485_v47  ;;  %v7166_v60 = vcombine.low %v1478_v48, %v1486_v2  ;;  %v1072_v46 = vld [vmem:[%s8689_s2 + $0xf8] sm:$0xff] }
 0x357   : > { %v9148_v21 = vpack.c.bf16 %v4854_v9, %v4853_v3  ;;  %v9150_v22 = vpack.c.bf16 %v4856_v10, %v4855_v4  ;;  %4579 = vmatpush1.bf16.msra.mxu0 %v7084_v1  ;;  %v1502_v58 = vld [vmem:[%s8689_s2 + $0xe68] sm:$0xff]  ;;  %v7181_v61 = vcombine.high %v1493_v55, %v1501_v56  ;;  %v1509_v63 = vld [vmem:[%s8689_s2 + $0xea0] sm:$0xff]  ;;  %v7180_v4 = vcombine.low %v1493_v55, %v1501_v56  ;;  %v1079_v2 = vld [vmem:[%s8689_s2 + $0x130] sm:$0xff] }
 0x358   : > { %4661 = vmatpush1.bf16.msra.mxu1 %v7086_v7  ;;  %4580 = vmatprep.subr.bf16.mxu0 %v7101_v8  ;;  %v7183_v62 = vcombine.high %v1494_v57, %v1502_v58  ;;  %v1517_v0 = vld [vmem:[%s8689_s2 + $0xee0] sm:$0xff]  ;;  %v1510_v1 = vld [vmem:[%s8689_s2 + $0xea8] sm:$0xff]  ;;  %v7182_v5 = vcombine.low %v1494_v57, %v1502_v58 }
 0x359   : > { %4662 = vmatprep.subr.bf16.mxu1 %v7103_v11  ;;  %v1518_v3 = vld [vmem:[%s8689_s2 + $0xee8] sm:$0xff]  ;;  %v7197_v6 = vcombine.high %v1509_v63, %v1517_v0  ;;  %v1525_v8 = vld [vmem:[%s8689_s2 + $0xf20] sm:$0xff]  ;;  %v7196_v16 = vcombine.low %v1509_v63, %v1517_v0 }
 0x35a   : > { %v7199_v7 = vcombine.high %v1510_v1, %v1518_v3  ;;  %v1533_v9 = vld [vmem:[%s8689_s2 + $0xf60] sm:$0xff]  ;;  %v1526_v10 = vld [vmem:[%s8689_s2 + $0xf28] sm:$0xff]  ;;  %v7198_v17 = vcombine.low %v1510_v1, %v1518_v3  ;;  %v1111_v3 = vld [vmem:[%s8689_s2 + $0x230] sm:$0xff] }
 0x35b   : > { %4581 = vmatpush1.bf16.msra.mxu0 %v7100_v23  ;;  %v1534_v11 = vld [vmem:[%s8689_s2 + $0xf68] sm:$0xff]  ;;  %v7213_v18 = vcombine.high %v1525_v8, %v1533_v9  ;;  %v1541_v23 = vld [vmem:[%s8689_s2 + $0xfa0] sm:$0xff]  ;;  %v7212_v28 = vcombine.low %v1525_v8, %v1533_v9 }
 0x35c   : > { %4663 = vmatpush1.bf16.msra.mxu1 %v7102_v24  ;;  %4582 = vmatprep.subr.bf16.mxu0 %v7117_v25  ;;  %v7215_v20 = vcombine.high %v1526_v10, %v1534_v11  ;;  %v1549_v24 = vld [vmem:[%s8689_s2 + $0xfe0] sm:$0xff]  ;;  %v1542_v25 = vld [vmem:[%s8689_s2 + $0xfa8] sm:$0xff]  ;;  %v7214_v29 = vcombine.low %v1526_v10, %v1534_v11  ;;  %v1127_v11 = vld [vmem:[%s8689_s2 + $0x2b0] sm:$0xff] }
 0x35d   : > { %4664 = vmatprep.subr.bf16.mxu1 %v7119_v27  ;;  %v1550_v27 = vld [vmem:[%s8689_s2 + $0xfe8] sm:$0xff]  ;;  %v7229_v32 = vcombine.high %v1541_v23, %v1549_v24  ;;  %v7228_v39 = vcombine.low %v1541_v23, %v1549_v24 }
 0x35e   : > { %v7231_v33 = vcombine.high %v1542_v25, %v1550_v27  ;;  %v7230_v40 = vcombine.low %v1542_v25, %v1550_v27  ;;  %v1143_v27 = vld [vmem:[%s8689_s2 + $0x330] sm:$0xff] }
 0x35f   : > { %4583 = vmatpush1.bf16.msra.mxu0 %v7116_v34  ;;  %v1047_v34 = vld [vmem:[%s8689_s2 + $0x30] sm:$0xff] }
 0x360   : > { %4665 = vmatpush1.bf16.msra.mxu1 %v7118_v36  ;;  %4584 = vmatprep.subr.bf16.mxu0 %v7133_v37  ;;  %v1055_v36 = vld [vmem:[%s8689_s2 + $0x70] sm:$0xff]  ;;  %v1048_v37 = vld [vmem:[%s8689_s2 + $0x38] sm:$0xff] }
 0x361   : > { %4666 = vmatprep.subr.bf16.mxu1 %v7135_v38  ;;  %v1056_v38 = vld [vmem:[%s8689_s2 + $0x78] sm:$0xff]  ;;  %v6737_v14 = vcombine.high %v1047_v34, %v1055_v36 }
 0x362   : > { %v6739_v41 = vcombine.high %v1048_v37, %v1056_v38  ;;  %v6738_v47 = vcombine.low %v1048_v37, %v1056_v38  ;;  %v1159_v38 = vld [vmem:[%s8689_s2 + $0x3b0] sm:$0xff] }
 0x363   : > { %4585 = vmatpush1.bf16.msra.mxu0 %v7132_v42  ;;  %v1063_v42 = vld [vmem:[%s8689_s2 + $0xb0] sm:$0xff] }
 0x364   : > { %4667 = vmatpush1.bf16.msra.mxu1 %v7134_v43  ;;  %4586 = vmatprep.subr.bf16.mxu0 %v7149_v44  ;;  %v1071_v43 = vld [vmem:[%s8689_s2 + $0xf0] sm:$0xff]  ;;  %v6736_v44 = vcombine.low %v1047_v34, %v1055_v36 }
 0x365   : > { %4668 = vmatprep.subr.bf16.mxu1 %v7151_v45  ;;  %v1064_v45 = vld [vmem:[%s8689_s2 + $0xb8] sm:$0xff]  ;;  %v6753_v48 = vcombine.high %v1063_v42, %v1071_v43  ;;  %v6752_v55 = vcombine.low %v1063_v42, %v1071_v43 }
 0x366   : > { %v6754_v56 = vcombine.low %v1064_v45, %v1072_v46 }
 0x367   : > { %4587 = vmatpush1.bf16.msra.mxu0 %v7148_v49  ;;  %v1087_v49 = vld [vmem:[%s8689_s2 + $0x170] sm:$0xff] }
 0x368   : > { %4669 = vmatpush1.bf16.msra.mxu1 %v7150_v50  ;;  %4588 = vmatprep.subr.bf16.mxu0 %v7165_v51  ;;  %v6755_v50 = vcombine.high %v1064_v45, %v1072_v46  ;;  %v1080_v51 = vld [vmem:[%s8689_s2 + $0x138] sm:$0xff]  ;;  %v6769_v57 = vcombine.high %v1079_v2, %v1087_v49  ;;  %v6768_v63 = vcombine.low %v1079_v2, %v1087_v49  ;;  %v1175_v45 = vld [vmem:[%s8689_s2 + $0x430] sm:$0xff] }
 0x369   : > { %4670 = vmatprep.subr.bf16.mxu1 %v7167_v52  ;;  %v1088_v52 = vld [vmem:[%s8689_s2 + $0x178] sm:$0xff]  ;;  %v1183_v46 = vld [vmem:[%s8689_s2 + $0x470] sm:$0xff] }
 0x36a   : > { %v6771_v58 = vcombine.high %v1080_v51, %v1088_v52  ;;  %v6770_v0 = vcombine.low %v1080_v51, %v1088_v52  ;;  %v1191_v52 = vld [vmem:[%s8689_s2 + $0x4b0] sm:$0xff] }
 0x36b   : > { %4589 = vmatpush1.bf16.msra.mxu0 %v7164_v59  ;;  %v1095_v59 = vld [vmem:[%s8689_s2 + $0x1b0] sm:$0xff] }
 0x36c   : > { %4671 = vmatpush1.bf16.msra.mxu1 %v7166_v60  ;;  %4590 = vmatprep.subr.bf16.mxu0 %v7181_v61  ;;  %v1103_v60 = vld [vmem:[%s8689_s2 + $0x1f0] sm:$0xff]  ;;  %v1096_v61 = vld [vmem:[%s8689_s2 + $0x1b8] sm:$0xff] }
 0x36d   : > { %4672 = vmatprep.subr.bf16.mxu1 %v7183_v62  ;;  %v1104_v62 = vld [vmem:[%s8689_s2 + $0x1f8] sm:$0xff]  ;;  %v6785_v1 = vcombine.high %v1095_v59, %v1103_v60 }
 0x36e   : > { %v6786_v8 = vcombine.low %v1096_v61, %v1104_v62 }
 0x36f   : > { %4591 = vmatpush1.bf16.msra.mxu0 %v7180_v4  ;;  %v1119_v4 = vld [vmem:[%s8689_s2 + $0x270] sm:$0xff] }
 0x370   : > { %4673 = vmatpush1.bf16.msra.mxu1 %v7182_v5  ;;  %4592 = vmatprep.subr.bf16.mxu0 %v7197_v6  ;;  %v1112_v5 = vld [vmem:[%s8689_s2 + $0x238] sm:$0xff]  ;;  %v6801_v9 = vcombine.high %v1111_v3, %v1119_v4 }
 0x371   : > { %4674 = vmatprep.subr.bf16.mxu1 %v7199_v7  ;;  %v1120_v6 = vld [vmem:[%s8689_s2 + $0x278] sm:$0xff]  ;;  %v6784_v7 = vcombine.low %v1095_v59, %v1103_v60 }
 0x372   : > { %v6803_v10 = vcombine.high %v1112_v5, %v1120_v6  ;;  %v6802_v23 = vcombine.low %v1112_v5, %v1120_v6  ;;  %v1223_v6 = vld [vmem:[%s8689_s2 + $0x5b0] sm:$0xff] }
 0x373   : > { %4593 = vmatpush1.bf16.msra.mxu0 %v7196_v16  ;;  %v1135_v16 = vld [vmem:[%s8689_s2 + $0x2f0] sm:$0xff] }
 0x374   : > { %4675 = vmatpush1.bf16.msra.mxu1 %v7198_v17  ;;  %4594 = vmatprep.subr.bf16.mxu0 %v7213_v18  ;;  %v1128_v17 = vld [vmem:[%s8689_s2 + $0x2b8] sm:$0xff]  ;;  %v6817_v24 = vcombine.high %v1127_v11, %v1135_v16 }
 0x375   : > { %4676 = vmatprep.subr.bf16.mxu1 %v7215_v20  ;;  %v1136_v18 = vld [vmem:[%s8689_s2 + $0x2f8] sm:$0xff]  ;;  %v6800_v20 = vcombine.low %v1111_v3, %v1119_v4 }
 0x376   : > { %v6819_v25 = vcombine.high %v1128_v17, %v1136_v18  ;;  %v6818_v34 = vcombine.low %v1128_v17, %v1136_v18  ;;  %v1239_v18 = vld [vmem:[%s8689_s2 + $0x630] sm:$0xff] }
 0x377   : > { %4595 = vmatpush1.bf16.msra.mxu0 %v7212_v28  ;;  %v1151_v28 = vld [vmem:[%s8689_s2 + $0x370] sm:$0xff] }
 0x378   : > { %4677 = vmatpush1.bf16.msra.mxu1 %v7214_v29  ;;  %4596 = vmatprep.subr.bf16.mxu0 %v7229_v32  ;;  %v1144_v29 = vld [vmem:[%s8689_s2 + $0x338] sm:$0xff]  ;;  %v6833_v36 = vcombine.high %v1143_v27, %v1151_v28 }
 0x379   : > { %4678 = vmatprep.subr.bf16.mxu1 %v7231_v33  ;;  %v1152_v32 = vld [vmem:[%s8689_s2 + $0x378] sm:$0xff]  ;;  %v6816_v33 = vcombine.low %v1127_v11, %v1135_v16 }
 0x37a   : > { %v6835_v37 = vcombine.high %v1144_v29, %v1152_v32  ;;  %v6834_v42 = vcombine.low %v1144_v29, %v1152_v32  ;;  %v1255_v32 = vld [vmem:[%s8689_s2 + $0x6b0] sm:$0xff] }
 0x37b   : > { %4597 = vmatpush1.bf16.msra.mxu0 %v7228_v39  ;;  %v1167_v39 = vld [vmem:[%s8689_s2 + $0x3f0] sm:$0xff] }
 0x37c   : > { %4679 = vmatpush1.bf16.msra.mxu1 %v7230_v40  ;;  %4689 = vmatprep.subr.bf16.mxu0 %v6737_v14  ;;  %v1160_v40 = vld [vmem:[%s8689_s2 + $0x3b8] sm:$0xff]  ;;  %v6849_v43 = vcombine.high %v1159_v38, %v1167_v39  ;;  %v6848_v2 = vcombine.low %v1159_v38, %v1167_v39 }
 0x37d   : > { %4771 = vmatprep.subr.bf16.mxu1 %v6739_v41  ;;  %v1168_v14 = vld [vmem:[%s8689_s2 + $0x3f8] sm:$0xff]  ;;  %v6832_v41 = vcombine.low %v1143_v27, %v1151_v28 }
 0x37e   : > { %4599 = vmatmul.mubr.bf16.vlgmr.msra.gmra.mrb[12].mxu0 %v8895_v53  ;;  %v6850_v49 = vcombine.low %v1160_v40, %v1168_v14 }
 0x37f   : > { %4681 = vmatmul.mubr.bf16.vlgmr.msra.gmra.mrb[12].mxu1 %v8895_v53  ;;  %4690 = vmatpush1.bf16.msra.mxu0 %v6736_v44  ;;  %v6851_v44 = vcombine.high %v1160_v40, %v1168_v14  ;;  %v1271_v14 = vld [vmem:[%s8689_s2 + $0x730] sm:$0xff] }
 0x380   : > { %4721 = vmatprep.mubr.bf16.mxu0 %v8809_v30  ;;  %4772 = vmatpush1.bf16.msra.mxu1 %v6738_v47  ;;  %v1176_v47 = vld [vmem:[%s8689_s2 + $0x438] sm:$0xff] }
 0x381   : > { %4803 = vmatprep.mubr.bf16.mxu1 %v8809_v30  ;;  %4691 = vmatprep.subr.bf16.mxu0 %v6753_v48  ;;  %v6787_v30 = vcombine.high %v1096_v61, %v1104_v62  ;;  %v1184_v48 = vld [vmem:[%s8689_s2 + $0x478] sm:$0xff]  ;;  %v1207_v62 = vld [vmem:[%s8689_s2 + $0x530] sm:$0xff] }
 0x382   : > { %4773 = vmatprep.subr.bf16.mxu1 %v6755_v50  ;;  %v6865_v50 = vcombine.high %v1175_v45, %v1183_v46  ;;  %v6867_v51 = vcombine.high %v1176_v47, %v1184_v48  ;;  %v6866_v59 = vcombine.low %v1176_v47, %v1184_v48  ;;  %v1287_v48 = vld [vmem:[%s8689_s2 + $0x7b0] sm:$0xff] }
 0x383   : > { %4692 = vmatpush1.bf16.msra.mxu0 %v6752_v55  ;;  %v1199_v55 = vld [vmem:[%s8689_s2 + $0x4f0] sm:$0xff] }
 0x384   : > { %4774 = vmatpush1.bf16.msra.mxu1 %v6754_v56  ;;  %4693 = vmatprep.subr.bf16.mxu0 %v6769_v57  ;;  %v1192_v56 = vld [vmem:[%s8689_s2 + $0x4b8] sm:$0xff]  ;;  %v6881_v60 = vcombine.high %v1191_v52, %v1199_v55 }
 0x385   : > { %4775 = vmatprep.subr.bf16.mxu1 %v6771_v58  ;;  %v1200_v57 = vld [vmem:[%s8689_s2 + $0x4f8] sm:$0xff]  ;;  %v6864_v58 = vcombine.low %v1175_v45, %v1183_v46 }
 0x386   : > { %v6883_v61 = vcombine.high %v1192_v56, %v1200_v57  ;;  %v6882_v3 = vcombine.low %v1192_v56, %v1200_v57  ;;  %v1303_v57 = vld [vmem:[%s8689_s2 + $0x830] sm:$0xff] }
 0x387   : > { %4694 = vmatpush1.bf16.msra.mxu0 %v6768_v63  ;;  %v1215_v63 = vld [vmem:[%s8689_s2 + $0x570] sm:$0xff] }
 0x388   : > { %4776 = vmatpush1.bf16.msra.mxu1 %v6770_v0  ;;  %4695 = vmatprep.subr.bf16.mxu0 %v6785_v1  ;;  %v1208_v0 = vld [vmem:[%s8689_s2 + $0x538] sm:$0xff]  ;;  %v6897_v4 = vcombine.high %v1207_v62, %v1215_v63 }
 0x389   : > { %4777 = vmatprep.subr.bf16.mxu1 %v6787_v30  ;;  %v1216_v1 = vld [vmem:[%s8689_s2 + $0x578] sm:$0xff]  ;;  %v6880_v30 = vcombine.low %v1191_v52, %v1199_v55 }
 0x38a   : > { %v6899_v5 = vcombine.high %v1208_v0, %v1216_v1  ;;  %v6898_v11 = vcombine.low %v1208_v0, %v1216_v1  ;;  %v1319_v1 = vld [vmem:[%s8689_s2 + $0x8b0] sm:$0xff] }
 0x38b   : > { %4696 = vmatpush1.bf16.msra.mxu0 %v6784_v7  ;;  %v1231_v7 = vld [vmem:[%s8689_s2 + $0x5f0] sm:$0xff] }
 0x38c   : > { %4778 = vmatpush1.bf16.msra.mxu1 %v6786_v8  ;;  %4697 = vmatprep.subr.bf16.mxu0 %v6801_v9  ;;  %v1224_v8 = vld [vmem:[%s8689_s2 + $0x5b8] sm:$0xff]  ;;  %v6913_v16 = vcombine.high %v1223_v6, %v1231_v7 }
 0x38d   : > { %4779 = vmatprep.subr.bf16.mxu1 %v6803_v10  ;;  %v1232_v9 = vld [vmem:[%s8689_s2 + $0x5f8] sm:$0xff]  ;;  %v6896_v10 = vcombine.low %v1207_v62, %v1215_v63 }
 0x38e   : > { %v6915_v17 = vcombine.high %v1224_v8, %v1232_v9  ;;  %v6914_v27 = vcombine.low %v1224_v8, %v1232_v9  ;;  %v1335_v8 = vld [vmem:[%s8689_s2 + $0x930] sm:$0xff] }
 0x38f   : > { %4698 = vmatpush1.bf16.msra.mxu0 %v6800_v20  ;;  %v1247_v20 = vld [vmem:[%s8689_s2 + $0x670] sm:$0xff] }
 0x390   : > { %4780 = vmatpush1.bf16.msra.mxu1 %v6802_v23  ;;  %4699 = vmatprep.subr.bf16.mxu0 %v6817_v24  ;;  %v1240_v23 = vld [vmem:[%s8689_s2 + $0x638] sm:$0xff]  ;;  %v6929_v28 = vcombine.high %v1239_v18, %v1247_v20  ;;  %v1343_v9 = vld [vmem:[%s8689_s2 + $0x970] sm:$0xff] }
 0x391   : > { %4781 = vmatprep.subr.bf16.mxu1 %v6819_v25  ;;  %v1248_v24 = vld [vmem:[%s8689_s2 + $0x678] sm:$0xff]  ;;  %v6912_v25 = vcombine.low %v1223_v6, %v1231_v7 }
 0x392   : > { %v6931_v29 = vcombine.high %v1240_v23, %v1248_v24  ;;  %v6930_v38 = vcombine.low %v1240_v23, %v1248_v24  ;;  %v1351_v24 = vld [vmem:[%s8689_s2 + $0x9b0] sm:$0xff] }
 0x393   : > { %4700 = vmatpush1.bf16.msra.mxu0 %v6816_v33  ;;  %v1263_v33 = vld [vmem:[%s8689_s2 + $0x6f0] sm:$0xff] }
 0x394   : > { %4782 = vmatpush1.bf16.msra.mxu1 %v6818_v34  ;;  %4701 = vmatprep.subr.bf16.mxu0 %v6833_v36  ;;  %v1256_v34 = vld [vmem:[%s8689_s2 + $0x6b8] sm:$0xff]  ;;  %v6945_v39 = vcombine.high %v1255_v32, %v1263_v33 }
 0x395   : > { %4783 = vmatprep.subr.bf16.mxu1 %v6835_v37  ;;  %v1264_v36 = vld [vmem:[%s8689_s2 + $0x6f8] sm:$0xff]  ;;  %v6928_v37 = vcombine.low %v1239_v18, %v1247_v20  ;;  %v7025_v20 = vcombine.high %v1335_v8, %v1343_v9 }
 0x396   : > { %v6947_v40 = vcombine.high %v1256_v34, %v1264_v36  ;;  %v6946_v45 = vcombine.low %v1256_v34, %v1264_v36  ;;  %v1375_v34 = vld [vmem:[%s8689_s2 + $0xa70] sm:$0xff]  ;;  %v1368_v36 = vld [vmem:[%s8689_s2 + $0xa38] sm:$0xff] }
 0x397   : > { %4702 = vmatpush1.bf16.msra.mxu0 %v6832_v41  ;;  %v1279_v41 = vld [vmem:[%s8689_s2 + $0x770] sm:$0xff] }
 0x398   : > { %4784 = vmatpush1.bf16.msra.mxu1 %v6834_v42  ;;  %4703 = vmatprep.subr.bf16.mxu0 %v6849_v43  ;;  %v1272_v42 = vld [vmem:[%s8689_s2 + $0x738] sm:$0xff]  ;;  %v6961_v46 = vcombine.high %v1271_v14, %v1279_v41 }
 0x399   : > { %4785 = vmatprep.subr.bf16.mxu1 %v6851_v44  ;;  %v1280_v43 = vld [vmem:[%s8689_s2 + $0x778] sm:$0xff]  ;;  %v6944_v44 = vcombine.low %v1255_v32, %v1263_v33  ;;  %v1367_v33 = vld [vmem:[%s8689_s2 + $0xa30] sm:$0xff] }
 0x39a   : > { %v6963_v47 = vcombine.high %v1272_v42, %v1280_v43  ;;  %v6962_v52 = vcombine.low %v1272_v42, %v1280_v43  ;;  %v1391_v42 = vld [vmem:[%s8689_s2 + $0xaf0] sm:$0xff]  ;;  %v1575_v43 = vsub.s32 4, %v8791_v12 }
 0x39b   : > { %4704 = vmatpush1.bf16.msra.mxu0 %v6848_v2  ;;  %v1295_v2 = vld [vmem:[%s8689_s2 + $0x7f0] sm:$0xff] }
 0x39c   : > { %4786 = vmatpush1.bf16.msra.mxu1 %v6850_v49  ;;  %4705 = vmatprep.subr.bf16.mxu0 %v6865_v50  ;;  %v1288_v49 = vld [vmem:[%s8689_s2 + $0x7b8] sm:$0xff]  ;;  %v6977_v55 = vcombine.high %v1287_v48, %v1295_v2 }
 0x39d   : > { %4787 = vmatprep.subr.bf16.mxu1 %v6867_v51  ;;  %v1296_v50 = vld [vmem:[%s8689_s2 + $0x7f8] sm:$0xff]  ;;  %v6960_v51 = vcombine.low %v1271_v14, %v1279_v41  ;;  %v1383_v41 = vld [vmem:[%s8689_s2 + $0xab0] sm:$0xff] }
 0x39e   : > { %v6979_v56 = vcombine.high %v1288_v49, %v1296_v50  ;;  %v6978_v62 = vcombine.low %v1288_v49, %v1296_v50  ;;  %v1587_v49 = vsub.s32 7, %v8791_v12  ;;  %v7073_v50 = vcombine.high %v1383_v41, %v1391_v42 }
 0x39f   : > { %4706 = vmatpush1.bf16.msra.mxu0 %v6864_v58  ;;  %v1311_v58 = vld [vmem:[%s8689_s2 + $0x870] sm:$0xff] }
 0x3a0   : > { %4788 = vmatpush1.bf16.msra.mxu1 %v6866_v59  ;;  %4707 = vmatprep.subr.bf16.mxu0 %v6881_v60  ;;  %v1304_v59 = vld [vmem:[%s8689_s2 + $0x838] sm:$0xff]  ;;  %v6993_v63 = vcombine.high %v1303_v57, %v1311_v58 }
 0x3a1   : > { %4789 = vmatprep.subr.bf16.mxu1 %v6883_v61  ;;  %v1312_v60 = vld [vmem:[%s8689_s2 + $0x878] sm:$0xff]  ;;  %v6976_v61 = vcombine.low %v1287_v48, %v1295_v2  ;;  %v1579_v48 = vsub.s32 5, %v8791_v12 }
 0x3a2   : > { %v6995_v0 = vcombine.high %v1304_v59, %v1312_v60  ;;  %v6994_v6 = vcombine.low %v1304_v59, %v1312_v60 }
 0x3a3   : > { %4708 = vmatpush1.bf16.msra.mxu0 %v6880_v30  ;;  %v1327_v30 = vld [vmem:[%s8689_s2 + $0x8f0] sm:$0xff]  ;;  %v1580_v60 = vrot.slane %v9126_v35, %v1579_v48 }
 0x3a4   : > { %4790 = vmatpush1.bf16.msra.mxu1 %v6882_v3  ;;  %4709 = vmatprep.subr.bf16.mxu0 %v6897_v4  ;;  %v6992_v3 = vcombine.low %v1303_v57, %v1311_v58  ;;  %v1320_v4 = vld [vmem:[%s8689_s2 + $0x8b8] sm:$0xff]  ;;  %v7009_v7 = vcombine.high %v1319_v1, %v1327_v30 }
 0x3a5   : > { %4791 = vmatprep.subr.bf16.mxu1 %v6899_v5  ;;  %v1328_v5 = vld [vmem:[%s8689_s2 + $0x8f8] sm:$0xff] }
 0x3a6   : > { %v7010_v18 = vcombine.low %v1320_v4, %v1328_v5  ;;  %v1400_v57 = vld [vmem:[%s8689_s2 + $0xb38] sm:$0xff] }
 0x3a7   : > { %4710 = vmatpush1.bf16.msra.mxu0 %v6896_v10  ;;  %v7011_v10 = vcombine.high %v1320_v4, %v1328_v5  ;;  %v1408_v58 = vld [vmem:[%s8689_s2 + $0xb78] sm:$0xff]  ;;  %v1423_v4 = vld [vmem:[%s8689_s2 + $0xbf0] sm:$0xff] }
 0x3a8   : > { %4792 = vmatpush1.bf16.msra.mxu1 %v6898_v11  ;;  %4711 = vmatprep.subr.bf16.mxu0 %v6913_v16  ;;  %v1336_v11 = vld [vmem:[%s8689_s2 + $0x938] sm:$0xff] }
 0x3a9   : > { %4793 = vmatprep.subr.bf16.mxu1 %v6915_v17  ;;  %v1344_v16 = vld [vmem:[%s8689_s2 + $0x978] sm:$0xff]  ;;  %v7008_v17 = vcombine.low %v1319_v1, %v1327_v30  ;;  %v7091_v30 = vcombine.high %v1400_v57, %v1408_v58 }
 0x3aa   : > { %v7027_v23 = vcombine.high %v1336_v11, %v1344_v16 }
 0x3ab   : > { %4712 = vmatpush1.bf16.msra.mxu0 %v6912_v25  ;;  %v1359_v25 = vld [vmem:[%s8689_s2 + $0x9f0] sm:$0xff] }
 0x3ac   : > { %4794 = vmatpush1.bf16.msra.mxu1 %v6914_v27  ;;  %4713 = vmatprep.subr.bf16.mxu0 %v6929_v28  ;;  %v1352_v27 = vld [vmem:[%s8689_s2 + $0x9b8] sm:$0xff]  ;;  %v7024_v28 = vcombine.low %v1335_v8, %v1343_v9  ;;  %v7041_v32 = vcombine.high %v1351_v24, %v1359_v25 }
 0x3ad   : > { %4795 = vmatprep.subr.bf16.mxu1 %v6931_v29  ;;  %v7026_v29 = vcombine.low %v1336_v11, %v1344_v16  ;;  %v1416_v8 = vld [vmem:[%s8689_s2 + $0xbb8] sm:$0xff] }
 0x3ae   : > { %v1424_v9 = vld [vmem:[%s8689_s2 + $0xbf8] sm:$0xff] }
 0x3af   : > { %4714 = vmatpush1.bf16.msra.mxu0 %v6928_v37  ;;  %v1376_v37 = vld [vmem:[%s8689_s2 + $0xa78] sm:$0xff] }
 0x3b0   : > { %4796 = vmatpush1.bf16.msra.mxu1 %v6930_v38  ;;  %4715 = vmatprep.subr.bf16.mxu0 %v6945_v39  ;;  %v7040_v38 = vcombine.low %v1351_v24, %v1359_v25  ;;  %v7059_v14 = vcombine.high %v1368_v36, %v1376_v37  ;;  %v7058_v2 = vcombine.low %v1368_v36, %v1376_v37  ;;  %v1432_v36 = vld [vmem:[%s8689_s2 + $0xc38] sm:$0xff] }
 0x3b1   : > { %4797 = vmatprep.subr.bf16.mxu1 %v6947_v40  ;;  %v7057_v40 = vcombine.high %v1367_v33, %v1375_v34  ;;  %v7090_v25 = vcombine.low %v1400_v57, %v1408_v58  ;;  %v1440_v37 = vld [vmem:[%s8689_s2 + $0xc78] sm:$0xff]  ;;  %v1471_v57 = vld [vmem:[%s8689_s2 + $0xd70] sm:$0xff] }
 0x3b2   : > { %v1464_v58 = vld [vmem:[%s8689_s2 + $0xd38] sm:$0xff] }
 0x3b3   : > { %4716 = vmatpush1.bf16.msra.mxu0 %v6944_v44  ;;  %v1384_v44 = vld [vmem:[%s8689_s2 + $0xab8] sm:$0xff] }
 0x3b4   : > { %4798 = vmatpush1.bf16.msra.mxu1 %v6946_v45  ;;  %4717 = vmatprep.subr.bf16.mxu0 %v6961_v46  ;;  %v1392_v45 = vld [vmem:[%s8689_s2 + $0xaf8] sm:$0xff]  ;;  %v7056_v46 = vcombine.low %v1367_v33, %v1375_v34  ;;  %v1439_v33 = vld [vmem:[%s8689_s2 + $0xc70] sm:$0xff] }
 0x3b5   : > { %4799 = vmatprep.subr.bf16.mxu1 %v6963_v47  ;;  %v1583_v47 = vsub.s32 6, %v8791_v12 }
 0x3b7   : > { %4718 = vmatpush1.bf16.msra.mxu0 %v6960_v51  ;;  %v7075_v51 = vcombine.high %v1384_v44, %v1392_v45  ;;  %v1584_v59 = vrot.slane %v9126_v35, %v1583_v47 }
 0x3b8   : > { %4800 = vmatpush1.bf16.msra.mxu1 %v6962_v52  ;;  %4719 = vmatprep.subr.bf16.mxu0 %v6977_v55  ;;  %v1399_v52 = vld [vmem:[%s8689_s2 + $0xb30] sm:$0xff] }
 0x3b9   : > { %4801 = vmatprep.subr.bf16.mxu1 %v6979_v56  ;;  %v1407_v55 = vld [vmem:[%s8689_s2 + $0xb70] sm:$0xff]  ;;  %v1576_v56 = vrot.slane %v9126_v35, %v1575_v43 }
 0x3bb   : > { %4720 = vmatpush1.bf16.msra.mxu0 %v6976_v61  ;;  %v7072_v61 = vcombine.low %v1383_v41, %v1391_v42  ;;  %v7123_v42 = vcombine.high %v1432_v36, %v1440_v37 }
 0x3bc   : > { %4802 = vmatpush1.bf16.msra.mxu1 %v6978_v62  ;;  %4730 = vmatprep.subr.bf16.mxu0 %v6993_v63  ;;  %v1588_v62 = vrot.slane %v9126_v35, %v1587_v49  ;;  %v7074_v63 = vcombine.low %v1384_v44, %v1392_v45  ;;  %v7088_v35 = vcombine.low %v1399_v52, %v1407_v55  ;;  %v1447_v44 = vld [vmem:[%s8689_s2 + $0xcb0] sm:$0xff] }
 0x3bd   : > { %4812 = vmatprep.subr.bf16.mxu1 %v6995_v0  ;;  %v7089_v0 = vcombine.high %v1399_v52, %v1407_v55  ;;  %v1455_v45 = vld [vmem:[%s8689_s2 + $0xcf0] sm:$0xff] }
 0x3be   : > { %4722 = vmatmul.mubr.bf16.vlgmr.msra.gmra.mrb[16].mxu0 %v8811_v31  ;;  %v7137_v52 = vcombine.high %v1447_v44, %v1455_v45 }
 0x3bf   : > { %4804 = vmatmul.mubr.bf16.vlgmr.msra.gmra.mrb[16].mxu1 %v8811_v31  ;;  %4731 = vmatpush1.bf16.msra.mxu0 %v6992_v3  ;;  %v1360_v31 = vld [vmem:[%s8689_s2 + $0x9f8] sm:$0xff]  ;;  %v1415_v3 = vld [vmem:[%s8689_s2 + $0xbb0] sm:$0xff] }
 0x3c0   : > { %4762 = vmatprep.mubr.bf16.mxu0 %v8848_v26  ;;  %4813 = vmatpush1.bf16.msra.mxu1 %v6994_v6  ;;  %v7042_v39 = vcombine.low %v1352_v27, %v1360_v31 }
 0x3c1   : > { %4844 = vmatprep.mubr.bf16.mxu1 %v8848_v26  ;;  %4732 = vmatprep.subr.bf16.mxu0 %v7009_v7  ;;  %v7043_v26 = vcombine.high %v1352_v27, %v1360_v31  ;;  %v7105_v27 = vcombine.high %v1415_v3, %v1423_v4 }
 0x3c2   : > { %4814 = vmatprep.subr.bf16.mxu1 %v7011_v10 }
 0x3c3   : > { %4733 = vmatpush1.bf16.msra.mxu0 %v7008_v17 }
 0x3c4   : > { %4815 = vmatpush1.bf16.msra.mxu1 %v7010_v18  ;;  %4734 = vmatprep.subr.bf16.mxu0 %v7025_v20 }
 0x3c5   : > { %4816 = vmatprep.subr.bf16.mxu1 %v7027_v23 }
 0x3c7   : > { %4735 = vmatpush1.bf16.msra.mxu0 %v7024_v28 }
 0x3c8   : > { %4817 = vmatpush1.bf16.msra.mxu1 %v7026_v29  ;;  %4736 = vmatprep.subr.bf16.mxu0 %v7041_v32  ;;  %v7107_v32 = vcombine.high %v1416_v8, %v1424_v9 }
 0x3c9   : > { %4818 = vmatprep.subr.bf16.mxu1 %v7043_v26  ;;  %v1431_v26 = vld [vmem:[%s8689_s2 + $0xc30] sm:$0xff] }
 0x3ca   : > { %v7121_v41 = vcombine.high %v1431_v26, %v1439_v33 }
 0x3cb   : > { %4737 = vmatpush1.bf16.msra.mxu0 %v7040_v38 }
 0x3cc   : > { %4819 = vmatpush1.bf16.msra.mxu1 %v7042_v39  ;;  %4738 = vmatprep.subr.bf16.mxu0 %v7057_v40  ;;  %v7104_v39 = vcombine.low %v1415_v3, %v1423_v4  ;;  %v1488_v3 = vld [vmem:[%s8689_s2 + $0xdf8] sm:$0xff] }
 0x3cd   : > { %4820 = vmatprep.subr.bf16.mxu1 %v7059_v14  ;;  %v7106_v14 = vcombine.low %v1416_v8, %v1424_v9  ;;  %v1495_v8 = vld [vmem:[%s8689_s2 + $0xe30] sm:$0xff] }
 0x3ce   : > { %v1503_v9 = vld [vmem:[%s8689_s2 + $0xe70] sm:$0xff] }
 0x3cf   : > { %4739 = vmatpush1.bf16.msra.mxu0 %v7056_v46  ;;  %v1448_v46 = vld [vmem:[%s8689_s2 + $0xcb8] sm:$0xff] }
 0x3d0   : > { %4821 = vmatpush1.bf16.msra.mxu1 %v7058_v2  ;;  %4740 = vmatprep.subr.bf16.mxu0 %v7073_v50  ;;  %v1456_v2 = vld [vmem:[%s8689_s2 + $0xcf8] sm:$0xff]  ;;  %v7120_v50 = vcombine.low %v1431_v26, %v1439_v33  ;;  %v1535_v26 = vld [vmem:[%s8689_s2 + $0xf70] sm:$0xff] }
 0x3d1   : > { %v4436_v1 = vpop.f32.mrb[8].mxu0  ;;  %4822 = vmatprep.subr.bf16.mxu1 %v7075_v51  ;;  %v7122_v51 = vcombine.low %v1432_v36, %v1440_v37  ;;  %v7139_v55 = vcombine.high %v1448_v46, %v1456_v2  ;;  %v1528_v33 = vld [vmem:[%s8689_s2 + $0xf38] sm:$0xff] }
 0x3d2   : > { %v7517_v5 = vadd.f32 %v4436_v1, %v1576_v56  ;;  %v4518_v6 = vpop.f32.mrb[8].mxu1  ;;  %v4438_v7 = vpop.f32.mrb[9].mxu0  ;;  %v1463_v56 = vld [vmem:[%s8689_s2 + $0xd30] sm:$0xff] }
 0x3d3   : > { %v7519_v10 = vadd.f32 %v4518_v6, %v1584_v59  ;;  %v7518_v11 = vadd.f32 %v4438_v7, %v1580_v60  ;;  %v4520_v16 = vpop.f32.mrb[9].mxu1  ;;  %v4440_v17 = vpop.f32.mrb[10].mxu0  ;;  %4741 = vmatpush1.bf16.msra.mxu0 %v7072_v61  ;;  %v1472_v59 = vld [vmem:[%s8689_s2 + $0xd78] sm:$0xff]  ;;  %v7136_v60 = vcombine.low %v1447_v44, %v1455_v45  ;;  %v7138_v61 = vcombine.low %v1448_v46, %v1456_v2  ;;  %v1487_v1 = vld [vmem:[%s8689_s2 + $0xdf0] sm:$0xff] }
 0x3d4   : > { %v4857_v18 = vmax.f32 %v7517_v5, 0.0  ;;  %v7520_v20 = vadd.f32 %v4520_v16, %v1588_v62  ;;  %v4522_v23 = vpop.f32.mrb[10].mxu1  ;;  %4823 = vmatpush1.bf16.msra.mxu1 %v7074_v63  ;;  %v4441_v24 = vpop.f32.mrb[11].mxu0  ;;  %4742 = vmatprep.subr.bf16.mxu0 %v7089_v0  ;;  %v7153_v62 = vcombine.high %v1463_v56, %v1471_v57  ;;  %v7155_v63 = vcombine.high %v1464_v58, %v1472_v59  ;;  %v1479_v0 = vld [vmem:[%s8689_s2 + $0xdb0] sm:$0xff]  ;;  %v1544_v44 = vld [vmem:[%s8689_s2 + $0xfb8] sm:$0xff] }
 0x3d5   : > { %v4859_v31 = vmax.f32 %v7519_v10, 0.0  ;;  %v4858_v28 = vmax.f32 %v7518_v11, 0.0  ;;  %v4523_v29 = vpop.f32.mrb[11].mxu1  ;;  %4824 = vmatprep.subr.bf16.mxu1 %v7091_v30  ;;  %v1480_v30 = vld [vmem:[%s8689_s2 + $0xdb8] sm:$0xff]  ;;  %v7152_v4 = vcombine.low %v1463_v56, %v1471_v57  ;;  %v7154_v5 = vcombine.low %v1464_v58, %v1472_v59  ;;  %v1519_v23 = vld [vmem:[%s8689_s2 + $0xef0] sm:$0xff] }
 0x3d6   : > { %v4860_v34 = vmax.f32 %v7520_v20, 0.0  ;;  %v7169_v6 = vcombine.high %v1479_v0, %v1487_v1  ;;  %v7171_v7 = vcombine.high %v1480_v30, %v1488_v3  ;;  %v1496_v10 = vld [vmem:[%s8689_s2 + $0xe38] sm:$0xff]  ;;  %v7168_v16 = vcombine.low %v1479_v0, %v1487_v1  ;;  %v1511_v20 = vld [vmem:[%s8689_s2 + $0xeb0] sm:$0xff]  ;;  %v7784_v56 = vld [vmem:[#allocation9 + $0x4] ss:$8 sps:$4 sm:$0xff]  }
 0x3d7   : > { %v9304_v38 = vpack.c.bf16 %v4858_v28, %v4857_v18  ;;  %4743 = vmatpush1.bf16.msra.mxu0 %v7088_v35  ;;  %v1504_v11 = vld [vmem:[%s8689_s2 + $0xe78] sm:$0xff]  ;;  %v7170_v17 = vcombine.low %v1480_v30, %v1488_v3  ;;  %v7185_v35 = vcombine.high %v1495_v8, %v1503_v9  ;;  %v7201_v28 = vcombine.high %v1511_v20, %v1519_v23  ;;  %v7782_v58 = vld [vmem:[#allocation9] ss:$8 sps:$4 sm:$0xff]  }
 0x3d8   : > { %v9306_v40 = vpack.c.bf16 %v4860_v34, %v4859_v31  ;;  %4825 = vmatpush1.bf16.msra.mxu1 %v7090_v25  ;;  %4744 = vmatprep.subr.bf16.mxu0 %v7105_v27  ;;  %v7187_v18 = vcombine.high %v1496_v10, %v1504_v11  ;;  %v1512_v24 = vld [vmem:[%s8689_s2 + $0xeb8] sm:$0xff]  ;;  %v7184_v27 = vcombine.low %v1495_v8, %v1503_v9  ;;  %v8326_v0 = vmov 0   ;;  %v7812_v1 = vld [vmem:[#allocation12 + $0x20] ss:$16 sps:$4 sm:$0xff]  }
 0x3d9   : > { %4826 = vmatprep.subr.bf16.mxu1 %v7107_v32  ;;  %v1520_v25 = vld [vmem:[%s8689_s2 + $0xef8] sm:$0xff]  ;;  %v7186_v31 = vcombine.low %v1496_v10, %v1504_v11  ;;  %v1527_v32 = vld [vmem:[%s8689_s2 + $0xf30] sm:$0xff]  ;;  %v7200_v36 = vcombine.low %v1511_v20, %v1519_v23  ;;  %v7788_v3 = vld [vmem:[#allocation9 + $0x20] ss:$8 sps:$4 sm:$0xff]  }
 0x3da   : > { %v7203_v29 = vcombine.high %v1512_v24, %v1520_v25  ;;  %v1536_v34 = vld [vmem:[%s8689_s2 + $0xf78] sm:$0xff]  ;;  %v7202_v37 = vcombine.low %v1512_v24, %v1520_v25  ;;  %v7216_v46 = vcombine.low %v1527_v32, %v1535_v26  ;;  %v7824_v8 = vld [vmem:[#allocation12 + $0x60] ss:$16 sps:$4 sm:$0xff]  }
 0x3db   : > { %4745 = vmatpush1.bf16.msra.mxu0 %v7104_v39  ;;  %v7217_v39 = vcombine.high %v1527_v32, %v1535_v26  ;;  %v1552_v45 = vld [vmem:[%s8689_s2 + $0xff8] sm:$0xff]  ;;  %v7218_v2 = vcombine.low %v1528_v33, %v1536_v34  ;;  %v7794_v10 = vld [vmem:[#allocation9 + $0x40] ss:$8 sps:$4 sm:$0xff]  }
 0x3dc   : > { %4827 = vmatpush1.bf16.msra.mxu1 %v7106_v14  ;;  %4746 = vmatprep.subr.bf16.mxu0 %v7121_v41  ;;  %v7219_v14 = vcombine.high %v1528_v33, %v1536_v34  ;;  %v1543_v41 = vld [vmem:[%s8689_s2 + $0xfb0] sm:$0xff]  ;;  %v7800_v23 = vld [vmem:[#allocation9 + $0x60] ss:$8 sps:$4 sm:$0xff]  }
 0x3dd   : > { %4828 = vmatprep.subr.bf16.mxu1 %v7123_v42  ;;  %v1551_v42 = vld [vmem:[%s8689_s2 + $0xff0] sm:$0xff]  ;;  %v7821_v26 = vld [vmem:[#allocation12 + $0x48] ss:$16 sps:$4 sm:$0xff]  }
 0x3de   : > { %v7808_v57 = vld [vmem:[#allocation12 + $0x4] ss:$16 sps:$4 sm:$0xff]   ;;  %v7836_v20 = vld [vmem:[#allocation12 + $0xa0] ss:$16 sps:$4 sm:$0xff]   ;;  %v7823_v32 = vld [vmem:[#allocation12 + $0x4c] ss:$16 sps:$4 sm:$0xff]  }
 0x3df   : > { %4747 = vmatpush1.bf16.msra.mxu0 %v7120_v50  ;;  %v7233_v50 = vcombine.high %v1543_v41, %v1551_v42  ;;  %v7787_v59 = vld [vmem:[#allocation9 + $0x14] ss:$8 sps:$4 sm:$0xff]   ;;  %v7803_v25 = vld [vmem:[#allocation9 + $0x70] ss:$8 sps:$4 sm:$0xff]  }
 0x3e0   : > { %4829 = vmatpush1.bf16.msra.mxu1 %v7122_v51  ;;  %4748 = vmatprep.subr.bf16.mxu0 %v7137_v52  ;;  %v7235_v51 = vcombine.high %v1544_v44, %v1552_v45  ;;  %v7232_v52 = vcombine.low %v1543_v41, %v1551_v42  ;;  %v7820_v30 = vld [vmem:[#allocation12 + $0x44] ss:$16 sps:$4 sm:$0xff]   ;;  %v7829_v33 = vld [vmem:[#allocation12 + $0x6c] ss:$16 sps:$4 sm:$0xff]   ;;  %v7827_v34 = vld [vmem:[#allocation12 + $0x68] ss:$16 sps:$4 sm:$0xff]  }
 0x3e1   : > { %4830 = vmatprep.subr.bf16.mxu1 %v7139_v55  ;;  %v7234_v55 = vcombine.low %v1544_v44, %v1552_v45  ;;  %v7832_v9 = vld [vmem:[#allocation12 + $0x84] ss:$16 sps:$4 sm:$0xff]  }
 0x3e2   : > { %v7799_v11 = vld [vmem:[#allocation9 + $0x54] ss:$8 sps:$4 sm:$0xff]  }
 0x3e3   : > { %4749 = vmatpush1.bf16.msra.mxu0 %v7136_v60  ;;  %v7806_v60 = vld [vmem:[#allocation12] ss:$16 sps:$4 sm:$0xff]  }
 0x3e4   : > { %4831 = vmatpush1.bf16.msra.mxu1 %v7138_v61  ;;  %4750 = vmatprep.subr.bf16.mxu0 %v7153_v62  ;;  %v7814_v61 = vld [vmem:[#allocation12 + $0x24] ss:$16 sps:$4 sm:$0xff]  }
 0x3e5   : > { %4832 = vmatprep.subr.bf16.mxu1 %v7155_v63  ;;  %v7785_v62 = vld [vmem:[#allocation9 + $0x10] ss:$8 sps:$4 sm:$0xff]   ;;  %v7790_v63 = vld [vmem:[#allocation9 + $0x24] ss:$8 sps:$4 sm:$0xff]   ;;  %v7805_v24 = vld [vmem:[#allocation9 + $0x74] ss:$8 sps:$4 sm:$0xff]  }
 0x3e7   : > { %4751 = vmatpush1.bf16.msra.mxu0 %v7152_v4  ;;  %v7793_v4 = vld [vmem:[#allocation9 + $0x34] ss:$8 sps:$4 sm:$0xff]  }
 0x3e8   : > { %4833 = vmatpush1.bf16.msra.mxu1 %v7154_v5  ;;  %4752 = vmatprep.subr.bf16.mxu0 %v7169_v6  ;;  %v7818_v5 = vld [vmem:[#allocation12 + $0x40] ss:$16 sps:$4 sm:$0xff]   ;;  %v7826_v6 = vld [vmem:[#allocation12 + $0x64] ss:$16 sps:$4 sm:$0xff]  }
 0x3e9   : > { %4834 = vmatprep.subr.bf16.mxu1 %v7171_v7  ;;  %v7796_v7 = vld [vmem:[#allocation9 + $0x44] ss:$8 sps:$4 sm:$0xff]  }
 0x3eb   : > { %4753 = vmatpush1.bf16.msra.mxu0 %v7168_v16  ;;  %v7830_v16 = vld [vmem:[#allocation12 + $0x80] ss:$16 sps:$4 sm:$0xff]  }
 0x3ec   : > { %4835 = vmatpush1.bf16.msra.mxu1 %v7170_v17  ;;  %4754 = vmatprep.subr.bf16.mxu0 %v7185_v35  ;;  %v7838_v17 = vld [vmem:[#allocation12 + $0xa4] ss:$16 sps:$4 sm:$0xff]  }
 0x3ed   : > { %4836 = vmatprep.subr.bf16.mxu1 %v7187_v18  ;;  %v7797_v35 = vld [vmem:[#allocation9 + $0x50] ss:$8 sps:$4 sm:$0xff]   ;;  %v7802_v18 = vld [vmem:[#allocation9 + $0x64] ss:$8 sps:$4 sm:$0xff]  }
 0x3ef   : > { %4755 = vmatpush1.bf16.msra.mxu0 %v7184_v27  ;;  %v7811_v27 = vld [vmem:[#allocation12 + $0xc] ss:$16 sps:$4 sm:$0xff]  }
 0x3f0   : > { %4837 = vmatpush1.bf16.msra.mxu1 %v7186_v31  ;;  %4756 = vmatprep.subr.bf16.mxu0 %v7201_v28  ;;  %v7809_v31 = vld [vmem:[#allocation12 + $0x8] ss:$16 sps:$4 sm:$0xff]   ;;  %v7817_v28 = vld [vmem:[#allocation12 + $0x2c] ss:$16 sps:$4 sm:$0xff]  }
 0x3f1   : > { %4838 = vmatprep.subr.bf16.mxu1 %v7203_v29  ;;  %v7815_v29 = vld [vmem:[#allocation12 + $0x28] ss:$16 sps:$4 sm:$0xff]  }
 0x3f3   : > { %4757 = vmatpush1.bf16.msra.mxu0 %v7200_v36  ;;  %v7835_v36 = vld [vmem:[#allocation12 + $0x8c] ss:$16 sps:$4 sm:$0xff]  }
 0x3f4   : > { %4839 = vmatpush1.bf16.msra.mxu1 %v7202_v37  ;;  %4758 = vmatprep.subr.bf16.mxu0 %v7217_v39  ;;  %v7841_v37 = vld [vmem:[#allocation12 + $0xac] ss:$16 sps:$4 sm:$0xff]   ;;  %v7839_v39 = vld [vmem:[#allocation12 + $0xa8] ss:$16 sps:$4 sm:$0xff]  }
 0x3f5   : > { %4840 = vmatprep.subr.bf16.mxu1 %v7219_v14 }
 0x3f7   : > { %4759 = vmatpush1.bf16.msra.mxu0 %v7216_v46 }
 0x3f8   : > { %4841 = vmatpush1.bf16.msra.mxu1 %v7218_v2  ;;  %4760 = vmatprep.subr.bf16.mxu0 %v7233_v50 }
 0x3f9   : > { %4842 = vmatprep.subr.bf16.mxu1 %v7235_v51 }
 0x3fb   : > { %4761 = vmatpush1.bf16.msra.mxu0 %v7232_v52 }
 0x3fc   : > { %4843 = vmatpush1.bf16.msra.mxu1 %v7234_v55  ;;  %5017 = vmatprep.subr.bf16.mxu0 %v7784_v56 }
 0x3fd   : > { %5584 = vmatprep.subr.bf16.mxu1 %v7808_v57 }
 0x3fe   : > { %4763 = vmatmul.mubr.bf16.vlgmr.msra.gmra.mrb[16].mxu0 %v8895_v53 }
 0x3ff   : > { %4845 = vmatmul.mubr.bf16.vlgmr.msra.gmra.mrb[16].mxu1 %v8895_v53  ;;  %5018 = vmatpush1.bf16.msra.mxu0 %v7782_v58  ;;  %v7791_v53 = vld [vmem:[#allocation9 + $0x30] ss:$8 sps:$4 sm:$0xff]  }
 0x400   : > { %5019 = vmatprep.subr.bf16.mxu0 %v7787_v59  ;;  %5049 = vmatprep.mubr.bf16.mxu0 %v8326_v0  ;;  %v7844_v59 = vld [vmem:[#allocation12 + $0xc4] ss:$16 sps:$4 sm:$0xff]  }
 0x401   : > { %5585 = vmatpush1.bf16.msra.mxu1 %v7806_v60 }
 0x402   : > { %5586 = vmatprep.subr.bf16.mxu1 %v7814_v61 }
 0x403   : > { %5020 = vmatpush1.bf16.msra.mxu0 %v7785_v62 }
 0x404   : > { %5021 = vmatprep.subr.bf16.mxu0 %v7790_v63  ;;  %v7842_v63 = vld [vmem:[#allocation12 + $0xc0] ss:$16 sps:$4 sm:$0xff]  }
 0x405   : > { %5587 = vmatpush1.bf16.msra.mxu1 %v7812_v1 }
 0x406   : > { %5588 = vmatprep.subr.bf16.mxu1 %v7820_v30  ;;  %v7845_v30 = vld [vmem:[#allocation12 + $0xc8] ss:$16 sps:$4 sm:$0xff]  }
 0x407   : > { %5022 = vmatpush1.bf16.msra.mxu0 %v7788_v3  ;;  %v7847_v3 = vld [vmem:[#allocation12 + $0xcc] ss:$16 sps:$4 sm:$0xff]  }
 0x408   : > { %5023 = vmatprep.subr.bf16.mxu0 %v7793_v4 }
 0x409   : > { %5589 = vmatpush1.bf16.msra.mxu1 %v7818_v5 }
 0x40a   : > { %5590 = vmatprep.subr.bf16.mxu1 %v7826_v6  ;;  %v7848_v6 = vld [vmem:[#allocation12 + $0xe0] ss:$16 sps:$4 sm:$0xff]  }
 0x40b   : > { %5024 = vmatpush1.bf16.msra.mxu0 %v7791_v53  ;;  %v7850_v53 = vld [vmem:[#allocation12 + $0xe4] ss:$16 sps:$4 sm:$0xff]  }
 0x40c   : > { %5025 = vmatprep.subr.bf16.mxu0 %v7796_v7  ;;  %v7853_v7 = vld [vmem:[#allocation12 + $0xec] ss:$16 sps:$4 sm:$0xff]  }
 0x40d   : > { %5591 = vmatpush1.bf16.msra.mxu1 %v7824_v8  ;;  %v7856_v8 = vld [vmem:[#allocation12 + $0x104] ss:$16 sps:$4 sm:$0xff]  }
 0x40e   : > { %5592 = vmatprep.subr.bf16.mxu1 %v7832_v9  ;;  %v7851_v9 = vld [vmem:[#allocation12 + $0xe8] ss:$16 sps:$4 sm:$0xff]  }
 0x40f   : > { %5026 = vmatpush1.bf16.msra.mxu0 %v7794_v10  ;;  %v7859_v10 = vld [vmem:[#allocation12 + $0x10c] ss:$16 sps:$4 sm:$0xff]  }
 0x410   : > { %5027 = vmatprep.subr.bf16.mxu0 %v7799_v11  ;;  %v7854_v11 = vld [vmem:[#allocation12 + $0x100] ss:$16 sps:$4 sm:$0xff]  }
 0x411   : > { %5593 = vmatpush1.bf16.msra.mxu1 %v7830_v16  ;;  %v7862_v16 = vld [vmem:[#allocation12 + $0x124] ss:$16 sps:$4 sm:$0xff]  }
 0x412   : > { %5594 = vmatprep.subr.bf16.mxu1 %v7838_v17  ;;  %v7857_v17 = vld [vmem:[#allocation12 + $0x108] ss:$16 sps:$4 sm:$0xff]  }
 0x413   : > { %5028 = vmatpush1.bf16.msra.mxu0 %v7797_v35  ;;  %v7865_v35 = vld [vmem:[#allocation12 + $0x12c] ss:$16 sps:$4 sm:$0xff]  }
 0x414   : > { %5029 = vmatprep.subr.bf16.mxu0 %v7802_v18  ;;  %v7860_v18 = vld [vmem:[#allocation12 + $0x120] ss:$16 sps:$4 sm:$0xff]  }
 0x415   : > { %5595 = vmatpush1.bf16.msra.mxu1 %v7836_v20  ;;  %v7868_v20 = vld [vmem:[#allocation12 + $0x144] ss:$16 sps:$4 sm:$0xff]  }
 0x416   : > { %5596 = vmatprep.subr.bf16.mxu1 %v7844_v59 }
 0x417   : > { %5030 = vmatpush1.bf16.msra.mxu0 %v7800_v23  ;;  %v7863_v23 = vld [vmem:[#allocation12 + $0x128] ss:$16 sps:$4 sm:$0xff]  }
 0x418   : > { %5031 = vmatprep.subr.bf16.mxu0 %v7805_v24  ;;  %v7871_v24 = vld [vmem:[#allocation12 + $0x14c] ss:$16 sps:$4 sm:$0xff]  }
 0x419   : > { %5597 = vmatpush1.bf16.msra.mxu1 %v7842_v63 }
 0x41a   : > { %5598 = vmatprep.subr.bf16.mxu1 %v7850_v53 }
 0x41b   : > { %5032 = vmatpush1.bf16.msra.mxu0 %v7803_v25  ;;  %v7866_v25 = vld [vmem:[#allocation12 + $0x140] ss:$16 sps:$4 sm:$0xff]  }
 0x41c   : > { %5697 = vmatprep.subr.bf16.mxu0 %v7811_v27  ;;  %v7874_v27 = vld [vmem:[#allocation12 + $0x164] ss:$16 sps:$4 sm:$0xff]  }
 0x41d   : > { %5599 = vmatpush1.bf16.msra.mxu1 %v7848_v6 }
 0x41e   : > { %5050 = vmatmul.mubr.bf16.vlgmr.msra.gmra.mrb[20].mxu0 %v9148_v21  ;;  %v7833_v21 = vld [vmem:[#allocation12 + $0x88] ss:$16 sps:$4 sm:$0xff]   ;;  %5600 = vmatprep.subr.bf16.mxu1 %v7856_v8 }
 0x41f   : > { %5059 = vmatprep.mubr.bf16.mxu0 %v8326_v0  ;;  %5698 = vmatpush1.bf16.msra.mxu0 %v7809_v31  ;;  %v7869_v31 = vld [vmem:[#allocation12 + $0x148] ss:$16 sps:$4 sm:$0xff]  }
 0x420   : > { %5699 = vmatprep.subr.bf16.mxu0 %v7817_v28  ;;  %v7877_v28 = vld [vmem:[#allocation12 + $0x16c] ss:$16 sps:$4 sm:$0xff]  }
 0x421   : > { %5601 = vmatpush1.bf16.msra.mxu1 %v7854_v11 }
 0x422   : > { %5602 = vmatprep.subr.bf16.mxu1 %v7862_v16 }
 0x423   : > { %5700 = vmatpush1.bf16.msra.mxu0 %v7815_v29  ;;  %v7872_v29 = vld [vmem:[#allocation12 + $0x160] ss:$16 sps:$4 sm:$0xff]  }
 0x424   : > { %5701 = vmatprep.subr.bf16.mxu0 %v7823_v32  ;;  %v7880_v32 = vld [vmem:[#allocation12 + $0x184] ss:$16 sps:$4 sm:$0xff]  }
 0x425   : > { %5603 = vmatpush1.bf16.msra.mxu1 %v7860_v18 }
 0x426   : > { %5060 = vmatmul.mubr.bf16.gmra.mrb[24].mxu0 %v9150_v22  ;;  %v9349_v22 = vld [vmem:[%s464_s8 + $0x8] sm:$0xff]  ;;  %5604 = vmatprep.subr.bf16.mxu1 %v7868_v20 }
 0x427   : > { %5069 = vmatprep.mubr.bf16.mxu0 %v8326_v0  ;;  %5702 = vmatpush1.bf16.msra.mxu0 %v7821_v26  ;;  %v1592_v14 = vrot.slane %v9349_v22, %v8794_v13  ;;  %v1600_v41 = vrot.slane %v9349_v22, %v8877_v19  ;;  %v1604_v42 = vrot.slane %v9349_v22, %v8830_v54  ;;  %v7875_v26 = vld [vmem:[#allocation12 + $0x168] ss:$16 sps:$4 sm:$0xff]  }
 0x428   : > { %5703 = vmatprep.subr.bf16.mxu0 %v7829_v33  ;;  %v7883_v33 = vld [vmem:[#allocation12 + $0x18c] ss:$16 sps:$4 sm:$0xff]  }
 0x429   : > { %5605 = vmatpush1.bf16.msra.mxu1 %v7866_v25 }
 0x42a   : > { %5606 = vmatprep.subr.bf16.mxu1 %v7874_v27 }
 0x42b   : > { %5704 = vmatpush1.bf16.msra.mxu0 %v7827_v34  ;;  %v7878_v34 = vld [vmem:[#allocation12 + $0x180] ss:$16 sps:$4 sm:$0xff]  }
 0x42c   : > { %5705 = vmatprep.subr.bf16.mxu0 %v7835_v36  ;;  %v7886_v36 = vld [vmem:[#allocation12 + $0x1a4] ss:$16 sps:$4 sm:$0xff]  }
 0x42d   : > { %5607 = vmatpush1.bf16.msra.mxu1 %v7872_v29 }
 0x42e   : > { %5070 = vmatmul.mubr.bf16.gmra.mrb[28].mxu0 %v9304_v38  ;;  %v1596_v38 = vrot.slane %v9349_v22, %v8799_v15  ;;  %5608 = vmatprep.subr.bf16.mxu1 %v7880_v32 }
 0x42f   : > { %5079 = vmatprep.mubr.bf16.mxu0 %v8326_v0  ;;  %5706 = vmatpush1.bf16.msra.mxu0 %v7833_v21  ;;  %v7881_v21 = vld [vmem:[#allocation12 + $0x188] ss:$16 sps:$4 sm:$0xff]  }
 0x430   : > { %5707 = vmatprep.subr.bf16.mxu0 %v7841_v37  ;;  %v7889_v37 = vld [vmem:[#allocation12 + $0x1ac] ss:$16 sps:$4 sm:$0xff]  }
 0x431   : > { %5609 = vmatpush1.bf16.msra.mxu1 %v7878_v34 }
 0x432   : > { %5610 = vmatprep.subr.bf16.mxu1 %v7886_v36 }
 0x433   : > { %5708 = vmatpush1.bf16.msra.mxu0 %v7839_v39  ;;  %v7884_v39 = vld [vmem:[#allocation12 + $0x1a0] ss:$16 sps:$4 sm:$0xff]  }
 0x434   : > { %5709 = vmatprep.subr.bf16.mxu0 %v7847_v3 }
 0x435   : > { %5611 = vmatpush1.bf16.msra.mxu1 %v7884_v39 }
 0x436   : > { %5080 = vmatmul.mubr.bf16.gmra.mrb[32].mxu0 %v9306_v40 }
 0x437   : > { %5089 = vmatprep.mubr.bf16.mxu0 %v8326_v0  ;;  %5710 = vmatpush1.bf16.msra.mxu0 %v7845_v30 }
 0x438   : > { %5711 = vmatprep.subr.bf16.mxu0 %v7853_v7 }
 0x43b   : > { %5712 = vmatpush1.bf16.msra.mxu0 %v7851_v9 }
 0x43c   : > { %5713 = vmatprep.subr.bf16.mxu0 %v7859_v10 }
 0x43f   : > { %5714 = vmatpush1.bf16.msra.mxu0 %v7857_v17 }
 0x440   : > { %5715 = vmatprep.subr.bf16.mxu0 %v7865_v35 }
 0x443   : > { %5716 = vmatpush1.bf16.msra.mxu0 %v7863_v23 }
 0x444   : > { %5717 = vmatprep.subr.bf16.mxu0 %v7871_v24 }
 0x447   : > { %5718 = vmatpush1.bf16.msra.mxu0 %v7869_v31 }
 0x448   : > { %5719 = vmatprep.subr.bf16.mxu0 %v7877_v28 }
 0x44b   : > { %5720 = vmatpush1.bf16.msra.mxu0 %v7875_v26 }
 0x44c   : > { %5721 = vmatprep.subr.bf16.mxu0 %v7883_v33 }
 0x44f   : > { %5722 = vmatpush1.bf16.msra.mxu0 %v7881_v21 }
 0x450   : > { %5723 = vmatprep.subr.bf16.mxu0 %v7889_v37 }
 0x451   : > { %v4600_v44 = vpop.f32.mrb[12].mxu0 }
 0x452   : > { %v7521_v45 = vadd.f32 %v4600_v44, %v1592_v14  ;;  %v4682_v40 = vpop.f32.mrb[12].mxu1  ;;  %v4602_v46 = vpop.f32.mrb[13].mxu0  ;;  %v7887_v14 = vld [vmem:[#allocation12 + $0x1a8] ss:$16 sps:$4 sm:$0xff]  }
 0x453   : > { %v7523_v2 = vadd.f32 %v4682_v40, %v1600_v41  ;;  %v7522_v50 = vadd.f32 %v4602_v46, %v1596_v38  ;;  %v4684_v51 = vpop.f32.mrb[13].mxu1  ;;  %v4604_v52 = vpop.f32.mrb[14].mxu0  ;;  %v7892_v41 = vld [vmem:[#allocation12 + $0x1c4] ss:$16 sps:$4 sm:$0xff]   ;;  %v7895_v38 = vld [vmem:[#allocation12 + $0x1cc] ss:$16 sps:$4 sm:$0xff]   ;;  %5724 = vmatpush1.bf16.msra.mxu0 %v7887_v14 }
 0x454   : > { %v4861_v55 = vmax.f32 %v7521_v45, 0.0  ;;  %v7524_v56 = vadd.f32 %v4684_v51, %v1604_v42  ;;  %v4686_v57 = vpop.f32.mrb[14].mxu1  ;;  %v4605_v58 = vpop.f32.mrb[15].mxu0  ;;  %v7890_v42 = vld [vmem:[#allocation12 + $0x1c0] ss:$16 sps:$4 sm:$0xff]   ;;  %5612 = vmatprep.subr.bf16.mxu1 %v7892_v41  ;;  %5725 = vmatprep.subr.bf16.mxu0 %v7895_v38  ;;  %v1616_v51 = vrot.slane %v9349_v22, %v1583_v47  ;;  %v1612_v52 = vrot.slane %v9349_v22, %v1579_v48 }
 0x455   : > { %v4863_v60 = vmax.f32 %v7523_v2, 0.0  ;;  %v4862_v61 = vmax.f32 %v7522_v50, 0.0  ;;  %v4687_v62 = vpop.f32.mrb[15].mxu1  ;;  %v7893_v44 = vld [vmem:[#allocation12 + $0x1c8] ss:$16 sps:$4 sm:$0xff]   ;;  %5613 = vmatpush1.bf16.msra.mxu1 %v7890_v42  ;;  %v1608_v50 = vrot.slane %v9349_v22, %v1575_v43 }
 0x456   : > { %v4864_v1 = vmax.f32 %v7524_v56, 0.0  ;;  %v7898_v45 = vld [vmem:[#allocation12 + $0x1e4] ss:$16 sps:$4 sm:$0xff]   ;;  %v7901_v40 = vld [vmem:[#allocation12 + $0x1ec] ss:$16 sps:$4 sm:$0xff]  }
 0x457   : > { %v4905_v4 = vpack.c.bf16 %v4862_v61, %v4861_v55  ;;  %v7896_v46 = vld [vmem:[#allocation12 + $0x1e0] ss:$16 sps:$4 sm:$0xff]   ;;  %5726 = vmatpush1.bf16.msra.mxu0 %v7893_v44  ;;  %5614 = vmatprep.subr.bf16.mxu1 %v7898_v45  ;;  %v7899_v2 = vld [vmem:[#allocation12 + $0x1e8] ss:$16 sps:$4 sm:$0xff]   ;;  %v1620_v55 = vrot.slane %v9349_v22, %v1587_v49  ;;  %v4925_v49 = vld [vmem:[#allocation10] sm:$0x3] }
 0x458   : > { %v4906_v5 = vpack.c.bf16 %v4864_v1, %v4863_v60  ;;  %5727 = vmatprep.subr.bf16.mxu0 %v7901_v40  ;;  %v9375_v22 = vrot.slane %v4925_v49, %v8794_v13  ;;  %v9378_v53 = vrot.slane %v4925_v49, %v8799_v15 }
 0x459   : > { %5090 = vmatmul.mubr.bf16.gmra.mrb[36].mxu0 %v4905_v4  ;;  %5615 = vmatpush1.bf16.msra.mxu1 %v7896_v46 }
 0x45a   : > { %5099 = vmatprep.mubr.bf16.mxu0 %v8326_v0 }
 0x45b   : > { %5728 = vmatpush1.bf16.msra.mxu0 %v7899_v2 }
 0x461   : > { %5100 = vmatmul.mubr.bf16.gmra.mrb[40].mxu0 %v4906_v5 }
 0x462   : > { %5109 = vmatprep.mubr.bf16.mxu0 %v8326_v0 }
 0x4d1   : > { %v4764_v56 = vpop.f32.mrb[16].mxu0 }
 0x4d2   : > { %v7525_v57 = vadd.f32 %v4764_v56, %v1608_v50  ;;  %v4846_v58 = vpop.f32.mrb[16].mxu1  ;;  %v4766_v59 = vpop.f32.mrb[17].mxu0 }
 0x4d3   : > { %v7527_v60 = vadd.f32 %v4846_v58, %v1616_v51  ;;  %v7526_v61 = vadd.f32 %v4766_v59, %v1612_v52  ;;  %v4848_v62 = vpop.f32.mrb[17].mxu1  ;;  %v4768_v43 = vpop.f32.mrb[18].mxu0 }
 0x4d4   : > { %v4865_v63 = vmax.f32 %v7525_v57, 0.0  ;;  %v7528_v1 = vadd.f32 %v4848_v62, %v1620_v55  ;;  %v4850_v30 = vpop.f32.mrb[18].mxu1  ;;  %v4769_v47 = vpop.f32.mrb[19].mxu0 }
 0x4d5   : > { %v4867_v3 = vmax.f32 %v7527_v60, 0.0  ;;  %v4866_v4 = vmax.f32 %v7526_v61, 0.0  ;;  %v4851_v5 = vpop.f32.mrb[19].mxu1 }
 0x4d6   : > { %v4868_v48 = vmax.f32 %v7528_v1, 0.0 }
 0x4d7   : > { %v4907_v6 = vpack.c.bf16 %v4866_v4, %v4865_v63 }
 0x4d8   : > { %v4908_v12 = vpack.c.bf16 %v4868_v48, %v4867_v3 }
 0x4d9   : > { %5110 = vmatmul.mubr.bf16.gmra.mrb[44].mxu0 %v4907_v6 }
 0x4da   : > { %5119 = vmatprep.mubr.bf16.mxu0 %v8326_v0 }
 0x4e1   : > { %5120 = vmatmul.mubr.bf16.gmra.mrb[48].mxu0 %v4908_v12 }
 0x4f1   : > { %v5051_v7 = vpop.f32.mrb[20].mxu0 }
 0x4f2   : > { %v5052_v8 = vadd.f32 %v5051_v7, %v9375_v22  ;;  %v5053_v9 = vpop.f32.mrb[21].mxu0 }
 0x4f3   : > { %v5054_v10 = vadd.f32 %v5053_v9, %v9378_v53  ;;  %v5055_v11 = vpop.f32.mrb[22].mxu0 }
 0x4f4   : > { %v5056_v16 = vadd.f32 %v5055_v11, %v9375_v22  ;;  %v5057_v17 = vpop.f32.mrb[23].mxu0  ;;  %v5130_v35 = vmax.f32 %v5052_v8, 0.0 }
 0x4f5   : > { %v5058_v0 = vadd.f32 %v5057_v17, %v9378_v53  ;;  %v5131_v20 = vmax.f32 %v5054_v10, 0.0 }
 0x4f6   : > { %v5132_v18 = vmax.f32 %v5056_v16, 0.0 }
 0x4f7   : > { %v5133_v23 = vmax.f32 %v5058_v0, 0.0 }
 0x4f8   : > { %v5162_v24 = vpack.c.bf16 %v5132_v18, %v5130_v35 }
 0x4f9   : > { %v5163_v25 = vpack.c.bf16 %v5133_v23, %v5131_v20  ;;  %v5061_v27 = vpop.f32.mrb[24].mxu0 }
 0x4fa   : > { %v5062_v31 = vadd.f32 %v5061_v27, %v9375_v22  ;;  %v5063_v28 = vpop.f32.mrb[25].mxu0 }
 0x4fb   : > { %v5064_v29 = vadd.f32 %v5063_v28, %v9378_v53  ;;  %v5065_v32 = vpop.f32.mrb[26].mxu0  ;;  %5616 = vmatprep.mubr.bf16.mxu1 %v5163_v25  ;;  %5729 = vmatprep.mubr.bf16.mxu0 %v5163_v25 }
 0x4fc   : > { %v5066_v26 = vadd.f32 %v5065_v32, %v9375_v22  ;;  %v5067_v33 = vpop.f32.mrb[27].mxu0  ;;  %5617 = vmatmul.mubr.bf16.vlgmr.msra.gmra.mrb[20].mxu1 %v5162_v24  ;;  %5730 = vmatmul.mubr.bf16.vlgmr.msra.gmra.mrb[52].mxu0 %v5162_v24  ;;  %v5134_v36 = vmax.f32 %v5062_v31, 0.0 }
 0x4fd   : > { %v5068_v34 = vadd.f32 %v5067_v33, %v9378_v53  ;;  %v5135_v37 = vmax.f32 %v5064_v29, 0.0 }
 0x4fe   : > { %v5136_v21 = vmax.f32 %v5066_v26, 0.0 }
 0x4ff   : > { %v5137_v39 = vmax.f32 %v5068_v34, 0.0 }
 0x500   : > { %v5164_v14 = vpack.c.bf16 %v5136_v21, %v5134_v36 }
 0x501   : > { %v5165_v41 = vpack.c.bf16 %v5137_v39, %v5135_v37  ;;  %v5071_v38 = vpop.f32.mrb[28].mxu0  ;;  %v7902_v37 = vld [vmem:[%s9781_s29 + $0x40] sm:$0xff]  }
 0x502   : > { %v5072_v42 = vadd.f32 %v5071_v38, %v9375_v22  ;;  %v5073_v44 = vpop.f32.mrb[29].mxu0  ;;  %v9410_v39 = vld [vmem:[%s9781_s29 + $0xc0] sm:$0xff]   ;;  %7369 = vmatprep.subr.bf16.mxu1 %v7902_v37 }
 0x503   : > { %v5074_v45 = vadd.f32 %v5073_v44, %v9378_v53  ;;  %v5075_v40 = vpop.f32.mrb[30].mxu0  ;;  %5626 = vmatprep.mubr.bf16.mxu1 %v5165_v41  ;;  %5739 = vmatprep.mubr.bf16.mxu0 %v5165_v41  ;;  %v7904_v41 = vld [vmem:[%s9781_s29] sm:$0xff]   ;;  %v7906_v44 = vld [vmem:[%s9781_s29 + $0x48] sm:$0xff]  }
 0x504   : > { %v5076_v46 = vadd.f32 %v5075_v40, %v9375_v22  ;;  %v5077_v2 = vpop.f32.mrb[31].mxu0  ;;  %5627 = vmatmul.mubr.bf16.gmra.mrb[24].mxu1 %v5164_v14  ;;  %5740 = vmatmul.mubr.bf16.gmra.mrb[56].mxu0 %v5164_v14  ;;  %v5138_v51 = vmax.f32 %v5072_v42, 0.0  ;;  %v9418_v38 = vld [vmem:[%s9781_s29 + $0x80] sm:$0xff]   ;;  %v7908_v40 = vld [vmem:[%s9781_s29 + $0x8] sm:$0xff]  }
 0x505   : > { %v5078_v50 = vadd.f32 %v5077_v2, %v9378_v53  ;;  %v5139_v55 = vmax.f32 %v5074_v45, 0.0  ;;  %7433 = vmatprep.subr.bf16.mxu0 %v9410_v39  ;;  %7370 = vmatpush3.bf16.msra.mxu1 %v7904_v41  ;;  %v9428_v45 = vld [vmem:[%s9781_s29 + $0xc8] sm:$0xff]   ;;  %v7910_v2 = vld [vmem:[%s9781_s29 + $0x50] sm:$0xff]  }
 0x506   : > { %v5140_v52 = vmax.f32 %v5076_v46, 0.0  ;;  %7434 = vmatpush3.bf16.msra.mxu0 %v9418_v38  ;;  %v9436_v46 = vld [vmem:[%s9781_s29 + $0x88] sm:$0xff]   ;;  %7371 = vmatprep.subr.bf16.mxu1 %v7906_v44 }
 0x507   : > { %v5141_v56 = vmax.f32 %v5078_v50, 0.0  ;;  %7435 = vmatprep.subr.bf16.mxu0 %v9428_v45  ;;  %v9445_v50 = vld [vmem:[%s9781_s29 + $0xd0] sm:$0xff]  }
 0x508   : > { %v5166_v57 = vpack.c.bf16 %v5140_v52, %v5138_v51  ;;  %v7912_v51 = vld [vmem:[%s9781_s29 + $0x10] sm:$0xff]  }
 0x509   : > { %v5167_v58 = vpack.c.bf16 %v5141_v56, %v5139_v55  ;;  %v5081_v59 = vpop.f32.mrb[32].mxu0  ;;  %7372 = vmatpush3.bf16.msra.mxu1 %v7908_v40  ;;  %v9454_v52 = vld [vmem:[%s9781_s29 + $0x90] sm:$0xff]   ;;  %v7914_v55 = vld [vmem:[%s9781_s29 + $0x58] sm:$0xff]  }
 0x50a   : > { %v5082_v60 = vadd.f32 %v5081_v59, %v9375_v22  ;;  %v5083_v61 = vpop.f32.mrb[33].mxu0  ;;  %7436 = vmatpush3.bf16.msra.mxu0 %v9436_v46  ;;  %7373 = vmatprep.subr.bf16.mxu1 %v7910_v2  ;;  %v9463_v56 = vld [vmem:[%s9781_s29 + $0xd8] sm:$0xff]   ;;  %v7918_v59 = vld [vmem:[%s9781_s29 + $0x60] sm:$0xff]  }
 0x50b   : > { %v5084_v62 = vadd.f32 %v5083_v61, %v9378_v53  ;;  %v5085_v43 = vpop.f32.mrb[34].mxu0  ;;  %5636 = vmatprep.mubr.bf16.mxu1 %v5167_v58  ;;  %5749 = vmatprep.mubr.bf16.mxu0 %v5167_v58  ;;  %v9472_v58 = vld [vmem:[%s9781_s29 + $0x98] sm:$0xff]   ;;  %v7920_v61 = vld [vmem:[%s9781_s29 + $0x20] sm:$0xff]  }
 0x50c   : > { %v5086_v63 = vadd.f32 %v5085_v43, %v9375_v22  ;;  %v5087_v1 = vpop.f32.mrb[35].mxu0  ;;  %5637 = vmatmul.mubr.bf16.gmra.mrb[28].mxu1 %v5166_v57  ;;  %5750 = vmatmul.mubr.bf16.gmra.mrb[60].mxu0 %v5166_v57  ;;  %v5142_v47 = vmax.f32 %v5082_v60, 0.0  ;;  %v7916_v57 = vld [vmem:[%s9781_s29 + $0x18] sm:$0xff]   ;;  %v9481_v60 = vld [vmem:[%s9781_s29 + $0xe0] sm:$0xff]   ;;  %v7922_v43 = vld [vmem:[%s9781_s29 + $0x68] sm:$0xff]  }
 0x50d   : > { %v5088_v30 = vadd.f32 %v5087_v1, %v9378_v53  ;;  %v5143_v4 = vmax.f32 %v5084_v62, 0.0  ;;  %7437 = vmatprep.subr.bf16.mxu0 %v9445_v50  ;;  %7374 = vmatpush3.bf16.msra.mxu1 %v7912_v51  ;;  %v9490_v62 = vld [vmem:[%s9781_s29 + $0xa0] sm:$0xff]   ;;  %v7924_v1 = vld [vmem:[%s9781_s29 + $0x28] sm:$0xff]  }
 0x50e   : > { %v5144_v3 = vmax.f32 %v5086_v63, 0.0  ;;  %7438 = vmatpush3.bf16.msra.mxu0 %v9454_v52  ;;  %7375 = vmatprep.subr.bf16.mxu1 %v7914_v55  ;;  %v9499_v63 = vld [vmem:[%s9781_s29 + $0xe8] sm:$0xff]  }
 0x50f   : > { %v5145_v5 = vmax.f32 %v5088_v30, 0.0  ;;  %7439 = vmatprep.subr.bf16.mxu0 %v9463_v56  ;;  %v9509_v30 = vld [vmem:[%s9781_s29 + $0xa8] sm:$0xff]  }
 0x510   : > { %v5168_v48 = vpack.c.bf16 %v5144_v3, %v5142_v47  ;;  %v7926_v47 = vld [vmem:[%s9781_s29 + $0x70] sm:$0xff]  }
 0x511   : > { %v5169_v6 = vpack.c.bf16 %v5145_v5, %v5143_v4  ;;  %7376 = vmatpush3.bf16.msra.mxu1 %v7916_v57  ;;  %v9518_v3 = vld [vmem:[%s9781_s29 + $0xf0] sm:$0xff]  }
 0x512   : > { %7440 = vmatpush3.bf16.msra.mxu0 %v9472_v58  ;;  %7377 = vmatprep.subr.bf16.mxu1 %v7918_v59  ;;  %v7928_v4 = vld [vmem:[%s9781_s29 + $0x30] sm:$0xff]  }
 0x513   : > { %5646 = vmatprep.mubr.bf16.mxu1 %v5169_v6  ;;  %5759 = vmatprep.mubr.bf16.mxu0 %v5169_v6  ;;  %v9526_v5 = vld [vmem:[%s9781_s29 + $0xb0] sm:$0xff]   ;;  %v9536_v6 = vld [vmem:[%s9781_s29 + $0xf8] sm:$0xff]  }
 0x514   : > { %5647 = vmatmul.mubr.bf16.gmra.mrb[32].mxu1 %v5168_v48  ;;  %5760 = vmatmul.mubr.bf16.gmra.mrb[64].mxu0 %v5168_v48  ;;  %v7930_v48 = vld [vmem:[%s9781_s29 + $0x78] sm:$0xff]  }
 0x515   : > { %7441 = vmatprep.subr.bf16.mxu0 %v9481_v60  ;;  %7378 = vmatpush3.bf16.msra.mxu1 %v7920_v61 }
 0x516   : > { %7442 = vmatpush3.bf16.msra.mxu0 %v9490_v62  ;;  %7379 = vmatprep.subr.bf16.mxu1 %v7922_v43 }
 0x517   : > { %7443 = vmatprep.subr.bf16.mxu0 %v9499_v63 }
 0x519   : > { %7380 = vmatpush3.bf16.msra.mxu1 %v7924_v1 }
 0x51a   : > { %7444 = vmatpush3.bf16.msra.mxu0 %v9509_v30  ;;  %7381 = vmatprep.subr.bf16.mxu1 %v7926_v47 }
 0x51b   : > { %7445 = vmatprep.subr.bf16.mxu0 %v9518_v3 }
 0x51d   : > { %7382 = vmatpush3.bf16.msra.mxu1 %v7928_v4 }
 0x51e   : > { %7446 = vmatpush3.bf16.msra.mxu0 %v9526_v5  ;;  %7383 = vmatprep.subr.bf16.mxu1 %v7930_v48 }
 0x51f   : > { %7447 = vmatprep.subr.bf16.mxu0 %v9536_v6 }
 0x52c   : > { %v5091_v12 = vpop.f32.mrb[36].mxu0 }
 0x52d   : > { %v5092_v49 = vadd.f32 %v5091_v12, %v9375_v22  ;;  %v5093_v7 = vpop.f32.mrb[37].mxu0  ;;  %v7932_v12 = vld [vmem:[%s9781_s29 + $0x38] sm:$0xff]  }
 0x52e   : > { %v5094_v8 = vadd.f32 %v5093_v7, %v9378_v53  ;;  %v5095_v9 = vpop.f32.mrb[38].mxu0  ;;  %7384 = vmatpush3.bf16.msra.mxu1 %v7932_v12 }
 0x52f   : > { %v5096_v10 = vadd.f32 %v5095_v9, %v9375_v22  ;;  %v5097_v11 = vpop.f32.mrb[39].mxu0  ;;  %v5146_v17 = vmax.f32 %v5092_v49, 0.0  ;;  %v9544_v49 = vld [vmem:[%s9781_s29 + $0xb8] sm:$0xff]   ;;  %7497 = vmatprep.subr.bf16.mxu1 %v9410_v39 }
 0x530   : > { %v5098_v16 = vadd.f32 %v5097_v11, %v9378_v53  ;;  %v5147_v35 = vmax.f32 %v5094_v8, 0.0  ;;  %7448 = vmatpush3.bf16.msra.mxu0 %v9544_v49 }
 0x531   : > { %v5148_v0 = vmax.f32 %v5096_v10, 0.0 }
 0x532   : > { %v5149_v18 = vmax.f32 %v5098_v16, 0.0 }
 0x533   : > { %v5170_v20 = vpack.c.bf16 %v5148_v0, %v5146_v17 }
 0x534   : > { %v5171_v23 = vpack.c.bf16 %v5149_v18, %v5147_v35  ;;  %v5101_v24 = vpop.f32.mrb[40].mxu0 }
 0x535   : > { %v5102_v25 = vadd.f32 %v5101_v24, %v9375_v22  ;;  %v5103_v27 = vpop.f32.mrb[41].mxu0 }
 0x536   : > { %v5104_v31 = vadd.f32 %v5103_v27, %v9378_v53  ;;  %v5105_v28 = vpop.f32.mrb[42].mxu0  ;;  %5656 = vmatprep.mubr.bf16.mxu1 %v5171_v23  ;;  %5769 = vmatprep.mubr.bf16.mxu0 %v5171_v23 }
 0x537   : > { %v5106_v29 = vadd.f32 %v5105_v28, %v9375_v22  ;;  %v5107_v32 = vpop.f32.mrb[43].mxu0  ;;  %5657 = vmatmul.mubr.bf16.gmra.mrb[36].mxu1 %v5170_v20  ;;  %5770 = vmatmul.mubr.bf16.gmra.mrb[68].mxu0 %v5170_v20  ;;  %v5150_v33 = vmax.f32 %v5102_v25, 0.0 }
 0x538   : > { %v5108_v26 = vadd.f32 %v5107_v32, %v9378_v53  ;;  %v5151_v36 = vmax.f32 %v5104_v31, 0.0 }
 0x539   : > { %v5152_v34 = vmax.f32 %v5106_v29, 0.0 }
 0x53a   : > { %v5153_v21 = vmax.f32 %v5108_v26, 0.0 }
 0x53b   : > { %v5172_v14 = vpack.c.bf16 %v5152_v34, %v5150_v33 }
 0x53c   : > { %v5173_v42 = vpack.c.bf16 %v5153_v21, %v5151_v36 }
 0x53e   : > { %5666 = vmatprep.mubr.bf16.mxu1 %v5173_v42  ;;  %5779 = vmatprep.mubr.bf16.mxu0 %v5173_v42  ;;  %v5242_v42 = vld [vmem:[#allocation13] sm:$0xf] }
 0x53f   : > { %5667 = vmatmul.mubr.bf16.gmra.mrb[40].mxu1 %v5172_v14  ;;  %5780 = vmatmul.mubr.bf16.gmra.mrb[72].mxu0 %v5172_v14  ;;  %v9558_v44 = vrot.slane %v5242_v42, %v8794_v13  ;;  %v9564_v40 = vrot.slane %v5242_v42, %v8799_v15 }
 0x5ac   : > { %v5111_v7 = vpop.f32.mrb[44].mxu0 }
 0x5ad   : > { %v5112_v8 = vadd.f32 %v5111_v7, %v9375_v22  ;;  %v5113_v9 = vpop.f32.mrb[45].mxu0 }
 0x5ae   : > { %v5114_v10 = vadd.f32 %v5113_v9, %v9378_v53  ;;  %v5115_v11 = vpop.f32.mrb[46].mxu0 }
 0x5af   : > { %v5116_v16 = vadd.f32 %v5115_v11, %v9375_v22  ;;  %v5117_v17 = vpop.f32.mrb[47].mxu0  ;;  %v5154_v35 = vmax.f32 %v5112_v8, 0.0 }
 0x5b0   : > { %v5118_v0 = vadd.f32 %v5117_v17, %v9378_v53  ;;  %v5155_v20 = vmax.f32 %v5114_v10, 0.0 }
 0x5b1   : > { %v5156_v18 = vmax.f32 %v5116_v16, 0.0 }
 0x5b2   : > { %v5157_v23 = vmax.f32 %v5118_v0, 0.0 }
 0x5b3   : > { %v5174_v24 = vpack.c.bf16 %v5156_v18, %v5154_v35 }
 0x5b4   : > { %v5175_v25 = vpack.c.bf16 %v5157_v23, %v5155_v20  ;;  %v5121_v27 = vpop.f32.mrb[48].mxu0 }
 0x5b5   : > { %v5122_v31 = vadd.f32 %v5121_v27, %v9375_v22  ;;  %v5123_v28 = vpop.f32.mrb[49].mxu0 }
 0x5b6   : > { %v5124_v29 = vadd.f32 %v5123_v28, %v9378_v53  ;;  %v5125_v32 = vpop.f32.mrb[50].mxu0  ;;  %5676 = vmatprep.mubr.bf16.mxu1 %v5175_v25  ;;  %5789 = vmatprep.mubr.bf16.mxu0 %v5175_v25 }
 0x5b7   : > { %v5126_v26 = vadd.f32 %v5125_v32, %v9375_v22  ;;  %v5127_v33 = vpop.f32.mrb[51].mxu0  ;;  %5677 = vmatmul.mubr.bf16.gmra.mrb[44].mxu1 %v5174_v24  ;;  %5790 = vmatmul.mubr.bf16.gmra.mrb[76].mxu0 %v5174_v24  ;;  %v5158_v36 = vmax.f32 %v5122_v31, 0.0  ;;  %v9561_v22 = vrot.slane %v5242_v42, %v8877_v19 }
 0x5b8   : > { %v5128_v34 = vadd.f32 %v5127_v33, %v9378_v53  ;;  %v5159_v37 = vmax.f32 %v5124_v29, 0.0  ;;  %v9567_v53 = vrot.slane %v5242_v42, %v8830_v54 }
 0x5b9   : > { %v5160_v21 = vmax.f32 %v5126_v26, 0.0 }
 0x5ba   : > { %v5161_v39 = vmax.f32 %v5128_v34, 0.0 }
 0x5bb   : > { %v5176_v14 = vpack.c.bf16 %v5160_v21, %v5158_v36 }
 0x5bc   : > { %v5177_v41 = vpack.c.bf16 %v5161_v39, %v5159_v37 }
 0x5be   : > { %5686 = vmatprep.mubr.bf16.mxu1 %v5177_v41  ;;  %5799 = vmatprep.mubr.bf16.mxu0 %v5177_v41 }
 0x5bf   : > { %5687 = vmatmul.mubr.bf16.gmra.mrb[48].mxu1 %v5176_v14  ;;  %5800 = vmatmul.mubr.bf16.gmra.mrb[80].mxu0 %v5176_v14 }
 0x5cf   : > { %v5618_v2 = vpop.f32.mrb[20].mxu1  ;;  %v5731_v51 = vpop.f32.mrb[52].mxu0 }
 0x5d0   : > { %v5619_v55 = vadd.f32 %v5618_v2, %v9558_v44  ;;  %v5732_v57 = vadd.f32 %v5731_v51, %v9561_v22  ;;  %v5620_v59 = vpop.f32.mrb[21].mxu1  ;;  %v5733_v61 = vpop.f32.mrb[53].mxu0 }
 0x5d1   : > { %v5621_v13 = vadd.f32 %v5620_v59, %v9564_v40  ;;  %v5734_v43 = vadd.f32 %v5733_v61, %v9567_v53  ;;  %v5622_v19 = vpop.f32.mrb[22].mxu1  ;;  %v5735_v1 = vpop.f32.mrb[54].mxu0 }
 0x5d2   : > { %v5623_v15 = vadd.f32 %v5622_v19, %v9558_v44  ;;  %v5736_v47 = vadd.f32 %v5735_v1, %v9561_v22  ;;  %v5624_v54 = vpop.f32.mrb[23].mxu1  ;;  %v5737_v4 = vpop.f32.mrb[55].mxu0  ;;  %v5810_v7 = vmax.f32 %v5619_v55, 0.0  ;;  %v5812_v8 = vmax.f32 %v5732_v57, 0.0 }
 0x5d3   : > { %v5625_v48 = vadd.f32 %v5624_v54, %v9564_v40  ;;  %v5738_v12 = vadd.f32 %v5737_v4, %v9567_v53  ;;  %v5811_v11 = vmax.f32 %v5621_v13, 0.0  ;;  %v5813_v16 = vmax.f32 %v5734_v43, 0.0 }
 0x5d4   : > { %v5814_v9 = vmax.f32 %v5623_v15, 0.0  ;;  %v5816_v10 = vmax.f32 %v5736_v47, 0.0 }
 0x5d5   : > { %v5815_v17 = vmax.f32 %v5625_v48, 0.0  ;;  %v5817_v0 = vmax.f32 %v5738_v12, 0.0 }
 0x5d6   : > { %v5874_v35 = vpack.c.bf16 %v5814_v9, %v5810_v7  ;;  %v5876_v18 = vpack.c.bf16 %v5816_v10, %v5812_v8 }
 0x5d7   : > { %v5875_v20 = vpack.c.bf16 %v5815_v17, %v5811_v11  ;;  %v5877_v23 = vpack.c.bf16 %v5817_v0, %v5813_v16  ;;  %v5628_v24 = vpop.f32.mrb[24].mxu1  ;;  %v5741_v25 = vpop.f32.mrb[56].mxu0 }
 0x5d8   : > { %v5629_v27 = vadd.f32 %v5628_v24, %v9558_v44  ;;  %v5742_v31 = vadd.f32 %v5741_v25, %v9561_v22  ;;  %v5630_v28 = vpop.f32.mrb[25].mxu1  ;;  %v5743_v29 = vpop.f32.mrb[57].mxu0 }
 0x5d9   : > { %v5631_v32 = vadd.f32 %v5630_v28, %v9564_v40  ;;  %v5744_v26 = vadd.f32 %v5743_v29, %v9567_v53  ;;  %v5632_v33 = vpop.f32.mrb[26].mxu1  ;;  %v5745_v34 = vpop.f32.mrb[58].mxu0  ;;  %6201 = vmatprep.mubr.bf16.mxu1 %v5875_v20  ;;  %6298 = vmatprep.mubr.bf16.mxu0 %v5877_v23 }
 0x5da   : > { %v5633_v36 = vadd.f32 %v5632_v33, %v9558_v44  ;;  %v5746_v21 = vadd.f32 %v5745_v34, %v9561_v22  ;;  %v5634_v37 = vpop.f32.mrb[27].mxu1  ;;  %v5747_v39 = vpop.f32.mrb[59].mxu0  ;;  %6202 = vmatmul.mubr.bf16.vlgmr.msra.gmra.mrb[52].mxu1 %v5874_v35  ;;  %6299 = vmatmul.mubr.bf16.vlgmr.msra.gmra.mrb[84].mxu0 %v5876_v18  ;;  %v5818_v42 = vmax.f32 %v5629_v27, 0.0  ;;  %v5820_v2 = vmax.f32 %v5742_v31, 0.0 }
 0x5db   : > { %v5635_v14 = vadd.f32 %v5634_v37, %v9564_v40  ;;  %v5748_v41 = vadd.f32 %v5747_v39, %v9567_v53  ;;  %7505 = vmatpush3.bf16.msra.mxu1 %v9418_v38  ;;  %v5819_v57 = vmax.f32 %v5631_v32, 0.0  ;;  %v5821_v59 = vmax.f32 %v5744_v26, 0.0 }
 0x5dc   : > { %v5822_v51 = vmax.f32 %v5633_v36, 0.0  ;;  %v5824_v55 = vmax.f32 %v5746_v21, 0.0  ;;  %7498 = vmatprep.subr.bf16.mxu1 %v9428_v45 }
 0x5dd   : > { %v5823_v61 = vmax.f32 %v5635_v14, 0.0  ;;  %v5825_v13 = vmax.f32 %v5748_v41, 0.0 }
 0x5de   : > { %v5878_v43 = vpack.c.bf16 %v5822_v51, %v5818_v42  ;;  %v5880_v19 = vpack.c.bf16 %v5824_v55, %v5820_v2 }
 0x5df   : > { %v5879_v1 = vpack.c.bf16 %v5823_v61, %v5819_v57  ;;  %v5881_v15 = vpack.c.bf16 %v5825_v13, %v5821_v59  ;;  %v5638_v47 = vpop.f32.mrb[28].mxu1  ;;  %v5751_v54 = vpop.f32.mrb[60].mxu0  ;;  %7506 = vmatpush3.bf16.msra.mxu1 %v9436_v46 }
 0x5e0   : > { %v5639_v38 = vadd.f32 %v5638_v47, %v9558_v44  ;;  %v5752_v4 = vadd.f32 %v5751_v54, %v9561_v22  ;;  %v5640_v48 = vpop.f32.mrb[29].mxu1  ;;  %v5753_v12 = vpop.f32.mrb[61].mxu0  ;;  %7499 = vmatprep.subr.bf16.mxu1 %v9445_v50 }
 0x5e1   : > { %v5641_v45 = vadd.f32 %v5640_v48, %v9564_v40  ;;  %v5754_v7 = vadd.f32 %v5753_v12, %v9567_v53  ;;  %v5642_v8 = vpop.f32.mrb[30].mxu1  ;;  %v5755_v9 = vpop.f32.mrb[62].mxu0  ;;  %6209 = vmatprep.mubr.bf16.mxu1 %v5879_v1  ;;  %6306 = vmatprep.mubr.bf16.mxu0 %v5881_v15 }
 0x5e2   : > { %v5643_v10 = vadd.f32 %v5642_v8, %v9558_v44  ;;  %v5756_v46 = vadd.f32 %v5755_v9, %v9561_v22  ;;  %v5644_v11 = vpop.f32.mrb[31].mxu1  ;;  %v5757_v16 = vpop.f32.mrb[63].mxu0  ;;  %6210 = vmatmul.mubr.bf16.gmra.mrb[56].mxu1 %v5878_v43  ;;  %6307 = vmatmul.mubr.bf16.gmra.mrb[88].mxu0 %v5880_v19  ;;  %v5826_v0 = vmax.f32 %v5639_v38, 0.0  ;;  %v5828_v35 = vmax.f32 %v5752_v4, 0.0 }
 0x5e3   : > { %v5645_v17 = vadd.f32 %v5644_v11, %v9564_v40  ;;  %v5758_v50 = vadd.f32 %v5757_v16, %v9567_v53  ;;  %7507 = vmatpush3.bf16.msra.mxu1 %v9454_v52  ;;  %v5827_v23 = vmax.f32 %v5641_v45, 0.0  ;;  %v5829_v24 = vmax.f32 %v5754_v7, 0.0 }
 0x5e4   : > { %v5830_v18 = vmax.f32 %v5643_v10, 0.0  ;;  %v5832_v20 = vmax.f32 %v5756_v46, 0.0  ;;  %7500 = vmatprep.subr.bf16.mxu1 %v9463_v56 }
 0x5e5   : > { %v5831_v25 = vmax.f32 %v5645_v17, 0.0  ;;  %v5833_v27 = vmax.f32 %v5758_v50, 0.0 }
 0x5e6   : > { %v5882_v31 = vpack.c.bf16 %v5830_v18, %v5826_v0  ;;  %v5884_v28 = vpack.c.bf16 %v5832_v20, %v5828_v35 }
 0x5e7   : > { %v5883_v29 = vpack.c.bf16 %v5831_v25, %v5827_v23  ;;  %v5885_v32 = vpack.c.bf16 %v5833_v27, %v5829_v24  ;;  %v5648_v26 = vpop.f32.mrb[32].mxu1  ;;  %v5761_v33 = vpop.f32.mrb[64].mxu0  ;;  %7508 = vmatpush3.bf16.msra.mxu1 %v9472_v58 }
 0x5e8   : > { %v5649_v52 = vadd.f32 %v5648_v26, %v9558_v44  ;;  %v5762_v34 = vadd.f32 %v5761_v33, %v9561_v22  ;;  %v5650_v36 = vpop.f32.mrb[33].mxu1  ;;  %v5763_v21 = vpop.f32.mrb[65].mxu0  ;;  %7501 = vmatprep.subr.bf16.mxu1 %v9481_v60 }
 0x5e9   : > { %v5651_v56 = vadd.f32 %v5650_v36, %v9564_v40  ;;  %v5764_v37 = vadd.f32 %v5763_v21, %v9567_v53  ;;  %v5652_v39 = vpop.f32.mrb[34].mxu1  ;;  %v5765_v14 = vpop.f32.mrb[66].mxu0  ;;  %6217 = vmatprep.mubr.bf16.mxu1 %v5883_v29  ;;  %6314 = vmatprep.mubr.bf16.mxu0 %v5885_v32 }
 0x5ea   : > { %v5653_v41 = vadd.f32 %v5652_v39, %v9558_v44  ;;  %v5766_v58 = vadd.f32 %v5765_v14, %v9561_v22  ;;  %v5654_v42 = vpop.f32.mrb[35].mxu1  ;;  %v5767_v2 = vpop.f32.mrb[67].mxu0  ;;  %6218 = vmatmul.mubr.bf16.gmra.mrb[60].mxu1 %v5882_v31  ;;  %6315 = vmatmul.mubr.bf16.gmra.mrb[92].mxu0 %v5884_v28  ;;  %v5834_v55 = vmax.f32 %v5649_v52, 0.0  ;;  %v5836_v57 = vmax.f32 %v5762_v34, 0.0 }
 0x5eb   : > { %v5655_v51 = vadd.f32 %v5654_v42, %v9564_v40  ;;  %v5768_v60 = vadd.f32 %v5767_v2, %v9567_v53  ;;  %7509 = vmatpush3.bf16.msra.mxu1 %v9490_v62  ;;  %v5835_v13 = vmax.f32 %v5651_v56, 0.0  ;;  %v5837_v43 = vmax.f32 %v5764_v37, 0.0 }
 0x5ec   : > { %v5838_v59 = vmax.f32 %v5653_v41, 0.0  ;;  %v5840_v61 = vmax.f32 %v5766_v58, 0.0  ;;  %7502 = vmatprep.subr.bf16.mxu1 %v9499_v63 }
 0x5ed   : > { %v5839_v19 = vmax.f32 %v5655_v51, 0.0  ;;  %v5841_v1 = vmax.f32 %v5768_v60, 0.0 }
 0x5ee   : > { %v5886_v15 = vpack.c.bf16 %v5838_v59, %v5834_v55  ;;  %v5888_v47 = vpack.c.bf16 %v5840_v61, %v5836_v57 }
 0x5ef   : > { %v5887_v54 = vpack.c.bf16 %v5839_v19, %v5835_v13  ;;  %v5889_v38 = vpack.c.bf16 %v5841_v1, %v5837_v43  ;;  %7510 = vmatpush3.bf16.msra.mxu1 %v9509_v30 }
 0x5f0   : > { %7503 = vmatprep.subr.bf16.mxu1 %v9518_v3 }
 0x5f1   : > { %6225 = vmatprep.mubr.bf16.mxu1 %v5887_v54  ;;  %6322 = vmatprep.mubr.bf16.mxu0 %v5889_v38 }
 0x5f2   : > { %6226 = vmatmul.mubr.bf16.gmra.mrb[64].mxu1 %v5886_v15  ;;  %6323 = vmatmul.mubr.bf16.gmra.mrb[96].mxu0 %v5888_v47 }
 0x5f3   : > { %7511 = vmatpush3.bf16.msra.mxu1 %v9526_v5 }
 0x5f4   : > { %7504 = vmatprep.subr.bf16.mxu1 %v9536_v6 }
 0x5f7   : > { %7512 = vmatpush3.bf16.msra.mxu1 %v9544_v49 }
 0x60a   : > { %v5658_v62 = vpop.f32.mrb[36].mxu1  ;;  %v5771_v63 = vpop.f32.mrb[68].mxu0 }
 0x60b   : > { %v5659_v4 = vadd.f32 %v5658_v62, %v9558_v44  ;;  %v5772_v48 = vadd.f32 %v5771_v63, %v9561_v22  ;;  %v5660_v12 = vpop.f32.mrb[37].mxu1  ;;  %v5773_v30 = vpop.f32.mrb[69].mxu0 }
 0x60c   : > { %v5661_v3 = vadd.f32 %v5660_v12, %v9564_v40  ;;  %v5774_v45 = vadd.f32 %v5773_v30, %v9567_v53  ;;  %v5662_v7 = vpop.f32.mrb[38].mxu1  ;;  %v5775_v8 = vpop.f32.mrb[70].mxu0 }
 0x60d   : > { %v5663_v5 = vadd.f32 %v5662_v7, %v9558_v44  ;;  %v5776_v6 = vadd.f32 %v5775_v8, %v9561_v22  ;;  %v5664_v9 = vpop.f32.mrb[39].mxu1  ;;  %v5777_v49 = vpop.f32.mrb[71].mxu0  ;;  %v5842_v11 = vmax.f32 %v5659_v4, 0.0  ;;  %v5844_v16 = vmax.f32 %v5772_v48, 0.0 }
 0x60e   : > { %v5665_v10 = vadd.f32 %v5664_v9, %v9564_v40  ;;  %v5778_v46 = vadd.f32 %v5777_v49, %v9567_v53  ;;  %v5843_v0 = vmax.f32 %v5661_v3, 0.0  ;;  %v5845_v35 = vmax.f32 %v5774_v45, 0.0 }
 0x60f   : > { %v5846_v17 = vmax.f32 %v5663_v5, 0.0  ;;  %v5848_v50 = vmax.f32 %v5776_v6, 0.0 }
 0x610   : > { %v5847_v18 = vmax.f32 %v5665_v10, 0.0  ;;  %v5849_v20 = vmax.f32 %v5778_v46, 0.0 }
 0x611   : > { %v5890_v23 = vpack.c.bf16 %v5846_v17, %v5842_v11  ;;  %v5892_v24 = vpack.c.bf16 %v5848_v50, %v5844_v16 }
 0x612   : > { %v5891_v25 = vpack.c.bf16 %v5847_v18, %v5843_v0  ;;  %v5893_v27 = vpack.c.bf16 %v5849_v20, %v5845_v35  ;;  %v5668_v31 = vpop.f32.mrb[40].mxu1  ;;  %v5781_v28 = vpop.f32.mrb[72].mxu0 }
 0x613   : > { %v5669_v29 = vadd.f32 %v5668_v31, %v9558_v44  ;;  %v5782_v32 = vadd.f32 %v5781_v28, %v9561_v22  ;;  %v5670_v26 = vpop.f32.mrb[41].mxu1  ;;  %v5783_v33 = vpop.f32.mrb[73].mxu0 }
 0x614   : > { %v5671_v52 = vadd.f32 %v5670_v26, %v9564_v40  ;;  %v5784_v34 = vadd.f32 %v5783_v33, %v9567_v53  ;;  %v5672_v36 = vpop.f32.mrb[42].mxu1  ;;  %v5785_v21 = vpop.f32.mrb[74].mxu0  ;;  %6233 = vmatprep.mubr.bf16.mxu1 %v5891_v25  ;;  %6330 = vmatprep.mubr.bf16.mxu0 %v5893_v27 }
 0x615   : > { %v5673_v56 = vadd.f32 %v5672_v36, %v9558_v44  ;;  %v5786_v37 = vadd.f32 %v5785_v21, %v9561_v22  ;;  %v5674_v39 = vpop.f32.mrb[43].mxu1  ;;  %v5787_v14 = vpop.f32.mrb[75].mxu0  ;;  %6234 = vmatmul.mubr.bf16.gmra.mrb[68].mxu1 %v5890_v23  ;;  %6331 = vmatmul.mubr.bf16.gmra.mrb[100].mxu0 %v5892_v24  ;;  %v5850_v42 = vmax.f32 %v5669_v29, 0.0  ;;  %v5852_v2 = vmax.f32 %v5782_v32, 0.0 }
 0x616   : > { %v5675_v41 = vadd.f32 %v5674_v39, %v9564_v40  ;;  %v5788_v58 = vadd.f32 %v5787_v14, %v9567_v53  ;;  %v5851_v55 = vmax.f32 %v5671_v52, 0.0  ;;  %v5853_v57 = vmax.f32 %v5784_v34, 0.0 }
 0x617   : > { %v5854_v51 = vmax.f32 %v5673_v56, 0.0  ;;  %v5856_v60 = vmax.f32 %v5786_v37, 0.0 }
 0x618   : > { %v5855_v59 = vmax.f32 %v5675_v41, 0.0  ;;  %v5857_v61 = vmax.f32 %v5788_v58, 0.0 }
 0x619   : > { %v5894_v13 = vpack.c.bf16 %v5854_v51, %v5850_v42  ;;  %v5896_v43 = vpack.c.bf16 %v5856_v60, %v5852_v2 }
 0x61a   : > { %v5895_v19 = vpack.c.bf16 %v5855_v59, %v5851_v55  ;;  %v5897_v1 = vpack.c.bf16 %v5857_v61, %v5853_v57 }
 0x61c   : > { %6241 = vmatprep.mubr.bf16.mxu1 %v5895_v19  ;;  %6338 = vmatprep.mubr.bf16.mxu0 %v5897_v1 }
 0x61d   : > { %6242 = vmatmul.mubr.bf16.gmra.mrb[72].mxu1 %v5894_v13  ;;  %6339 = vmatmul.mubr.bf16.gmra.mrb[104].mxu0 %v5896_v43 }
 0x68a   : > { %v5678_v15 = vpop.f32.mrb[44].mxu1  ;;  %v5791_v47 = vpop.f32.mrb[76].mxu0 }
 0x68b   : > { %v5679_v54 = vadd.f32 %v5678_v15, %v9558_v44  ;;  %v5792_v38 = vadd.f32 %v5791_v47, %v9561_v22  ;;  %v5680_v62 = vpop.f32.mrb[45].mxu1  ;;  %v5793_v63 = vpop.f32.mrb[77].mxu0 }
 0x68c   : > { %v5681_v4 = vadd.f32 %v5680_v62, %v9564_v40  ;;  %v5794_v48 = vadd.f32 %v5793_v63, %v9567_v53  ;;  %v5682_v12 = vpop.f32.mrb[46].mxu1  ;;  %v5795_v30 = vpop.f32.mrb[78].mxu0 }
 0x68d   : > { %v5683_v3 = vadd.f32 %v5682_v12, %v9558_v44  ;;  %v5796_v45 = vadd.f32 %v5795_v30, %v9561_v22  ;;  %v5684_v7 = vpop.f32.mrb[47].mxu1  ;;  %v5797_v8 = vpop.f32.mrb[79].mxu0  ;;  %v5858_v9 = vmax.f32 %v5679_v54, 0.0  ;;  %v5860_v49 = vmax.f32 %v5792_v38, 0.0 }
 0x68e   : > { %v5685_v5 = vadd.f32 %v5684_v7, %v9564_v40  ;;  %v5798_v6 = vadd.f32 %v5797_v8, %v9567_v53  ;;  %v5859_v11 = vmax.f32 %v5681_v4, 0.0  ;;  %v5861_v16 = vmax.f32 %v5794_v48, 0.0 }
 0x68f   : > { %v5862_v10 = vmax.f32 %v5683_v3, 0.0  ;;  %v5864_v46 = vmax.f32 %v5796_v45, 0.0 }
 0x690   : > { %v5863_v17 = vmax.f32 %v5685_v5, 0.0  ;;  %v5865_v50 = vmax.f32 %v5798_v6, 0.0 }
 0x691   : > { %v5898_v0 = vpack.c.bf16 %v5862_v10, %v5858_v9  ;;  %v5900_v35 = vpack.c.bf16 %v5864_v46, %v5860_v49 }
 0x692   : > { %v5899_v18 = vpack.c.bf16 %v5863_v17, %v5859_v11  ;;  %v5901_v20 = vpack.c.bf16 %v5865_v50, %v5861_v16  ;;  %v5688_v23 = vpop.f32.mrb[48].mxu1  ;;  %v5801_v24 = vpop.f32.mrb[80].mxu0 }
 0x693   : > { %v5689_v25 = vadd.f32 %v5688_v23, %v9558_v44  ;;  %v5802_v27 = vadd.f32 %v5801_v24, %v9561_v22  ;;  %v5690_v31 = vpop.f32.mrb[49].mxu1  ;;  %v5803_v28 = vpop.f32.mrb[81].mxu0 }
 0x694   : > { %v5691_v29 = vadd.f32 %v5690_v31, %v9564_v40  ;;  %v5804_v32 = vadd.f32 %v5803_v28, %v9567_v53  ;;  %v5692_v26 = vpop.f32.mrb[50].mxu1  ;;  %v5805_v33 = vpop.f32.mrb[82].mxu0  ;;  %6249 = vmatprep.mubr.bf16.mxu1 %v5899_v18 }
 0x695   : > { %v5693_v52 = vadd.f32 %v5692_v26, %v9558_v44  ;;  %v5806_v34 = vadd.f32 %v5805_v33, %v9561_v22  ;;  %v5694_v36 = vpop.f32.mrb[51].mxu1  ;;  %v5807_v21 = vpop.f32.mrb[83].mxu0  ;;  %6250 = vmatmul.mubr.bf16.gmra.mrb[76].mxu1 %v5898_v0  ;;  %v5866_v39 = vmax.f32 %v5689_v25, 0.0  ;;  %v5868_v14 = vmax.f32 %v5802_v27, 0.0 }
 0x696   : > { %v5695_v56 = vadd.f32 %v5694_v36, %v9564_v40  ;;  %v5808_v37 = vadd.f32 %v5807_v21, %v9567_v53  ;;  %v5867_v42 = vmax.f32 %v5691_v29, 0.0  ;;  %v5869_v2 = vmax.f32 %v5804_v32, 0.0  ;;  %v9648_v53 = vld [vmem:[#allocation15] ss:$0 sm:$0xff] }
 0x697   : > { %v5870_v41 = vmax.f32 %v5693_v52, 0.0  ;;  %v5872_v58 = vmax.f32 %v5806_v34, 0.0 }
 0x698   : > { %v5871_v51 = vmax.f32 %v5695_v56, 0.0  ;;  %v5873_v60 = vmax.f32 %v5808_v37, 0.0 }
 0x699   : > { %v5902_v55 = vpack.c.bf16 %v5870_v41, %v5866_v39  ;;  %v5904_v57 = vpack.c.bf16 %v5872_v58, %v5868_v14 }
 0x69a   : > { %v5903_v44 = vpack.c.bf16 %v5871_v51, %v5867_v42  ;;  %v5905_v59 = vpack.c.bf16 %v5873_v60, %v5869_v2 }
 0x69c   : > { %6257 = vmatprep.mubr.bf16.mxu1 %v5903_v44 }
 0x69d   : > { %6258 = vmatmul.mubr.bf16.gmra.mrb[80].mxu1 %v5902_v55 }
 0x69e   : > { %6346 = vmatprep.mubr.bf16.mxu1 %v5901_v20 }
 0x6a5   : > { %6347 = vmatmul.mubr.bf16.vlgmr.msra.gmra.mrb[84].mxu1 %v5900_v35 }
 0x6a6   : > { %6354 = vmatprep.mubr.bf16.mxu1 %v5905_v59 }
 0x6ad   : > { %v7385_v22 = vpop.f32.mrb[52].mxu1  ;;  %v7449_v40 = vpop.f32.mrb[84].mxu0  ;;  %6355 = vmatmul.mubr.bf16.gmra.mrb[88].mxu1 %v5904_v57 }
 0x6ae   : > { %v7386_v61 = vpop.f32.mrb[53].mxu1  ;;  %v7450_v13 = vpop.f32.mrb[85].mxu0 }
 0x6af   : > { %v7387_v43 = vadd.f32 %v7386_v61, %v7385_v22  ;;  %v7451_v19 = vadd.f32 %v7450_v13, %v7449_v40  ;;  %v7388_v1 = vpop.f32.mrb[54].mxu1  ;;  %v7452_v15 = vpop.f32.mrb[86].mxu0 }
 0x6b0   : > { %v7389_v47 = vpop.f32.mrb[55].mxu1  ;;  %v7453_v54 = vpop.f32.mrb[87].mxu0 }
 0x6b1   : > { %v6204_v38 = vadd.f32 %v7387_v43, %v9648_v53  ;;  %v7390_v62 = vadd.f32 %v7389_v47, %v7388_v1  ;;  %v7454_v63 = vadd.f32 %v7453_v54, %v7452_v15 }
 0x6b3   : > { %v6301_v4 = vadd.f32 %v7451_v19, %v6204_v38  ;;  %v6207_v48 = vadd.f32 %v7390_v62, %v9648_v53 }
 0x6b5   : > { %v7349_v12 = vmul.f32 -1.442695, %v6301_v4  ;;  %v6304_v30 = vadd.f32 %v7454_v63, %v6207_v48  ;;  %v7391_v3 = vpop.f32.mrb[56].mxu1  ;;  %v7455_v45 = vpop.f32.mrb[88].mxu0 }
 0x6b6   : > { %v7392_v7 = vpop.f32.mrb[57].mxu1  ;;  %v7456_v8 = vpop.f32.mrb[89].mxu0 }
 0x6b7   : > { %7934 = vpow2.f32 %v7349_v12  ;;  %v7350_v5 = vmul.f32 -1.442695, %v6304_v30  ;;  %v7393_v6 = vadd.f32 %v7392_v7, %v7391_v3  ;;  %v7457_v9 = vadd.f32 %v7456_v8, %v7455_v45  ;;  %v7394_v49 = vpop.f32.mrb[58].mxu1  ;;  %v7458_v10 = vpop.f32.mrb[90].mxu0 }
 0x6b8   : > { %v7395_v46 = vpop.f32.mrb[59].mxu1  ;;  %v7459_v11 = vpop.f32.mrb[91].mxu0 }
 0x6b9   : > { %7936 = vpow2.f32 %v7350_v5  ;;  %v6212_v16 = vadd.f32 %v7393_v6, %v9648_v53  ;;  %v7396_v17 = vadd.f32 %v7395_v46, %v7394_v49  ;;  %v7460_v50 = vadd.f32 %v7459_v11, %v7458_v10 }
 0x6bb   : > { %v6309_v0 = vadd.f32 %v7457_v9, %v6212_v16  ;;  %v6215_v35 = vadd.f32 %v7396_v17, %v9648_v53 }
 0x6bd   : > { %v7351_v18 = vmul.f32 -1.442695, %v6309_v0  ;;  %v6312_v20 = vadd.f32 %v7460_v50, %v6215_v35  ;;  %v7397_v23 = vpop.f32.mrb[60].mxu1  ;;  %v7461_v24 = vpop.f32.mrb[92].mxu0 }
 0x6be   : > { %v7398_v25 = vpop.f32.mrb[61].mxu1  ;;  %v7462_v27 = vpop.f32.mrb[93].mxu0 }
 0x6bf   : > { %7938 = vpow2.f32 %v7351_v18  ;;  %v7352_v31 = vmul.f32 -1.442695, %v6312_v20  ;;  %v7399_v28 = vadd.f32 %v7398_v25, %v7397_v23  ;;  %v7463_v29 = vadd.f32 %v7462_v27, %v7461_v24  ;;  %v7400_v32 = vpop.f32.mrb[62].mxu1  ;;  %v7464_v26 = vpop.f32.mrb[94].mxu0 }
 0x6c0   : > { %v7401_v33 = vpop.f32.mrb[63].mxu1  ;;  %v7465_v52 = vpop.f32.mrb[95].mxu0 }
 0x6c1   : > { %v7935_v34 = vpop.eup %7934  ;;  %7940 = vpow2.f32 %v7352_v31  ;;  %v6220_v36 = vadd.f32 %v7399_v28, %v9648_v53  ;;  %v7402_v21 = vadd.f32 %v7401_v33, %v7400_v32  ;;  %v7466_v56 = vadd.f32 %v7465_v52, %v7464_v26 }
 0x6c2   : > { %v6411_v37 = vadd.f32 1.0, %v7935_v34 }
 0x6c3   : > { %v7937_v39 = vpop.eup %7936  ;;  %v6317_v14 = vadd.f32 %v7463_v29, %v6220_v36  ;;  %v6223_v41 = vadd.f32 %v7402_v21, %v9648_v53 }
 0x6c4   : > { %7942 = vrcp.f32 %v6411_v37  ;;  %v6412_v58 = vadd.f32 1.0, %v7937_v39 }
 0x6c5   : > { %v7353_v42 = vmul.f32 -1.442695, %v6317_v14  ;;  %v6320_v2 = vadd.f32 %v7466_v56, %v6223_v41  ;;  %v7403_v51 = vpop.f32.mrb[64].mxu1  ;;  %v7467_v60 = vpop.f32.mrb[96].mxu0 }
 0x6c6   : > { %7944 = vrcp.f32 %v6412_v58  ;;  %v7404_v55 = vpop.f32.mrb[65].mxu1  ;;  %v7468_v57 = vpop.f32.mrb[97].mxu0 }
 0x6c7   : > { %7946 = vpow2.f32 %v7353_v42  ;;  %v7354_v44 = vmul.f32 -1.442695, %v6320_v2  ;;  %v7405_v59 = vadd.f32 %v7404_v55, %v7403_v51  ;;  %v7469_v22 = vadd.f32 %v7468_v57, %v7467_v60  ;;  %v7406_v40 = vpop.f32.mrb[66].mxu1  ;;  %v7470_v61 = vpop.f32.mrb[98].mxu0 }
 0x6c8   : > { %v7407_v13 = vpop.f32.mrb[67].mxu1  ;;  %v7471_v43 = vpop.f32.mrb[99].mxu0 }
 0x6c9   : > { %v7939_v19 = vpop.eup %7938  ;;  %7948 = vpow2.f32 %v7354_v44  ;;  %v6228_v1 = vadd.f32 %v7405_v59, %v9648_v53  ;;  %v7408_v15 = vadd.f32 %v7407_v13, %v7406_v40  ;;  %v7472_v47 = vadd.f32 %v7471_v43, %v7470_v61 }
 0x6ca   : > { %v6413_v54 = vadd.f32 1.0, %v7939_v19 }
 0x6cb   : > { %v7941_v38 = vpop.eup %7940  ;;  %v6325_v62 = vadd.f32 %v7469_v22, %v6228_v1  ;;  %v6231_v63 = vadd.f32 %v7408_v15, %v9648_v53 }
 0x6cc   : > { %7950 = vrcp.f32 %v6413_v54  ;;  %v6414_v4 = vadd.f32 1.0, %v7941_v38 }
 0x6cd   : > { %v7355_v48 = vmul.f32 -1.442695, %v6325_v62  ;;  %v6328_v12 = vadd.f32 %v7472_v47, %v6231_v63 }
 0x6ce   : > { %v7943_v30 = vpop.eup %7942  ;;  %7952 = vrcp.f32 %v6414_v4 }
 0x6cf   : > { %6460 = vst.msk [vmem:[%s9662_s27] sm:$0xff] %vm6459_vm0, %v7943_v30  ;;  %7954 = vpow2.f32 %v7355_v48  ;;  %v7356_v3 = vmul.f32 -1.442695, %v6328_v12 }
 0x6d0   : > { %v7945_v45 = vpop.eup %7944 }
 0x6d1   : > { %v7947_v7 = vpop.eup %7946  ;;  %6461 = vst.msk [vmem:[%s9662_s27 + $0x8] sm:$0xff] %vm6459_vm0, %v7945_v45  ;;  %7956 = vpow2.f32 %v7356_v3 }
 0x6d2   : > { %v6415_v8 = vadd.f32 1.0, %v7947_v7 }
 0x6d3   : > { %v7949_v5 = vpop.eup %7948 }
 0x6d4   : > { %7958 = vrcp.f32 %v6415_v8  ;;  %v6416_v6 = vadd.f32 1.0, %v7949_v5 }
 0x6d6   : > { %v7951_v9 = vpop.eup %7950  ;;  %7960 = vrcp.f32 %v6416_v6 }
 0x6d7   : > { %6462 = vst.msk [vmem:[%s9662_s27 + $0x10] sm:$0xff] %vm6459_vm0, %v7951_v9 }
 0x6d8   : > { %v7953_v49 = vpop.eup %7952 }
 0x6d9   : > { %v7955_v10 = vpop.eup %7954  ;;  %6463 = vst.msk [vmem:[%s9662_s27 + $0x18] sm:$0xff] %vm6459_vm0, %v7953_v49 }
 0x6da   : > { %v6417_v46 = vadd.f32 1.0, %v7955_v10 }
 0x6db   : > { %v7957_v11 = vpop.eup %7956 }
 0x6dc   : > { %7962 = vrcp.f32 %v6417_v46  ;;  %v6418_v16 = vadd.f32 1.0, %v7957_v11 }
 0x6de   : > { %v7959_v17 = vpop.eup %7958  ;;  %7964 = vrcp.f32 %v6418_v16 }
 0x6df   : > { %6464 = vst.msk [vmem:[%s9662_s27 + $0x20] sm:$0xff] %vm6459_vm0, %v7959_v17 }
 0x6e0   : > { %v7961_v50 = vpop.eup %7960 }
 0x6e1   : > { %6465 = vst.msk [vmem:[%s9662_s27 + $0x28] sm:$0xff] %vm6459_vm0, %v7961_v50 }
 0x6e6   : > { %v7963_v0 = vpop.eup %7962 }
 0x6e7   : > { %6466 = vst.msk [vmem:[%s9662_s27 + $0x30] sm:$0xff] %vm6459_vm0, %v7963_v0 }
 0x6e8   : > { %v7965_v35 = vpop.eup %7964  ;;  %v7409_v18 = vpop.f32.mrb[68].mxu1 }
 0x6e9   : > { %v7473_v20 = vpop.f32.mrb[100].mxu0  ;;  %6467 = vst.msk [vmem:[%s9662_s27 + $0x38] sm:$0xff] %vm6459_vm0, %v7965_v35  ;;  %v7410_v23 = vpop.f32.mrb[69].mxu1 }
 0x6ea   : > { %v7474_v24 = vpop.f32.mrb[101].mxu0  ;;  %v7411_v25 = vadd.f32 %v7410_v23, %v7409_v18  ;;  %v7412_v31 = vpop.f32.mrb[70].mxu1 }
 0x6eb   : > { %v7475_v27 = vadd.f32 %v7474_v24, %v7473_v20  ;;  %v7476_v28 = vpop.f32.mrb[102].mxu0  ;;  %v7413_v29 = vpop.f32.mrb[71].mxu1 }
 0x6ec   : > { %v7477_v32 = vpop.f32.mrb[103].mxu0  ;;  %v6236_v26 = vadd.f32 %v7411_v25, %v9648_v53  ;;  %v7414_v33 = vadd.f32 %v7413_v29, %v7412_v31 }
 0x6ed   : > { %v7478_v52 = vadd.f32 %v7477_v32, %v7476_v28 }
 0x6ee   : > { %v6333_v34 = vadd.f32 %v7475_v27, %v6236_v26  ;;  %v6239_v36 = vadd.f32 %v7414_v33, %v9648_v53 }
 0x6f0   : > { %v7357_v21 = vmul.f32 -1.442695, %v6333_v34  ;;  %v6336_v56 = vadd.f32 %v7478_v52, %v6239_v36  ;;  %v7415_v37 = vpop.f32.mrb[72].mxu1  ;;  %v7479_v39 = vpop.f32.mrb[104].mxu0 }
 0x6f1   : > { %v7416_v14 = vpop.f32.mrb[73].mxu1  ;;  %v7480_v41 = vpop.f32.mrb[105].mxu0 }
 0x6f2   : > { %7966 = vpow2.f32 %v7357_v21  ;;  %v7358_v58 = vmul.f32 -1.442695, %v6336_v56  ;;  %v7417_v42 = vadd.f32 %v7416_v14, %v7415_v37  ;;  %v7481_v2 = vadd.f32 %v7480_v41, %v7479_v39  ;;  %v7418_v51 = vpop.f32.mrb[74].mxu1  ;;  %v7482_v60 = vpop.f32.mrb[106].mxu0 }
 0x6f3   : > { %v7419_v55 = vpop.f32.mrb[75].mxu1  ;;  %v7483_v57 = vpop.f32.mrb[107].mxu0 }
 0x6f4   : > { %7968 = vpow2.f32 %v7358_v58  ;;  %v6244_v44 = vadd.f32 %v7417_v42, %v9648_v53  ;;  %v7420_v59 = vadd.f32 %v7419_v55, %v7418_v51  ;;  %v7484_v22 = vadd.f32 %v7483_v57, %v7482_v60 }
 0x6f6   : > { %v6341_v40 = vadd.f32 %v7481_v2, %v6244_v44  ;;  %v6247_v61 = vadd.f32 %v7420_v59, %v9648_v53 }
 0x6f8   : > { %v7359_v13 = vmul.f32 -1.442695, %v6341_v40  ;;  %v6344_v43 = vadd.f32 %v7484_v22, %v6247_v61 }
 0x6fa   : > { %7970 = vpow2.f32 %v7359_v13  ;;  %v7360_v19 = vmul.f32 -1.442695, %v6344_v43 }
 0x6fc   : > { %v7967_v1 = vpop.eup %7966  ;;  %7972 = vpow2.f32 %v7360_v19 }
 0x6fd   : > { %v6419_v15 = vadd.f32 1.0, %v7967_v1 }
 0x6fe   : > { %v7969_v47 = vpop.eup %7968 }
 0x6ff   : > { %7974 = vrcp.f32 %v6419_v15  ;;  %v6420_v54 = vadd.f32 1.0, %v7969_v47 }
 0x701   : > { %7976 = vrcp.f32 %v6420_v54 }
 0x704   : > { %v7971_v38 = vpop.eup %7970 }
 0x705   : > { %v6421_v62 = vadd.f32 1.0, %v7971_v38 }
 0x706   : > { %v7973_v63 = vpop.eup %7972 }
 0x707   : > { %7978 = vrcp.f32 %v6421_v62  ;;  %v6422_v4 = vadd.f32 1.0, %v7973_v63 }
 0x709   : > { %v7975_v48 = vpop.eup %7974  ;;  %7980 = vrcp.f32 %v6422_v4 }
 0x70a   : > { %6468 = vst.msk [vmem:[%s9662_s27 + $0x40] sm:$0xff] %vm6459_vm0, %v7975_v48 }
 0x70b   : > { %v7977_v12 = vpop.eup %7976 }
 0x70c   : > { %6469 = vst.msk [vmem:[%s9662_s27 + $0x48] sm:$0xff] %vm6459_vm0, %v7977_v12 }
 0x711   : > { %v7979_v30 = vpop.eup %7978 }
 0x712   : > { %6470 = vst.msk [vmem:[%s9662_s27 + $0x50] sm:$0xff] %vm6459_vm0, %v7979_v30 }
 0x713   : > { %v7981_v3 = vpop.eup %7980 }
 0x714   : > { %6471 = vst.msk [vmem:[%s9662_s27 + $0x58] sm:$0xff] %vm6459_vm0, %v7981_v3 }
 0x768   : > { %v7421_v45 = vpop.f32.mrb[76].mxu1 }
 0x769   : > { %v7422_v7 = vpop.f32.mrb[77].mxu1 }
 0x76a   : > { %v7423_v8 = vadd.f32 %v7422_v7, %v7421_v45  ;;  %v7424_v5 = vpop.f32.mrb[78].mxu1 }
 0x76b   : > { %v7425_v6 = vpop.f32.mrb[79].mxu1 }
 0x76c   : > { %v7426_v9 = vadd.f32 %v7425_v6, %v7424_v5  ;;  %v6252_v35 = vadd.f32 %v7423_v8, %v9648_v53 }
 0x76e   : > { %v6255_v24 = vadd.f32 %v7426_v9, %v9648_v53 }
 0x770   : > { %v7427_v49 = vpop.f32.mrb[80].mxu1 }
 0x771   : > { %v7428_v10 = vpop.f32.mrb[81].mxu1 }
 0x772   : > { %v7429_v46 = vadd.f32 %v7428_v10, %v7427_v49  ;;  %v7430_v11 = vpop.f32.mrb[82].mxu1 }
 0x773   : > { %v7431_v16 = vpop.f32.mrb[83].mxu1 }
 0x774   : > { %v7432_v17 = vadd.f32 %v7431_v16, %v7430_v11  ;;  %v6260_v33 = vadd.f32 %v7429_v46, %v9648_v53 }
 0x776   : > { %v6263_v21 = vadd.f32 %v7432_v17, %v9648_v53 }
 0x778   : > { %v7485_v50 = vpop.f32.mrb[84].mxu1 }
 0x779   : > { %v7486_v0 = vpop.f32.mrb[85].mxu1 }
 0x77a   : > { %v7487_v18 = vadd.f32 %v7486_v0, %v7485_v50  ;;  %v7488_v20 = vpop.f32.mrb[86].mxu1 }
 0x77b   : > { %v7489_v23 = vpop.f32.mrb[87].mxu1 }
 0x77c   : > { %v6349_v25 = vadd.f32 %v7487_v18, %v6252_v35  ;;  %v7490_v27 = vadd.f32 %v7489_v23, %v7488_v20 }
 0x77e   : > { %v7361_v31 = vmul.f32 -1.442695, %v6349_v25  ;;  %v6352_v28 = vadd.f32 %v7490_v27, %v6255_v24 }
 0x780   : > { %7982 = vpow2.f32 %v7361_v31  ;;  %v7362_v29 = vmul.f32 -1.442695, %v6352_v28  ;;  %v7491_v32 = vpop.f32.mrb[88].mxu1 }
 0x781   : > { %v7492_v26 = vpop.f32.mrb[89].mxu1 }
 0x782   : > { %7984 = vpow2.f32 %v7362_v29  ;;  %v7493_v52 = vadd.f32 %v7492_v26, %v7491_v32  ;;  %v7494_v34 = vpop.f32.mrb[90].mxu1 }
 0x783   : > { %v7495_v36 = vpop.f32.mrb[91].mxu1 }
 0x784   : > { %v6357_v56 = vadd.f32 %v7493_v52, %v6260_v33  ;;  %v7496_v37 = vadd.f32 %v7495_v36, %v7494_v34 }
 0x786   : > { %v7363_v39 = vmul.f32 -1.442695, %v6357_v56  ;;  %v6360_v14 = vadd.f32 %v7496_v37, %v6263_v21 }
 0x788   : > { %7986 = vpow2.f32 %v7363_v39  ;;  %v7364_v41 = vmul.f32 -1.442695, %v6360_v14 }
 0x78a   : > { %v7983_v58 = vpop.eup %7982  ;;  %7988 = vpow2.f32 %v7364_v41 }
 0x78b   : > { %v6423_v42 = vadd.f32 1.0, %v7983_v58 }
 0x78c   : > { %v7985_v2 = vpop.eup %7984 }
 0x78d   : > { %7990 = vrcp.f32 %v6423_v42  ;;  %v6424_v51 = vadd.f32 1.0, %v7985_v2 }
 0x78f   : > { %7992 = vrcp.f32 %v6424_v51 }
 0x792   : > { %v7987_v60 = vpop.eup %7986 }
 0x793   : > { %v6425_v55 = vadd.f32 1.0, %v7987_v60 }
 0x794   : > { %v7989_v53 = vpop.eup %7988 }
 0x795   : > { %7994 = vrcp.f32 %v6425_v55  ;;  %v6426_v57 = vadd.f32 1.0, %v7989_v53 }
 0x797   : > { %v7991_v44 = vpop.eup %7990  ;;  %7996 = vrcp.f32 %v6426_v57 }
 0x798   : > { %6472 = vst.msk [vmem:[%s9662_s27 + $0x60] sm:$0xff] %vm6459_vm0, %v7991_v44 }
 0x799   : > { %v7993_v59 = vpop.eup %7992 }
 0x79a   : > { %6473 = vst.msk [vmem:[%s9662_s27 + $0x68] sm:$0xff] %vm6459_vm0, %v7993_v59 }
 0x79f   : > { %v7995_v22 = vpop.eup %7994 }
 0x7a0   : > { %6474 = vst.msk [vmem:[%s9662_s27 + $0x70] sm:$0xff] %vm6459_vm0, %v7995_v22 }
 0x7a1   : > { %v7997_v40 = vpop.eup %7996 }
 0x7a2   : > { %6475 = vst.msk [vmem:[%s9662_s27 + $0x78] sm:$0xff] %vm6459_vm0, %v7997_v40 }
 0x7a3 PF: > { %s9783_s20 = sld [smem:[#allocation22_spill]]  ;;  %p22_p5 = scmp.ge.s32.totalorder %s8528_s9, 6  }
 0x7a4   : > { %s9784_s17 = smov %s8300_s18  ;;  %s9785_s18 = smov %s8304_s19 }
 0x7a5   :  { %24 = sbr.rel (!%p22_p5) target bundleno = 14 (0xe), region = 142 }
 0x7a9   : > { %s9786_s19 = smov %s9783_s20  ;;  %s9787_s20 = smov %s8528_s9 }
 0x7ac   :  { %6498 = vsyncpa [#allocation4], 1 }
 0x7ad   :  { %6500 = vsyncpa [#allocation4 + $0x1], 1 }
 0x7ae   :  { %6501 = vsyncpa [#allocation6], 1 }
 0x7af   :  { %6502 = vsyncpa [#allocation11], 1 }
 0x7b0   :  { %6503 = vsyncpa [#allocation14], 1 }

</bundles_post_ra>
